<compile_context>
chip_gen: v7x
topology: tpu7x:2x2x1
jax: 0.10.0
libtpu: 0.0.40
codegen_flags: <defaults>
</compile_context>

<pallas_src>
import functools

import jax
import jax.numpy as jnp
from jax.experimental import pallas as pl
from jax.experimental.pallas import tpu as pltpu


def dit_block_kernel(x_ref, mod_ref,
                     w_qkv_ref, b_qkv_ref,
                     w_proj_ref, b_proj_ref,
                     w_fc1_ref, b_fc1_ref,
                     w_fc2_ref, b_fc2_ref,
                     o_ref,
                     *, num_heads, eps=1e-6):
    f32 = jnp.float32
    bf16 = jnp.bfloat16

    x = x_ref[...]                     # (BT, N, C) f32 residual stream
    mod = mod_ref[...]                 # (BT, 6, C) f32, scales already hold 1+scale
    BT, N, C = x.shape
    H = num_heads
    hd = C // H
    attn_scale = hd ** -0.5

    shift_msa    = mod[:, 0:1, :]
    scale_msa_p1 = mod[:, 1:2, :]
    gate_msa     = mod[:, 2:3, :]
    shift_mlp    = mod[:, 3:4, :]
    scale_mlp_p1 = mod[:, 4:5, :]
    gate_mlp     = mod[:, 5:6, :]

    def layernorm(v):                  # LayerNorm, no affine, eps=1e-6 (f32 VPU)
        mu = jnp.mean(v, axis=-1, keepdims=True)
        var = jnp.mean(jnp.square(v - mu), axis=-1, keepdims=True)
        return (v - mu) * jax.lax.rsqrt(var + eps)

    # --- attention branch ---
    xm = layernorm(x) * scale_msa_p1 + shift_msa                     # modulate
    qkv = (jnp.dot(xm.reshape(BT * N, C).astype(bf16), w_qkv_ref[...],
                   preferred_element_type=f32) + b_qkv_ref[...]
           ).reshape(BT, N, 3 * C)                                   # M = BT*N

    def split_heads(t):                # (BT, N, C) -> (BT*H, N, hd), leading batch
        return jnp.swapaxes(t.reshape(BT, N, H, hd), 1, 2).reshape(BT * H, N, hd)

    q = split_heads(qkv[..., 0:C] * attn_scale).astype(bf16)         # pre-scaled q
    k = split_heads(qkv[..., C:2 * C]).astype(bf16)
    v = split_heads(qkv[..., 2 * C:3 * C]).astype(bf16)

    # Batched over g = BT*H (leading batch dim -> safe Mosaic batched matmul).
    # TODO(synk): for N >= ~1024 switch to a KV-tiled online softmax so the
    # (BT*H, N, N) score tensor never materializes (required for v7x 64 MiB VMEM).
    s = jnp.einsum('gqd,gkd->gqk', q, k, preferred_element_type=f32)
    s = s - jnp.max(s, axis=-1, keepdims=True)
    p = jnp.exp(s)
    p = p * pl.reciprocal(jnp.sum(p, axis=-1, keepdims=True), approx=True)
    o_h = jnp.einsum('gqk,gkd->gqd', p.astype(bf16), v,
                     preferred_element_type=f32)                     # (BT*H, N, hd)

    # Head merge + output projection with M = BT*N.
    # TODO(synk): fuse the head merge into the projection ('hqd,hdc->qc') once
    # multi-contracting-dim dot_general lowers reliably in Mosaic; also pad/pack
    # hd<128 heads to improve lane density in the attention einsums.
    attn = jnp.swapaxes(o_h.reshape(BT, H, N, hd), 1, 2).reshape(BT * N, C)
    attn = (jnp.dot(attn.astype(bf16), w_proj_ref[...],
                    preferred_element_type=f32) + b_proj_ref[...]
            ).reshape(BT, N, C)
    x = x + gate_msa * attn

    # --- MLP branch ---
    # TODO(synk): chunk the mlp_hidden dimension (fc1/fc2 + h1 slice) at DiT-XL
    # scale so only a (C, tile)/(tile, C) weight slice and (BT*N, tile) h1 live.
    xm2 = layernorm(x) * scale_mlp_p1 + shift_mlp
    h1 = jnp.dot(xm2.reshape(BT * N, C).astype(bf16), w_fc1_ref[...],
                 preferred_element_type=f32) + b_fc1_ref[...]
    # GELU with tanh approximation (matches nn.GELU(approximate='tanh')).
    h1 = 0.5 * h1 * (1.0 + jnp.tanh(0.7978845608028654
                                    * (h1 + 0.044715 * h1 * h1 * h1)))
    h2 = (jnp.dot(h1.astype(bf16), w_fc2_ref[...],
                  preferred_element_type=f32) + b_fc2_ref[...]
          ).reshape(BT, N, C)
    x = x + gate_mlp * h2

    o_ref[...] = x


WEIGHT_ORDER = ("w_qkv", "b_qkv", "w_proj", "b_proj",
                "w_fc1", "b_fc1", "w_fc2", "b_fc2")


def _pick_batch_tile(B, N):
    """Pack batch elements per grid step so the matmul M dim is >= ~256."""
    bt = min(B, max(1, -(-256 // N)))
    while B % bt:
        bt -= 1
    return bt


def dit_block(x, c, params, num_heads):
    B, N, C = x.shape
    f32 = jnp.float32

    # adaLN modulation hoisted out of the kernel (plain XLA): M=1 matmul would
    # starve the MXU and w_ada is the largest weight.  Pre-add "+1" to the two
    # scale rows so the kernel only does multiply-add.
    c_act = c * jax.nn.sigmoid(c)
    ada = (c_act @ params["w_ada"] + params["b_ada"][0]).reshape(B, 6, C)
    ada = (ada + jnp.array([0., 1., 0., 0., 1., 0.], f32)[None, :, None]).astype(f32)

    # Weights feed the MXU only -> bf16 (halves VMEM residency / DMA bytes);
    # biases stay f32 (added after the f32 accumulation).
    ops = {k: (params[k].astype(jnp.bfloat16) if k.startswith("w")
               else params[k].astype(f32))
           for k in WEIGHT_ORDER}

    BT = _pick_batch_tile(B, N)
    grid = (B // BT,)
    kernel = functools.partial(dit_block_kernel, num_heads=num_heads)
    args = (x.astype(f32), ada) + tuple(ops[k] for k in WEIGHT_ORDER)

    def build(single_buffer_weights):
        def weight_spec(arr):
            nd = arr.ndim
            idx = lambda b, _nd=nd: (0,) * _nd
            if single_buffer_weights:
                # Constant index_map -> the second pipeline buffer is pure waste.
                return pl.BlockSpec(arr.shape, idx, pipeline_mode=pl.Buffered(1))
            return pl.BlockSpec(arr.shape, idx)

        in_specs = [
            pl.BlockSpec((BT, N, C), lambda b: (b, 0, 0)),   # x: BT batches/step
            pl.BlockSpec((BT, 6, C), lambda b: (b, 0, 0)),   # modulation rows
        ] + [weight_spec(ops[k]) for k in WEIGHT_ORDER]

        # VMEM budget: weights (single/double buffered) + double-buffered x/mod/
        # out tiles + live f32 activations (qkv, scores, probs, h1) + slack,
        # capped below physical VMEM per generation (leaves compiler headroom).
        wbuf = 1 if single_buffer_weights else 2
        weight_bytes = wbuf * sum(ops[k].size * ops[k].dtype.itemsize
                                  for k in WEIGHT_ORDER)
        io_bytes = 2 * (2 * BT * N * C + BT * 6 * C) * 4
        act_bytes = (BT * N * 3 * C                 # qkv
                     + 2 * BT * num_heads * N * N   # scores + probs
                     + BT * N * 4 * C               # h1
                     + 4 * BT * N * C) * 4          # misc temporaries
        try:
            cap = int(pltpu.get_tpu_info().vmem_capacity_bytes * 7 // 8)
        except Exception:
            cap = 48 << 20
        vmem_budget = int(min(max(weight_bytes + io_bytes + act_bytes + (4 << 20),
                                  16 << 20), cap))

        return pl.pallas_call(
            kernel,
            out_shape=jax.ShapeDtypeStruct((B, N, C), f32),
            grid=grid,
            in_specs=in_specs,
            out_specs=pl.BlockSpec((BT, N, C), lambda b: (b, 0, 0)),
            compiler_params=pltpu.CompilerParams(
                dimension_semantics=("parallel",),
                vmem_limit_bytes=vmem_budget),
        )

    try:
        out = build(True)(*args)
        return jax.block_until_ready(out)
    except Exception:
        # Fallback if this jax/mosaic version rejects pipeline_mode=Buffered(1).
        return build(False)(*args)


def dit_block_ref(x, c, p, num_heads):
    """Pure-JAX f32 reference mirroring the PyTorch DiTBlock forward."""
    B, N, C = x.shape
    hd = C // num_heads
    ca = c * jax.nn.sigmoid(c)
    ada = ca @ p["w_ada"] + p["b_ada"][0]
    sm, scm, gm, sp, scp, gp = jnp.split(ada, 6, axis=1)

    def ln(v):
        mu = v.mean(-1, keepdims=True)
        var = ((v - mu) ** 2).mean(-1, keepdims=True)
        return (v - mu) / jnp.sqrt(var + 1e-6)

    xm = ln(x) * (1 + scm[:, None, :]) + sm[:, None, :]
    qkv = xm @ p["w_qkv"] + p["b_qkv"][0]
    qkv = qkv.reshape(B, N, 3, num_heads, hd).transpose(2, 0, 3, 1, 4)
    q, k, v = qkv[0], qkv[1], qkv[2]
    att = jax.nn.softmax((q * hd ** -0.5) @ jnp.swapaxes(k, -2, -1), axis=-1)
    o = (att @ v).transpose(0, 2, 1, 3).reshape(B, N, C)
    o = o @ p["w_proj"] + p["b_proj"][0]
    x = x + gm[:, None, :] * o
    xm2 = ln(x) * (1 + scp[:, None, :]) + sp[:, None, :]
    h = xm2 @ p["w_fc1"] + p["b_fc1"][0]
    h = 0.5 * h * (1 + jnp.tanh(0.7978845608028654 * (h + 0.044715 * h ** 3)))
    h = h @ p["w_fc2"] + p["b_fc2"][0]
    return x + gp[:, None, :] * h


def init_params(key, hidden, mlp_ratio=4.0):
    mlp_hidden = int(hidden * mlp_ratio)
    ks = jax.random.split(key, 10)
    std = 0.02
    return {
        "w_ada":  std * jax.random.normal(ks[0], (hidden, 6 * hidden), jnp.float32),
        "b_ada":  std * jax.random.normal(ks[1], (1, 6 * hidden), jnp.float32),
        "w_qkv":  std * jax.random.normal(ks[2], (hidden, 3 * hidden), jnp.float32),
        "b_qkv":  std * jax.random.normal(ks[3], (1, 3 * hidden), jnp.float32),
        "w_proj": std * jax.random.normal(ks[4], (hidden, hidden), jnp.float32),
        "b_proj": std * jax.random.normal(ks[5], (1, hidden), jnp.float32),
        "w_fc1":  std * jax.random.normal(ks[6], (hidden, mlp_hidden), jnp.float32),
        "b_fc1":  std * jax.random.normal(ks[7], (1, mlp_hidden), jnp.float32),
        "w_fc2":  std * jax.random.normal(ks[8], (mlp_hidden, hidden), jnp.float32),
        "b_fc2":  std * jax.random.normal(ks[9], (1, hidden), jnp.float32),
    }


if __name__ == "__main__":
    B, N, C = 2, 8, 32          # batch, sequence, hidden
    num_heads = 4               # head_dim = 8

    key = jax.random.PRNGKey(0)
    kx, kc, kp = jax.random.split(key, 3)
    x = jax.random.normal(kx, (B, N, C), jnp.float32)
    c = jax.random.normal(kc, (B, C), jnp.float32)
    params = init_params(kp, C)

    out = dit_block(x, c, params, num_heads)
    out = jax.block_until_ready(out)

    ref = dit_block_ref(x, c, params, num_heads)
    assert out.shape == (B, N, C)
    # bf16 MXU inputs + approx reciprocal -> compare to f32 ref at loosened tol.
    assert jnp.allclose(out, ref, atol=1e-2, rtol=1e-2), (
        float(jnp.max(jnp.abs(out - ref))))

    print("KERNEL_OK")
</pallas_src>

<mosaic_0001>
module attributes {stable_mosaic.version = 11 : i64} {
  func.func @dit_block_kernel(%arg0: i32, %arg1: memref<2x8x32xf32, #tpu.memory_space<vmem>>, %arg2: memref<2x6x32xf32, #tpu.memory_space<vmem>>, %arg3: memref<32x96xbf16, #tpu.memory_space<vmem>>, %arg4: memref<1x96xf32, #tpu.memory_space<vmem>>, %arg5: memref<32x32xbf16, #tpu.memory_space<vmem>>, %arg6: memref<1x32xf32, #tpu.memory_space<vmem>>, %arg7: memref<32x128xbf16, #tpu.memory_space<vmem>>, %arg8: memref<1x128xf32, #tpu.memory_space<vmem>>, %arg9: memref<128x32xbf16, #tpu.memory_space<vmem>>, %arg10: memref<1x32xf32, #tpu.memory_space<vmem>>, %arg11: memref<2x8x32xf32, #tpu.memory_space<vmem>>) attributes {dimension_semantics = [#tpu.dimension_semantics<parallel>], iteration_bounds = array<i64: 1>, scalar_prefetch = 0 : i64, scratch_operands = 0 : i64, tpu.core_type = #tpu.core_type<tc>, window_params = [{transform_indices = @transform_0, window_bounds = array<i64: 2, 8, 32>}, {transform_indices = @transform_1, window_bounds = array<i64: 2, 6, 32>}, {pipeline_mode = #tpu.pipeline_mode<synchronous>, transform_indices = @transform_2, window_bounds = array<i64: 32, 96>}, {pipeline_mode = #tpu.pipeline_mode<synchronous>, transform_indices = @transform_3, window_bounds = array<i64: 1, 96>}, {pipeline_mode = #tpu.pipeline_mode<synchronous>, transform_indices = @transform_4, window_bounds = array<i64: 32, 32>}, {pipeline_mode = #tpu.pipeline_mode<synchronous>, transform_indices = @transform_5, window_bounds = array<i64: 1, 32>}, {pipeline_mode = #tpu.pipeline_mode<synchronous>, transform_indices = @transform_6, window_bounds = array<i64: 32, 128>}, {pipeline_mode = #tpu.pipeline_mode<synchronous>, transform_indices = @transform_7, window_bounds = array<i64: 1, 128>}, {pipeline_mode = #tpu.pipeline_mode<synchronous>, transform_indices = @transform_8, window_bounds = array<i64: 128, 32>}, {pipeline_mode = #tpu.pipeline_mode<synchronous>, transform_indices = @transform_9, window_bounds = array<i64: 1, 32>}, {transform_indices = @transform_10, window_bounds = array<i64: 2, 8, 32>}]} {
    %c0 = arith.constant 0 : index
    %c0_0 = arith.constant 0 : index
    %c0_1 = arith.constant 0 : index
    %0 = vector.load %arg1[%c0, %c0_0, %c0_1] : memref<2x8x32xf32, #tpu.memory_space<vmem>>, vector<2x8x32xf32>
    %c0_2 = arith.constant 0 : index
    %c0_3 = arith.constant 0 : index
    %c0_4 = arith.constant 0 : index
    %1 = vector.load %arg2[%c0_2, %c0_3, %c0_4] : memref<2x6x32xf32, #tpu.memory_space<vmem>>, vector<2x6x32xf32>
    %2 = vector.extract_strided_slice %1 {offsets = [0, 0, 0], sizes = [2, 1, 32], strides = [1, 1, 1]} : vector<2x6x32xf32> to vector<2x1x32xf32>
    %3 = vector.extract_strided_slice %1 {offsets = [0, 1, 0], sizes = [2, 1, 32], strides = [1, 1, 1]} : vector<2x6x32xf32> to vector<2x1x32xf32>
    %4 = vector.extract_strided_slice %1 {offsets = [0, 2, 0], sizes = [2, 1, 32], strides = [1, 1, 1]} : vector<2x6x32xf32> to vector<2x1x32xf32>
    %5 = vector.extract_strided_slice %1 {offsets = [0, 3, 0], sizes = [2, 1, 32], strides = [1, 1, 1]} : vector<2x6x32xf32> to vector<2x1x32xf32>
    %6 = vector.extract_strided_slice %1 {offsets = [0, 4, 0], sizes = [2, 1, 32], strides = [1, 1, 1]} : vector<2x6x32xf32> to vector<2x1x32xf32>
    %7 = vector.extract_strided_slice %1 {offsets = [0, 5, 0], sizes = [2, 1, 32], strides = [1, 1, 1]} : vector<2x6x32xf32> to vector<2x1x32xf32>
    %cst = arith.constant dense<0.000000e+00> : vector<2x8xf32>
    %8 = vector.multi_reduction <add>, %0, %cst [2] : vector<2x8x32xf32> to vector<2x8xf32>
    %9 = vector.shape_cast %8 : vector<2x8xf32> to vector<2x8x1xf32>
    %cst_5 = arith.constant 3.200000e+01 : f32
    %10 = vector.broadcast %cst_5 : f32 to vector<2x8x1xf32>
    %11 = arith.divf %9, %10 : vector<2x8x1xf32>
    %12 = vector.broadcast %11 : vector<2x8x1xf32> to vector<2x8x32xf32>
    %13 = arith.subf %0, %12 : vector<2x8x32xf32>
    %14 = arith.mulf %13, %13 : vector<2x8x32xf32>
    %cst_6 = arith.constant dense<0.000000e+00> : vector<2x8xf32>
    %15 = vector.multi_reduction <add>, %14, %cst_6 [2] : vector<2x8x32xf32> to vector<2x8xf32>
    %16 = vector.shape_cast %15 : vector<2x8xf32> to vector<2x8x1xf32>
    %cst_7 = arith.constant 3.200000e+01 : f32
    %17 = vector.broadcast %cst_7 : f32 to vector<2x8x1xf32>
    %18 = arith.divf %16, %17 : vector<2x8x1xf32>
    %19 = vector.broadcast %11 : vector<2x8x1xf32> to vector<2x8x32xf32>
    %20 = arith.subf %0, %19 : vector<2x8x32xf32>
    %cst_8 = arith.constant 9.99999997E-7 : f32
    %21 = vector.broadcast %cst_8 : f32 to vector<2x8x1xf32>
    %22 = arith.addf %18, %21 : vector<2x8x1xf32>
    %23 = math.rsqrt %22 : vector<2x8x1xf32>
    %24 = vector.broadcast %23 : vector<2x8x1xf32> to vector<2x8x32xf32>
    %25 = arith.mulf %20, %24 : vector<2x8x32xf32>
    %26 = vector.broadcast %3 : vector<2x1x32xf32> to vector<2x8x32xf32>
    %27 = arith.mulf %25, %26 : vector<2x8x32xf32>
    %28 = vector.broadcast %2 : vector<2x1x32xf32> to vector<2x8x32xf32>
    %29 = arith.addf %27, %28 : vector<2x8x32xf32>
    %30 = vector.shape_cast %29 : vector<2x8x32xf32> to vector<16x32xf32>
    %31 = arith.truncf %30 : vector<16x32xf32> to vector<16x32xbf16>
    %c0_9 = arith.constant 0 : index
    %c0_10 = arith.constant 0 : index
    %32 = vector.load %arg3[%c0_9, %c0_10] : memref<32x96xbf16, #tpu.memory_space<vmem>>, vector<32x96xbf16>
    %cst_11 = arith.constant dense<0.000000e+00> : vector<16x96xf32>
    %33 = tpu.matmul %31, %32, %cst_11 {dimension_numbers = #tpu.dot_dimension_numbers<[1], [0], [0], [1], [0, 0, 1, 1], [], []>} : vector<16x32xbf16>, vector<32x96xbf16>, vector<16x96xf32> -> vector<16x96xf32>
    %c0_12 = arith.constant 0 : index
    %c0_13 = arith.constant 0 : index
    %34 = vector.load %arg4[%c0_12, %c0_13] : memref<1x96xf32, #tpu.memory_space<vmem>>, vector<1x96xf32>
    %35 = vector.broadcast %34 : vector<1x96xf32> to vector<16x96xf32>
    %36 = arith.addf %33, %35 : vector<16x96xf32>
    %37 = vector.shape_cast %36 : vector<16x96xf32> to vector<2x8x96xf32>
    %38 = vector.extract_strided_slice %37 {offsets = [0, 0, 0], sizes = [2, 8, 32], strides = [1, 1, 1]} : vector<2x8x96xf32> to vector<2x8x32xf32>
    %cst_14 = arith.constant 0.353553385 : f32
    %39 = vector.broadcast %cst_14 : f32 to vector<2x8x32xf32>
    %40 = arith.mulf %38, %39 : vector<2x8x32xf32>
    %41 = vector.shape_cast %40 : vector<2x8x32xf32> to vector<2x8x4x8xf32>
    %42 = tpu.transpose %41, [0, 2, 1, 3] : vector<2x8x4x8xf32> -> vector<2x4x8x8xf32>
    %43 = vector.shape_cast %42 : vector<2x4x8x8xf32> to vector<8x8x8xf32>
    %44 = arith.truncf %43 : vector<8x8x8xf32> to vector<8x8x8xbf16>
    %45 = vector.extract_strided_slice %37 {offsets = [0, 0, 32], sizes = [2, 8, 32], strides = [1, 1, 1]} : vector<2x8x96xf32> to vector<2x8x32xf32>
    %46 = vector.shape_cast %45 : vector<2x8x32xf32> to vector<2x8x4x8xf32>
    %47 = tpu.transpose %46, [0, 2, 1, 3] : vector<2x8x4x8xf32> -> vector<2x4x8x8xf32>
    %48 = vector.shape_cast %47 : vector<2x4x8x8xf32> to vector<8x8x8xf32>
    %49 = arith.truncf %48 : vector<8x8x8xf32> to vector<8x8x8xbf16>
    %50 = vector.extract_strided_slice %37 {offsets = [0, 0, 64], sizes = [2, 8, 32], strides = [1, 1, 1]} : vector<2x8x96xf32> to vector<2x8x32xf32>
    %51 = vector.shape_cast %50 : vector<2x8x32xf32> to vector<2x8x4x8xf32>
    %52 = tpu.transpose %51, [0, 2, 1, 3] : vector<2x8x4x8xf32> -> vector<2x4x8x8xf32>
    %53 = vector.shape_cast %52 : vector<2x4x8x8xf32> to vector<8x8x8xf32>
    %54 = arith.truncf %53 : vector<8x8x8xf32> to vector<8x8x8xbf16>
    "tpu.trace_start"() <{level = 10 : i32, message = "gqd,gkd->gqk"}> : () -> ()
    %cst_15 = arith.constant dense<0.000000e+00> : vector<8x8x8xf32>
    %55 = tpu.matmul %44, %49, %cst_15 {dimension_numbers = #tpu.dot_dimension_numbers<[2], [2], [1], [1], [0, 0, 0, 1, 1, 1], [0], [0]>} : vector<8x8x8xbf16>, vector<8x8x8xbf16>, vector<8x8x8xf32> -> vector<8x8x8xf32>
    "tpu.trace_stop"() : () -> ()
    %cst_16 = arith.constant dense<0xFF800000> : vector<8x8xf32>
    %56 = vector.multi_reduction <maximumf>, %55, %cst_16 [2] : vector<8x8x8xf32> to vector<8x8xf32>
    %57 = vector.shape_cast %56 : vector<8x8xf32> to vector<8x8x1xf32>
    %58 = vector.broadcast %57 : vector<8x8x1xf32> to vector<8x8x8xf32>
    %59 = arith.subf %55, %58 : vector<8x8x8xf32>
    %60 = math.exp %59 : vector<8x8x8xf32>
    %cst_17 = arith.constant dense<0.000000e+00> : vector<8x8xf32>
    %61 = vector.multi_reduction <add>, %60, %cst_17 [2] : vector<8x8x8xf32> to vector<8x8xf32>
    %62 = vector.shape_cast %61 : vector<8x8xf32> to vector<8x8x1xf32>
    %63 = tpu.reciprocal %62 {approx = true} : vector<8x8x1xf32> -> vector<8x8x1xf32>
    %64 = vector.broadcast %63 : vector<8x8x1xf32> to vector<8x8x8xf32>
    %65 = arith.mulf %60, %64 : vector<8x8x8xf32>
    %66 = arith.truncf %65 : vector<8x8x8xf32> to vector<8x8x8xbf16>
    "tpu.trace_start"() <{level = 10 : i32, message = "gqk,gkd->gqd"}> : () -> ()
    %cst_18 = arith.constant dense<0.000000e+00> : vector<8x8x8xf32>
    %67 = tpu.matmul %66, %54, %cst_18 {dimension_numbers = #tpu.dot_dimension_numbers<[2], [1], [1], [2], [0, 0, 0, 1, 1, 2], [0], [0]>} : vector<8x8x8xbf16>, vector<8x8x8xbf16>, vector<8x8x8xf32> -> vector<8x8x8xf32>
    "tpu.trace_stop"() : () -> ()
    %68 = vector.shape_cast %67 : vector<8x8x8xf32> to vector<2x4x8x8xf32>
    %69 = tpu.transpose %68, [0, 2, 1, 3] : vector<2x4x8x8xf32> -> vector<2x8x4x8xf32>
    %70 = vector.shape_cast %69 : vector<2x8x4x8xf32> to vector<16x32xf32>
    %71 = arith.truncf %70 : vector<16x32xf32> to vector<16x32xbf16>
    %c0_19 = arith.constant 0 : index
    %c0_20 = arith.constant 0 : index
    %72 = vector.load %arg5[%c0_19, %c0_20] : memref<32x32xbf16, #tpu.memory_space<vmem>>, vector<32x32xbf16>
    %cst_21 = arith.constant dense<0.000000e+00> : vector<16x32xf32>
    %73 = tpu.matmul %71, %72, %cst_21 {dimension_numbers = #tpu.dot_dimension_numbers<[1], [0], [0], [1], [0, 0, 1, 1], [], []>} : vector<16x32xbf16>, vector<32x32xbf16>, vector<16x32xf32> -> vector<16x32xf32>
    %c0_22 = arith.constant 0 : index
    %c0_23 = arith.constant 0 : index
    %74 = vector.load %arg6[%c0_22, %c0_23] : memref<1x32xf32, #tpu.memory_space<vmem>>, vector<1x32xf32>
    %75 = vector.broadcast %74 : vector<1x32xf32> to vector<16x32xf32>
    %76 = arith.addf %73, %75 : vector<16x32xf32>
    %77 = vector.shape_cast %76 : vector<16x32xf32> to vector<2x8x32xf32>
    %78 = vector.broadcast %4 : vector<2x1x32xf32> to vector<2x8x32xf32>
    %79 = arith.mulf %78, %77 : vector<2x8x32xf32>
    %80 = arith.addf %0, %79 : vector<2x8x32xf32>
    %cst_24 = arith.constant dense<0.000000e+00> : vector<2x8xf32>
    %81 = vector.multi_reduction <add>, %80, %cst_24 [2] : vector<2x8x32xf32> to vector<2x8xf32>
    %82 = vector.shape_cast %81 : vector<2x8xf32> to vector<2x8x1xf32>
    %cst_25 = arith.constant 3.200000e+01 : f32
    %83 = vector.broadcast %cst_25 : f32 to vector<2x8x1xf32>
    %84 = arith.divf %82, %83 : vector<2x8x1xf32>
    %85 = vector.broadcast %84 : vector<2x8x1xf32> to vector<2x8x32xf32>
    %86 = arith.subf %80, %85 : vector<2x8x32xf32>
    %87 = arith.mulf %86, %86 : vector<2x8x32xf32>
    %cst_26 = arith.constant dense<0.000000e+00> : vector<2x8xf32>
    %88 = vector.multi_reduction <add>, %87, %cst_26 [2] : vector<2x8x32xf32> to vector<2x8xf32>
    %89 = vector.shape_cast %88 : vector<2x8xf32> to vector<2x8x1xf32>
    %cst_27 = arith.constant 3.200000e+01 : f32
    %90 = vector.broadcast %cst_27 : f32 to vector<2x8x1xf32>
    %91 = arith.divf %89, %90 : vector<2x8x1xf32>
    %92 = vector.broadcast %84 : vector<2x8x1xf32> to vector<2x8x32xf32>
    %93 = arith.subf %80, %92 : vector<2x8x32xf32>
    %cst_28 = arith.constant 9.99999997E-7 : f32
    %94 = vector.broadcast %cst_28 : f32 to vector<2x8x1xf32>
    %95 = arith.addf %91, %94 : vector<2x8x1xf32>
    %96 = math.rsqrt %95 : vector<2x8x1xf32>
    %97 = vector.broadcast %96 : vector<2x8x1xf32> to vector<2x8x32xf32>
    %98 = arith.mulf %93, %97 : vector<2x8x32xf32>
    %99 = vector.broadcast %6 : vector<2x1x32xf32> to vector<2x8x32xf32>
    %100 = arith.mulf %98, %99 : vector<2x8x32xf32>
    %101 = vector.broadcast %5 : vector<2x1x32xf32> to vector<2x8x32xf32>
    %102 = arith.addf %100, %101 : vector<2x8x32xf32>
    %103 = vector.shape_cast %102 : vector<2x8x32xf32> to vector<16x32xf32>
    %104 = arith.truncf %103 : vector<16x32xf32> to vector<16x32xbf16>
    %c0_29 = arith.constant 0 : index
    %c0_30 = arith.constant 0 : index
    %105 = vector.load %arg7[%c0_29, %c0_30] : memref<32x128xbf16, #tpu.memory_space<vmem>>, vector<32x128xbf16>
    %cst_31 = arith.constant dense<0.000000e+00> : vector<16x128xf32>
    %106 = tpu.matmul %104, %105, %cst_31 {dimension_numbers = #tpu.dot_dimension_numbers<[1], [0], [0], [1], [0, 0, 1, 1], [], []>} : vector<16x32xbf16>, vector<32x128xbf16>, vector<16x128xf32> -> vector<16x128xf32>
    %c0_32 = arith.constant 0 : index
    %c0_33 = arith.constant 0 : index
    %107 = vector.load %arg8[%c0_32, %c0_33] : memref<1x128xf32, #tpu.memory_space<vmem>>, vector<1x128xf32>
    %108 = vector.broadcast %107 : vector<1x128xf32> to vector<16x128xf32>
    %109 = arith.addf %106, %108 : vector<16x128xf32>
    %cst_34 = arith.constant 5.000000e-01 : f32
    %110 = vector.broadcast %cst_34 : f32 to vector<16x128xf32>
    %111 = arith.mulf %110, %109 : vector<16x128xf32>
    %cst_35 = arith.constant 4.471500e-02 : f32
    %112 = vector.broadcast %cst_35 : f32 to vector<16x128xf32>
    %113 = arith.mulf %112, %109 : vector<16x128xf32>
    %114 = arith.mulf %113, %109 : vector<16x128xf32>
    %115 = arith.mulf %114, %109 : vector<16x128xf32>
    %116 = arith.addf %109, %115 : vector<16x128xf32>
    %cst_36 = arith.constant 0.797884583 : f32
    %117 = vector.broadcast %cst_36 : f32 to vector<16x128xf32>
    %118 = arith.mulf %117, %116 : vector<16x128xf32>
    %119 = math.tanh %118 : vector<16x128xf32>
    %cst_37 = arith.constant 1.000000e+00 : f32
    %120 = vector.broadcast %cst_37 : f32 to vector<16x128xf32>
    %121 = arith.addf %120, %119 : vector<16x128xf32>
    %122 = arith.mulf %111, %121 : vector<16x128xf32>
    %123 = arith.truncf %122 : vector<16x128xf32> to vector<16x128xbf16>
    %c0_38 = arith.constant 0 : index
    %c0_39 = arith.constant 0 : index
    %124 = vector.load %arg9[%c0_38, %c0_39] : memref<128x32xbf16, #tpu.memory_space<vmem>>, vector<128x32xbf16>
    %cst_40 = arith.constant dense<0.000000e+00> : vector<16x32xf32>
    %125 = tpu.matmul %123, %124, %cst_40 {dimension_numbers = #tpu.dot_dimension_numbers<[1], [0], [0], [1], [0, 0, 1, 1], [], []>} : vector<16x128xbf16>, vector<128x32xbf16>, vector<16x32xf32> -> vector<16x32xf32>
    %c0_41 = arith.constant 0 : index
    %c0_42 = arith.constant 0 : index
    %126 = vector.load %arg10[%c0_41, %c0_42] : memref<1x32xf32, #tpu.memory_space<vmem>>, vector<1x32xf32>
    %127 = vector.broadcast %126 : vector<1x32xf32> to vector<16x32xf32>
    %128 = arith.addf %125, %127 : vector<16x32xf32>
    %129 = vector.shape_cast %128 : vector<16x32xf32> to vector<2x8x32xf32>
    %130 = vector.broadcast %7 : vector<2x1x32xf32> to vector<2x8x32xf32>
    %131 = arith.mulf %130, %129 : vector<2x8x32xf32>
    %132 = arith.addf %80, %131 : vector<2x8x32xf32>
    %c0_43 = arith.constant 0 : index
    %c0_44 = arith.constant 0 : index
    %c0_45 = arith.constant 0 : index
    %133 = vector.load %arg11[%c0_43, %c0_44, %c0_45] : memref<2x8x32xf32, #tpu.memory_space<vmem>>, vector<2x8x32xf32>
    tpu.vector_store %arg11[%c0_43, %c0_44, %c0_45], %132 {strides = array<i32>} : memref<2x8x32xf32, #tpu.memory_space<vmem>>, vector<2x8x32xf32>,
    return
  }
  func.func @transform_0(%arg0: i32) -> (i32, i32, i32) {
    %c0_i32 = arith.constant 0 : i32
    %c0_i32_0 = arith.constant 0 : i32
    %c0_i32_1 = arith.constant 0 : i32
    return %arg0, %c0_i32, %c0_i32_0 : i32, i32, i32
  }
  func.func @transform_1(%arg0: i32) -> (i32, i32, i32) {
    %c0_i32 = arith.constant 0 : i32
    %c0_i32_0 = arith.constant 0 : i32
    %c0_i32_1 = arith.constant 0 : i32
    return %arg0, %c0_i32, %c0_i32_0 : i32, i32, i32
  }
  func.func @transform_2(%arg0: i32) -> (i32, i32) {
    %c0_i32 = arith.constant 0 : i32
    %c0_i32_0 = arith.constant 0 : i32
    %c0_i32_1 = arith.constant 0 : i32
    return %c0_i32, %c0_i32_0 : i32, i32
  }
  func.func @transform_3(%arg0: i32) -> (i32, i32) {
    %c0_i32 = arith.constant 0 : i32
    %c0_i32_0 = arith.constant 0 : i32
    %c0_i32_1 = arith.constant 0 : i32
    return %c0_i32, %c0_i32_0 : i32, i32
  }
  func.func @transform_4(%arg0: i32) -> (i32, i32) {
    %c0_i32 = arith.constant 0 : i32
    %c0_i32_0 = arith.constant 0 : i32
    %c0_i32_1 = arith.constant 0 : i32
    return %c0_i32, %c0_i32_0 : i32, i32
  }
  func.func @transform_5(%arg0: i32) -> (i32, i32) {
    %c0_i32 = arith.constant 0 : i32
    %c0_i32_0 = arith.constant 0 : i32
    %c0_i32_1 = arith.constant 0 : i32
    return %c0_i32, %c0_i32_0 : i32, i32
  }
  func.func @transform_6(%arg0: i32) -> (i32, i32) {
    %c0_i32 = arith.constant 0 : i32
    %c0_i32_0 = arith.constant 0 : i32
    %c0_i32_1 = arith.constant 0 : i32
    return %c0_i32, %c0_i32_0 : i32, i32
  }
  func.func @transform_7(%arg0: i32) -> (i32, i32) {
    %c0_i32 = arith.constant 0 : i32
    %c0_i32_0 = arith.constant 0 : i32
    %c0_i32_1 = arith.constant 0 : i32
    return %c0_i32, %c0_i32_0 : i32, i32
  }
  func.func @transform_8(%arg0: i32) -> (i32, i32) {
    %c0_i32 = arith.constant 0 : i32
    %c0_i32_0 = arith.constant 0 : i32
    %c0_i32_1 = arith.constant 0 : i32
    return %c0_i32, %c0_i32_0 : i32, i32
  }
  func.func @transform_9(%arg0: i32) -> (i32, i32) {
    %c0_i32 = arith.constant 0 : i32
    %c0_i32_0 = arith.constant 0 : i32
    %c0_i32_1 = arith.constant 0 : i32
    return %c0_i32, %c0_i32_0 : i32, i32
  }
  func.func @transform_10(%arg0: i32) -> (i32, i32, i32) {
    %c0_i32 = arith.constant 0 : i32
    %c0_i32_0 = arith.constant 0 : i32
    %c0_i32_1 = arith.constant 0 : i32
    return %arg0, %c0_i32, %c0_i32_0 : i32, i32, i32
  }
}

module attributes {stable_mosaic.version = 11 : i64} {
  func.func @dit_block_kernel(%arg0: i32, %arg1: memref<2x8x32xf32, #tpu.memory_space<vmem>>, %arg2: memref<2x6x32xf32, #tpu.memory_space<vmem>>, %arg3: memref<32x96xbf16, #tpu.memory_space<vmem>>, %arg4: memref<1x96xf32, #tpu.memory_space<vmem>>, %arg5: memref<32x32xbf16, #tpu.memory_space<vmem>>, %arg6: memref<1x32xf32, #tpu.memory_space<vmem>>, %arg7: memref<32x128xbf16, #tpu.memory_space<vmem>>, %arg8: memref<1x128xf32, #tpu.memory_space<vmem>>, %arg9: memref<128x32xbf16, #tpu.memory_space<vmem>>, %arg10: memref<1x32xf32, #tpu.memory_space<vmem>>, %arg11: memref<2x8x32xf32, #tpu.memory_space<vmem>>) attributes {dimension_semantics = [#tpu.dimension_semantics<parallel>], iteration_bounds = array<i64: 1>, scalar_prefetch = 0 : i64, scratch_operands = 0 : i64, tpu.core_type = #tpu.core_type<tc>, window_params = [{transform_indices = @transform_0, window_bounds = array<i64: 2, 8, 32>}, {transform_indices = @transform_1, window_bounds = array<i64: 2, 6, 32>}, {pipeline_mode = #tpu.pipeline_mode<synchronous>, transform_indices = @transform_2, window_bounds = array<i64: 32, 96>}, {pipeline_mode = #tpu.pipeline_mode<synchronous>, transform_indices = @transform_3, window_bounds = array<i64: 1, 96>}, {pipeline_mode = #tpu.pipeline_mode<synchronous>, transform_indices = @transform_4, window_bounds = array<i64: 32, 32>}, {pipeline_mode = #tpu.pipeline_mode<synchronous>, transform_indices = @transform_5, window_bounds = array<i64: 1, 32>}, {pipeline_mode = #tpu.pipeline_mode<synchronous>, transform_indices = @transform_6, window_bounds = array<i64: 32, 128>}, {pipeline_mode = #tpu.pipeline_mode<synchronous>, transform_indices = @transform_7, window_bounds = array<i64: 1, 128>}, {pipeline_mode = #tpu.pipeline_mode<synchronous>, transform_indices = @transform_8, window_bounds = array<i64: 128, 32>}, {pipeline_mode = #tpu.pipeline_mode<synchronous>, transform_indices = @transform_9, window_bounds = array<i64: 1, 32>}, {transform_indices = @transform_10, window_bounds = array<i64: 2, 8, 32>}]} {
    %c0 = arith.constant 0 : index
    %c0_0 = arith.constant 0 : index
    %c0_1 = arith.constant 0 : index
    %0 = vector.load %arg1[%c0, %c0_0, %c0_1] : memref<2x8x32xf32, #tpu.memory_space<vmem>>, vector<2x8x32xf32>
    %c0_2 = arith.constant 0 : index
    %c0_3 = arith.constant 0 : index
    %c0_4 = arith.constant 0 : index
    %1 = vector.load %arg2[%c0_2, %c0_3, %c0_4] : memref<2x6x32xf32, #tpu.memory_space<vmem>>, vector<2x6x32xf32>
    %2 = vector.extract_strided_slice %1 {offsets = [0, 0, 0], sizes = [2, 1, 32], strides = [1, 1, 1]} : vector<2x6x32xf32> to vector<2x1x32xf32>
    %3 = vector.extract_strided_slice %1 {offsets = [0, 1, 0], sizes = [2, 1, 32], strides = [1, 1, 1]} : vector<2x6x32xf32> to vector<2x1x32xf32>
    %4 = vector.extract_strided_slice %1 {offsets = [0, 2, 0], sizes = [2, 1, 32], strides = [1, 1, 1]} : vector<2x6x32xf32> to vector<2x1x32xf32>
    %5 = vector.extract_strided_slice %1 {offsets = [0, 3, 0], sizes = [2, 1, 32], strides = [1, 1, 1]} : vector<2x6x32xf32> to vector<2x1x32xf32>
    %6 = vector.extract_strided_slice %1 {offsets = [0, 4, 0], sizes = [2, 1, 32], strides = [1, 1, 1]} : vector<2x6x32xf32> to vector<2x1x32xf32>
    %7 = vector.extract_strided_slice %1 {offsets = [0, 5, 0], sizes = [2, 1, 32], strides = [1, 1, 1]} : vector<2x6x32xf32> to vector<2x1x32xf32>
    %cst = arith.constant dense<0.000000e+00> : vector<2x8xf32>
    %8 = vector.multi_reduction <add>, %0, %cst [2] : vector<2x8x32xf32> to vector<2x8xf32>
    %9 = vector.shape_cast %8 : vector<2x8xf32> to vector<2x8x1xf32>
    %cst_5 = arith.constant 3.200000e+01 : f32
    %10 = vector.broadcast %cst_5 : f32 to vector<2x8x1xf32>
    %11 = arith.divf %9, %10 : vector<2x8x1xf32>
    %12 = vector.broadcast %11 : vector<2x8x1xf32> to vector<2x8x32xf32>
    %13 = arith.subf %0, %12 : vector<2x8x32xf32>
    %14 = arith.mulf %13, %13 : vector<2x8x32xf32>
    %cst_6 = arith.constant dense<0.000000e+00> : vector<2x8xf32>
    %15 = vector.multi_reduction <add>, %14, %cst_6 [2] : vector<2x8x32xf32> to vector<2x8xf32>
    %16 = vector.shape_cast %15 : vector<2x8xf32> to vector<2x8x1xf32>
    %cst_7 = arith.constant 3.200000e+01 : f32
    %17 = vector.broadcast %cst_7 : f32 to vector<2x8x1xf32>
    %18 = arith.divf %16, %17 : vector<2x8x1xf32>
    %19 = vector.broadcast %11 : vector<2x8x1xf32> to vector<2x8x32xf32>
    %20 = arith.subf %0, %19 : vector<2x8x32xf32>
    %cst_8 = arith.constant 9.99999997E-7 : f32
    %21 = vector.broadcast %cst_8 : f32 to vector<2x8x1xf32>
    %22 = arith.addf %18, %21 : vector<2x8x1xf32>
    %23 = math.rsqrt %22 : vector<2x8x1xf32>
    %24 = vector.broadcast %23 : vector<2x8x1xf32> to vector<2x8x32xf32>
    %25 = arith.mulf %20, %24 : vector<2x8x32xf32>
    %26 = vector.broadcast %3 : vector<2x1x32xf32> to vector<2x8x32xf32>
    %27 = arith.mulf %25, %26 : vector<2x8x32xf32>
    %28 = vector.broadcast %2 : vector<2x1x32xf32> to vector<2x8x32xf32>
    %29 = arith.addf %27, %28 : vector<2x8x32xf32>
    %30 = vector.shape_cast %29 : vector<2x8x32xf32> to vector<16x32xf32>
    %31 = arith.truncf %30 : vector<16x32xf32> to vector<16x32xbf16>
    %c0_9 = arith.constant 0 : index
    %c0_10 = arith.constant 0 : index
    %32 = vector.load %arg3[%c0_9, %c0_10] : memref<32x96xbf16, #tpu.memory_space<vmem>>, vector<32x96xbf16>
    %cst_11 = arith.constant dense<0.000000e+00> : vector<16x96xf32>
    %33 = tpu.matmul %31, %32, %cst_11 {dimension_numbers = #tpu.dot_dimension_numbers<[1], [0], [0], [1], [0, 0, 1, 1], [], []>} : vector<16x32xbf16>, vector<32x96xbf16>, vector<16x96xf32> -> vector<16x96xf32>
    %c0_12 = arith.constant 0 : index
    %c0_13 = arith.constant 0 : index
    %34 = vector.load %arg4[%c0_12, %c0_13] : memref<1x96xf32, #tpu.memory_space<vmem>>, vector<1x96xf32>
    %35 = vector.broadcast %34 : vector<1x96xf32> to vector<16x96xf32>
    %36 = arith.addf %33, %35 : vector<16x96xf32>
    %37 = vector.shape_cast %36 : vector<16x96xf32> to vector<2x8x96xf32>
    %38 = vector.extract_strided_slice %37 {offsets = [0, 0, 0], sizes = [2, 8, 32], strides = [1, 1, 1]} : vector<2x8x96xf32> to vector<2x8x32xf32>
    %cst_14 = arith.constant 0.353553385 : f32
    %39 = vector.broadcast %cst_14 : f32 to vector<2x8x32xf32>
    %40 = arith.mulf %38, %39 : vector<2x8x32xf32>
    %41 = vector.shape_cast %40 : vector<2x8x32xf32> to vector<2x8x4x8xf32>
    %42 = tpu.transpose %41, [0, 2, 1, 3] : vector<2x8x4x8xf32> -> vector<2x4x8x8xf32>
    %43 = vector.shape_cast %42 : vector<2x4x8x8xf32> to vector<8x8x8xf32>
    %44 = arith.truncf %43 : vector<8x8x8xf32> to vector<8x8x8xbf16>
    %45 = vector.extract_strided_slice %37 {offsets = [0, 0, 32], sizes = [2, 8, 32], strides = [1, 1, 1]} : vector<2x8x96xf32> to vector<2x8x32xf32>
    %46 = vector.shape_cast %45 : vector<2x8x32xf32> to vector<2x8x4x8xf32>
    %47 = tpu.transpose %46, [0, 2, 1, 3] : vector<2x8x4x8xf32> -> vector<2x4x8x8xf32>
    %48 = vector.shape_cast %47 : vector<2x4x8x8xf32> to vector<8x8x8xf32>
    %49 = arith.truncf %48 : vector<8x8x8xf32> to vector<8x8x8xbf16>
    %50 = vector.extract_strided_slice %37 {offsets = [0, 0, 64], sizes = [2, 8, 32], strides = [1, 1, 1]} : vector<2x8x96xf32> to vector<2x8x32xf32>
    %51 = vector.shape_cast %50 : vector<2x8x32xf32> to vector<2x8x4x8xf32>
    %52 = tpu.transpose %51, [0, 2, 1, 3] : vector<2x8x4x8xf32> -> vector<2x4x8x8xf32>
    %53 = vector.shape_cast %52 : vector<2x4x8x8xf32> to vector<8x8x8xf32>
    %54 = arith.truncf %53 : vector<8x8x8xf32> to vector<8x8x8xbf16>
    "tpu.trace_start"() <{level = 10 : i32, message = "gqd,gkd->gqk"}> : () -> ()
    %cst_15 = arith.constant dense<0.000000e+00> : vector<8x8x8xf32>
    %55 = tpu.matmul %44, %49, %cst_15 {dimension_numbers = #tpu.dot_dimension_numbers<[2], [2], [1], [1], [0, 0, 0, 1, 1, 1], [0], [0]>} : vector<8x8x8xbf16>, vector<8x8x8xbf16>, vector<8x8x8xf32> -> vector<8x8x8xf32>
    "tpu.trace_stop"() : () -> ()
    %cst_16 = arith.constant dense<0xFF800000> : vector<8x8xf32>
    %56 = vector.multi_reduction <maximumf>, %55, %cst_16 [2] : vector<8x8x8xf32> to vector<8x8xf32>
    %57 = vector.shape_cast %56 : vector<8x8xf32> to vector<8x8x1xf32>
    %58 = vector.broadcast %57 : vector<8x8x1xf32> to vector<8x8x8xf32>
    %59 = arith.subf %55, %58 : vector<8x8x8xf32>
    %60 = math.exp %59 : vector<8x8x8xf32>
    %cst_17 = arith.constant dense<0.000000e+00> : vector<8x8xf32>
    %61 = vector.multi_reduction <add>, %60, %cst_17 [2] : vector<8x8x8xf32> to vector<8x8xf32>
    %62 = vector.shape_cast %61 : vector<8x8xf32> to vector<8x8x1xf32>
    %63 = tpu.reciprocal %62 {approx = true} : vector<8x8x1xf32> -> vector<8x8x1xf32>
    %64 = vector.broadcast %63 : vector<8x8x1xf32> to vector<8x8x8xf32>
    %65 = arith.mulf %60, %64 : vector<8x8x8xf32>
    %66 = arith.truncf %65 : vector<8x8x8xf32> to vector<8x8x8xbf16>
    "tpu.trace_start"() <{level = 10 : i32, message = "gqk,gkd->gqd"}> : () -> ()
    %cst_18 = arith.constant dense<0.000000e+00> : vector<8x8x8xf32>
    %67 = tpu.matmul %66, %54, %cst_18 {dimension_numbers = #tpu.dot_dimension_numbers<[2], [1], [1], [2], [0, 0, 0, 1, 1, 2], [0], [0]>} : vector<8x8x8xbf16>, vector<8x8x8xbf16>, vector<8x8x8xf32> -> vector<8x8x8xf32>
    "tpu.trace_stop"() : () -> ()
    %68 = vector.shape_cast %67 : vector<8x8x8xf32> to vector<2x4x8x8xf32>
    %69 = tpu.transpose %68, [0, 2, 1, 3] : vector<2x4x8x8xf32> -> vector<2x8x4x8xf32>
    %70 = vector.shape_cast %69 : vector<2x8x4x8xf32> to vector<16x32xf32>
    %71 = arith.truncf %70 : vector<16x32xf32> to vector<16x32xbf16>
    %c0_19 = arith.constant 0 : index
    %c0_20 = arith.constant 0 : index
    %72 = vector.load %arg5[%c0_19, %c0_20] : memref<32x32xbf16, #tpu.memory_space<vmem>>, vector<32x32xbf16>
    %cst_21 = arith.constant dense<0.000000e+00> : vector<16x32xf32>
    %73 = tpu.matmul %71, %72, %cst_21 {dimension_numbers = #tpu.dot_dimension_numbers<[1], [0], [0], [1], [0, 0, 1, 1], [], []>} : vector<16x32xbf16>, vector<32x32xbf16>, vector<16x32xf32> -> vector<16x32xf32>
    %c0_22 = arith.constant 0 : index
    %c0_23 = arith.constant 0 : index
    %74 = vector.load %arg6[%c0_22, %c0_23] : memref<1x32xf32, #tpu.memory_space<vmem>>, vector<1x32xf32>
    %75 = vector.broadcast %74 : vector<1x32xf32> to vector<16x32xf32>
    %76 = arith.addf %73, %75 : vector<16x32xf32>
    %77 = vector.shape_cast %76 : vector<16x32xf32> to vector<2x8x32xf32>
    %78 = vector.broadcast %4 : vector<2x1x32xf32> to vector<2x8x32xf32>
    %79 = arith.mulf %78, %77 : vector<2x8x32xf32>
    %80 = arith.addf %0, %79 : vector<2x8x32xf32>
    %cst_24 = arith.constant dense<0.000000e+00> : vector<2x8xf32>
    %81 = vector.multi_reduction <add>, %80, %cst_24 [2] : vector<2x8x32xf32> to vector<2x8xf32>
    %82 = vector.shape_cast %81 : vector<2x8xf32> to vector<2x8x1xf32>
    %cst_25 = arith.constant 3.200000e+01 : f32
    %83 = vector.broadcast %cst_25 : f32 to vector<2x8x1xf32>
    %84 = arith.divf %82, %83 : vector<2x8x1xf32>
    %85 = vector.broadcast %84 : vector<2x8x1xf32> to vector<2x8x32xf32>
    %86 = arith.subf %80, %85 : vector<2x8x32xf32>
    %87 = arith.mulf %86, %86 : vector<2x8x32xf32>
    %cst_26 = arith.constant dense<0.000000e+00> : vector<2x8xf32>
    %88 = vector.multi_reduction <add>, %87, %cst_26 [2] : vector<2x8x32xf32> to vector<2x8xf32>
    %89 = vector.shape_cast %88 : vector<2x8xf32> to vector<2x8x1xf32>
    %cst_27 = arith.constant 3.200000e+01 : f32
    %90 = vector.broadcast %cst_27 : f32 to vector<2x8x1xf32>
    %91 = arith.divf %89, %90 : vector<2x8x1xf32>
    %92 = vector.broadcast %84 : vector<2x8x1xf32> to vector<2x8x32xf32>
    %93 = arith.subf %80, %92 : vector<2x8x32xf32>
    %cst_28 = arith.constant 9.99999997E-7 : f32
    %94 = vector.broadcast %cst_28 : f32 to vector<2x8x1xf32>
    %95 = arith.addf %91, %94 : vector<2x8x1xf32>
    %96 = math.rsqrt %95 : vector<2x8x1xf32>
    %97 = vector.broadcast %96 : vector<2x8x1xf32> to vector<2x8x32xf32>
    %98 = arith.mulf %93, %97 : vector<2x8x32xf32>
    %99 = vector.broadcast %6 : vector<2x1x32xf32> to vector<2x8x32xf32>
    %100 = arith.mulf %98, %99 : vector<2x8x32xf32>
    %101 = vector.broadcast %5 : vector<2x1x32xf32> to vector<2x8x32xf32>
    %102 = arith.addf %100, %101 : vector<2x8x32xf32>
    %103 = vector.shape_cast %102 : vector<2x8x32xf32> to vector<16x32xf32>
    %104 = arith.truncf %103 : vector<16x32xf32> to vector<16x32xbf16>
    %c0_29 = arith.constant 0 : index
    %c0_30 = arith.constant 0 : index
    %105 = vector.load %arg7[%c0_29, %c0_30] : memref<32x128xbf16, #tpu.memory_space<vmem>>, vector<32x128xbf16>
    %cst_31 = arith.constant dense<0.000000e+00> : vector<16x128xf32>
    %106 = tpu.matmul %104, %105, %cst_31 {dimension_numbers = #tpu.dot_dimension_numbers<[1], [0], [0], [1], [0, 0, 1, 1], [], []>} : vector<16x32xbf16>, vector<32x128xbf16>, vector<16x128xf32> -> vector<16x128xf32>
    %c0_32 = arith.constant 0 : index
    %c0_33 = arith.constant 0 : index
    %107 = vector.load %arg8[%c0_32, %c0_33] : memref<1x128xf32, #tpu.memory_space<vmem>>, vector<1x128xf32>
    %108 = vector.broadcast %107 : vector<1x128xf32> to vector<16x128xf32>
    %109 = arith.addf %106, %108 : vector<16x128xf32>
    %cst_34 = arith.constant 5.000000e-01 : f32
    %110 = vector.broadcast %cst_34 : f32 to vector<16x128xf32>
    %111 = arith.mulf %110, %109 : vector<16x128xf32>
    %cst_35 = arith.constant 4.471500e-02 : f32
    %112 = vector.broadcast %cst_35 : f32 to vector<16x128xf32>
    %113 = arith.mulf %112, %109 : vector<16x128xf32>
    %114 = arith.mulf %113, %109 : vector<16x128xf32>
    %115 = arith.mulf %114, %109 : vector<16x128xf32>
    %116 = arith.addf %109, %115 : vector<16x128xf32>
    %cst_36 = arith.constant 0.797884583 : f32
    %117 = vector.broadcast %cst_36 : f32 to vector<16x128xf32>
    %118 = arith.mulf %117, %116 : vector<16x128xf32>
    %119 = math.tanh %118 : vector<16x128xf32>
    %cst_37 = arith.constant 1.000000e+00 : f32
    %120 = vector.broadcast %cst_37 : f32 to vector<16x128xf32>
    %121 = arith.addf %120, %119 : vector<16x128xf32>
    %122 = arith.mulf %111, %121 : vector<16x128xf32>
    %123 = arith.truncf %122 : vector<16x128xf32> to vector<16x128xbf16>
    %c0_38 = arith.constant 0 : index
    %c0_39 = arith.constant 0 : index
    %124 = vector.load %arg9[%c0_38, %c0_39] : memref<128x32xbf16, #tpu.memory_space<vmem>>, vector<128x32xbf16>
    %cst_40 = arith.constant dense<0.000000e+00> : vector<16x32xf32>
    %125 = tpu.matmul %123, %124, %cst_40 {dimension_numbers = #tpu.dot_dimension_numbers<[1], [0], [0], [1], [0, 0, 1, 1], [], []>} : vector<16x128xbf16>, vector<128x32xbf16>, vector<16x32xf32> -> vector<16x32xf32>
    %c0_41 = arith.constant 0 : index
    %c0_42 = arith.constant 0 : index
    %126 = vector.load %arg10[%c0_41, %c0_42] : memref<1x32xf32, #tpu.memory_space<vmem>>, vector<1x32xf32>
    %127 = vector.broadcast %126 : vector<1x32xf32> to vector<16x32xf32>
    %128 = arith.addf %125, %127 : vector<16x32xf32>
    %129 = vector.shape_cast %128 : vector<16x32xf32> to vector<2x8x32xf32>
    %130 = vector.broadcast %7 : vector<2x1x32xf32> to vector<2x8x32xf32>
    %131 = arith.mulf %130, %129 : vector<2x8x32xf32>
    %132 = arith.addf %80, %131 : vector<2x8x32xf32>
    %c0_43 = arith.constant 0 : index
    %c0_44 = arith.constant 0 : index
    %c0_45 = arith.constant 0 : index
    %133 = vector.load %arg11[%c0_43, %c0_44, %c0_45] : memref<2x8x32xf32, #tpu.memory_space<vmem>>, vector<2x8x32xf32>
    tpu.vector_store %arg11[%c0_43, %c0_44, %c0_45], %132 {strides = array<i32>} : memref<2x8x32xf32, #tpu.memory_space<vmem>>, vector<2x8x32xf32>,
    return
  }
  func.func @transform_0(%arg0: i32) -> (i32, i32, i32) {
    %c0_i32 = arith.constant 0 : i32
    %c0_i32_0 = arith.constant 0 : i32
    %c0_i32_1 = arith.constant 0 : i32
    return %arg0, %c0_i32, %c0_i32_0 : i32, i32, i32
  }
  func.func @transform_1(%arg0: i32) -> (i32, i32, i32) {
    %c0_i32 = arith.constant 0 : i32
    %c0_i32_0 = arith.constant 0 : i32
    %c0_i32_1 = arith.constant 0 : i32
    return %arg0, %c0_i32, %c0_i32_0 : i32, i32, i32
  }
  func.func @transform_2(%arg0: i32) -> (i32, i32) {
    %c0_i32 = arith.constant 0 : i32
    %c0_i32_0 = arith.constant 0 : i32
    %c0_i32_1 = arith.constant 0 : i32
    return %c0_i32, %c0_i32_0 : i32, i32
  }
  func.func @transform_3(%arg0: i32) -> (i32, i32) {
    %c0_i32 = arith.constant 0 : i32
    %c0_i32_0 = arith.constant 0 : i32
    %c0_i32_1 = arith.constant 0 : i32
    return %c0_i32, %c0_i32_0 : i32, i32
  }
  func.func @transform_4(%arg0: i32) -> (i32, i32) {
    %c0_i32 = arith.constant 0 : i32
    %c0_i32_0 = arith.constant 0 : i32
    %c0_i32_1 = arith.constant 0 : i32
    return %c0_i32, %c0_i32_0 : i32, i32
  }
  func.func @transform_5(%arg0: i32) -> (i32, i32) {
    %c0_i32 = arith.constant 0 : i32
    %c0_i32_0 = arith.constant 0 : i32
    %c0_i32_1 = arith.constant 0 : i32
    return %c0_i32, %c0_i32_0 : i32, i32
  }
  func.func @transform_6(%arg0: i32) -> (i32, i32) {
    %c0_i32 = arith.constant 0 : i32
    %c0_i32_0 = arith.constant 0 : i32
    %c0_i32_1 = arith.constant 0 : i32
    return %c0_i32, %c0_i32_0 : i32, i32
  }
  func.func @transform_7(%arg0: i32) -> (i32, i32) {
    %c0_i32 = arith.constant 0 : i32
    %c0_i32_0 = arith.constant 0 : i32
    %c0_i32_1 = arith.constant 0 : i32
    return %c0_i32, %c0_i32_0 : i32, i32
  }
  func.func @transform_8(%arg0: i32) -> (i32, i32) {
    %c0_i32 = arith.constant 0 : i32
    %c0_i32_0 = arith.constant 0 : i32
    %c0_i32_1 = arith.constant 0 : i32
    return %c0_i32, %c0_i32_0 : i32, i32
  }
  func.func @transform_9(%arg0: i32) -> (i32, i32) {
    %c0_i32 = arith.constant 0 : i32
    %c0_i32_0 = arith.constant 0 : i32
    %c0_i32_1 = arith.constant 0 : i32
    return %c0_i32, %c0_i32_0 : i32, i32
  }
  func.func @transform_10(%arg0: i32) -> (i32, i32, i32) {
    %c0_i32 = arith.constant 0 : i32
    %c0_i32_0 = arith.constant 0 : i32
    %c0_i32_1 = arith.constant 0 : i32
    return %arg0, %c0_i32, %c0_i32_0 : i32, i32, i32
  }
}

</mosaic_0001>

<bundles_post_ra>
// kernel: tpu_custom_call.1
= control target key start
LH: loop header
LB: loop body
LE: loop exit
PB: predicated region body
PF: predicated region fallthrough
CT: control target
= control target key end

     0   :  { %vm41_vm0 = vcmask 261120   ;;  %s3551_s0 = inlined_call_operand.vmem [shape: f32[2,8,32], index: 0, kind: input, shape index: {}]   ;;  %s3552_s1 = inlined_call_operand.vmem [shape: f32[2,6,32], index: 1, kind: input, shape index: {}]   ;;  %s3553_s2 = inlined_call_operand.vmem [shape: bf16[32,96], index: 2, kind: input, shape index: {}]   ;;  %s3554_s3 = inlined_call_operand.vmem [shape: f32[1,96], index: 3, kind: input, shape index: {}]   ;;  %s3555_s4 = inlined_call_operand.vmem [shape: bf16[32,32], index: 4, kind: input, shape index: {}]   ;;  %s3556_s5 = inlined_call_operand.vmem [shape: f32[1,32], index: 5, kind: input, shape index: {}]   ;;  %s3557_s6 = inlined_call_operand.vmem [shape: bf16[32,128], index: 6, kind: input, shape index: {}]   ;;  %s3558_s7 = inlined_call_operand.vmem [shape: f32[1,128], index: 7, kind: input, shape index: {}]   ;;  %s3559_s8 = inlined_call_operand.vmem [shape: bf16[128,32], index: 8, kind: input, shape index: {}]   ;;  %s3560_s9 = inlined_call_operand.vmem [shape: f32[1,32], index: 9, kind: input, shape index: {}]   ;;  %s3561_s10 = inlined_call_operand.hbm [shape: f32[2,8,32], index: 10, kind: output, shape index: {}]  }
   0x1   :  { %v37_v0 = vld [vmem:[%s3551_s0] sm:$0xff]  ;;  %v38_v1 = vld [vmem:[%s3551_s0 + $0x8] sm:$0xff] }
   0x2   :  { %v42_v2 = vsel %vm41_vm0, %v37_v0, 0.0  ;;  %v45_v3 = vsel %vm41_vm0, %v38_v1, 0.0 }
   0x3   :  { %43 = vadd.xlane.f32.xlu0 %v42_v2 }
   0x7   :  { %46 = vadd.xlane.f32.xlu0 %v45_v3 }
   0x8   :  { %15 = vsyncpa [#allocation3], 0  ;;  %v2846_v14 = vld [vmem:[%s3553_s2] sm:$0xff]   ;;  %v2932_v15 = vmov 0.0   ;;  %v2847_v16 = vld [vmem:[%s3553_s2 + $0x8] sm:$0xff]   ;;  %vm2933_vm1 = vmmov 0   ;;  %v69_v21 = vlaneseq }
   0x9   :  { %2677 = vmatprep.subr.bf16.mxu0 %v2932_v15  ;;  %2697 = vmatprep.subr.bf16.mxu1 %v2932_v15  ;;  %v39_v26 = vld [vmem:[%s3552_s1] sm:$0x3f]  ;;  %v40_v28 = vld [vmem:[%s3552_s1 + $0x8] sm:$0x3f]  ;;  %s2934_s26 = smov 112   ;;  %s2935_s27 = smov 120  }
   0xa   :  { %2678 = vmatpush3.bf16.msra.mxu0 %v2846_v14  ;;  %2681 = vmatprep.mubr.msk.bf16.mxu0 %vm2933_vm1, %v2932_v15  ;;  %v3025_v24 = vshrl.u32 %v69_v21, 7  ;;  %v2574_v42 = vld [vmem:[%s3554_s3] ss:$0 sm:$0xff]  ;;  %s2936_s28 = smov 104   ;;  %s2937_s3 = smov 96   ;;  %vm1081_vm2 = vcmask 64512  }
   0xb   :  { %2679 = vmatprep.subr.bf16.mxu0 %v2932_v15  ;;  %2699 = vmatprep.mubr.msk.bf16.mxu1 %vm2933_vm1, %v2932_v15  ;;  %v2938_v57 = vmov 1983009808   ;;  %v2939_v60 = vmov 1934713408   ;;  %s2940_s29 = smov 64   ;;  %vm1549_vm3 = vcmask 1043456  }
   0xc   :  { %v71_v25 = vsub.s32 1, %v3025_v24  ;;  %v81_v31 = vsub.s32 0, %v3025_v24  ;;  %v182_v58 = vunpack.c.l.s4 %v2938_v57  ;;  %v214_v61 = vunpack.c.l.s4 %v2939_v60  ;;  %s2941_s14 = smov 16   ;;  %s2942_s15 = smov 8  }
   0xd   :  { %s2943_s16 = smov 24   ;;  %vm2213_vm4 = vcmask 130048   ;;  %vm2216_vm5 = vcmask 195584  }
   0xe   :  { %2680 = vmatpush3.bf16.msra.mxu0 %v2847_v16  ;;  %v72_v30 = vrot.slane %v39_v26, %v71_v25  ;;  %v76_v32 = vrot.slane %v40_v28, %v71_v25  ;;  %v82_v36 = vrot.slane %v39_v26, %v81_v31  ;;  %v86_v37 = vrot.slane %v40_v28, %v81_v31 }
   0xf   :  { %2685 = vmatprep.subr.bf16.mxu0 %v2932_v15  ;;  %v183_v62 = vunpack.c.0.s8 %v182_v58 }
  0x11   :  { %v3087_v2 = vsub.s32 %v183_v62, %v3025_v24 }
  0x90   :  { %v44_v4 = vpop.xlane.xlu0 %43 }
  0x91   :  { %v49_v5 = vmul.f32 0.03125, %v44_v4 }
  0x93   :  { %v51_v6 = vsub.f32 %v37_v0, %v49_v5 }
  0x94   :  { %v47_v7 = vpop.xlane.xlu0 %46 }
  0x95   :  { %v50_v8 = vmul.f32 0.03125, %v47_v7  ;;  %v53_v9 = vmul.f32 %v51_v6, %v51_v6 }
  0x97   :  { %v52_v10 = vsub.f32 %v38_v1, %v50_v8  ;;  %v55_v11 = vsel %vm41_vm0, %v53_v9, 0.0  ;;  %v215_v1 = vunpack.c.0.s8 %v214_v61 }
  0x98   :  { %56 = vadd.xlane.f32.xlu1 %v55_v11 }
  0x99   :  { %v54_v12 = vmul.f32 %v52_v10, %v52_v10  ;;  %v3090_v9 = vsub.s32 %v215_v1, %v3025_v24 }
  0x9b   :  { %v58_v13 = vsel %vm41_vm0, %v54_v12, 0.0 }
  0x9c   :  { %59 = vadd.xlane.f32.xlu1 %v58_v13 }
 0x125   :  { %v57_v17 = vpop.xlane.xlu1 %56 }
 0x126   :  { %v61_v18 = vmul.f32 0.03125, %v57_v17 }
 0x128   :  { %v63_v19 = vadd.f32 1e-06, %v61_v18 }
 0x129   :  { %v60_v20 = vpop.xlane.xlu1 %59 }
 0x12a   :  { %2860 = vrsqrt.f32 %v63_v19  ;;  %v62_v22 = vmul.f32 0.03125, %v60_v20 }
 0x12c   :  { %v64_v23 = vadd.f32 1e-06, %v62_v22 }
 0x12e   :  { %2862 = vrsqrt.f32 %v64_v23 }
 0x134   :  { %v2861_v27 = vpop.eup %2860 }
 0x135   :  { %v67_v29 = vmul.f32 %v2861_v27, %v51_v6 }
 0x137   :  { %v77_v35 = vmul.f32 %v72_v30, %v67_v29 }
 0x138   :  { %v2863_v33 = vpop.eup %2862 }
 0x139   :  { %v68_v34 = vmul.f32 %v2863_v33, %v52_v10  ;;  %v87_v39 = vadd.f32 %v82_v36, %v77_v35 }
 0x13b   :  { %v78_v38 = vmul.f32 %v76_v32, %v68_v34 }
 0x13d   :  { %v88_v40 = vadd.f32 %v86_v37, %v78_v38 }
 0x13f   :  { %v89_v41 = vpack.c.bf16 %v88_v40, %v87_v39 }
 0x141   :  { %2682 = vmatmul.mubr.msk.bf16.vlgmr.msra.gmra.mrb[0].mxu0 %vm41_vm0, %v89_v41 }
 0x142   :  { %2687 = vmatprep.mubr.msk.bf16.mxu0 %vm2933_vm1, %v2932_v15 }
 0x214   :  { %v150_v43 = vpop.f32.mrb[0].mxu0 }
 0x215   :  { %v3041_v44 = vadd.f32 %v2574_v42, %v150_v43  ;;  %v2683_v45 = vpop.f32.mrb[1].mxu0 }
 0x216   :  { %v153_v46 = vpop.f32.mrb[2].mxu0 }
 0x217   :  { %465 = vrot.lane.b32.xlu1 %v3041_v44, %s2934_s26  ;;  %461 = vrot.lane.b32.xlu0 %v3041_v44, %s2935_s27  ;;  %v2684_v47 = vpop.f32.mrb[3].mxu0  ;;  %v3047_v48 = vadd.f32 %v2574_v42, %v153_v46  ;;  %v157_v51 = vmul.f32 0.35355338, %v3041_v44 }
 0x219   :  { %v3079_v56 = vmul.f32 0.35355338, %v3047_v48 }
 0x21b   :  { %469 = vrot.lane.b32.xlu1 %v3041_v44, %s2936_s28  ;;  %467 = vrot.lane.b32.xlu0 %v3047_v48, %s2934_s26 }
 0x21f   :  { %473 = vrot.lane.b32.xlu0 %v3041_v44, %s2937_s3  ;;  %463 = vrot.lane.b32.xlu1 %v3047_v48, %s2935_s27 }
 0x223   :  { %471 = vrot.lane.b32.xlu1 %v3047_v48, %s2936_s28 }
 0x289   :  { %v3056_v49 = vpop.permute.xlu1 %465  ;;  %v3058_v50 = vpop.permute.xlu0 %461 }
 0x28a   :  { %477 = vrot.lane.b32.xlu0 %v3056_v49, %s2937_s3  ;;  %475 = vrot.lane.b32.xlu1 %v3058_v50, %s2937_s3 }
 0x28d   :  { %v3063_v52 = vpop.permute.xlu1 %469  ;;  %v3072_v54 = vpop.permute.xlu0 %467 }
 0x28e   :  { %161 = vrot.lane.b32.xlu0 %v157_v51, %s2935_s27  ;;  %479 = vrot.lane.b32.xlu1 %v3063_v52, %s2937_s3 }
 0x291   :  { %v3068_v53 = vpop.permute.xlu1 %463  ;;  %v474_v59 = vpop.permute.xlu0 %473 }
 0x292   :  { %173 = vrot.lane.b32.xlu0 %v157_v51, %s2936_s28  ;;  %167 = vrot.lane.b32.xlu1 %v157_v51, %s2934_s26 }
 0x295   :  { %v3074_v55 = vpop.permute.xlu1 %471 }
 0x296   :  { %481 = vrot.lane.b32.xlu1 %v3047_v48, %s2937_s3  ;;  %483 = vrot.lane.b32.xlu0 %v3068_v53, %s2937_s3 }
 0x29a   :  { %485 = vrot.lane.b32.xlu1 %v3072_v54, %s2937_s3  ;;  %487 = vrot.lane.b32.xlu0 %v3074_v55, %s2937_s3 }
 0x29e   :  { %169 = vrot.lane.b32.xlu0 %v3079_v56, %s2934_s26  ;;  %163 = vrot.lane.b32.xlu1 %v3079_v56, %s2935_s27 }
 0x2a2   :  { %175 = vrot.lane.b32.xlu1 %v3079_v56, %s2936_s28 }
 0x2fc   :  { %v478_v63 = vpop.permute.xlu0 %477  ;;  %v476_v0 = vpop.permute.xlu1 %475 }
 0x2fd   :  { %v497_v3 = vcombine.low %v474_v59, %v478_v63  ;;  %v498_v4 = vcombine.high %v474_v59, %v478_v63 }
 0x2ff   :  { %v505_v10 = vrot.slane %v497_v3, %v3087_v2  ;;  %v512_v11 = vrot.slane %v498_v4, %v3087_v2 }
 0x300   :  { %v162_v5 = vpop.permute.xlu0 %161  ;;  %v480_v6 = vpop.permute.xlu1 %479 }
 0x301   :  { %v513_v7 = vcombine.low %v476_v0, %v480_v6  ;;  %v514_v8 = vcombine.high %v476_v0, %v480_v6 }
 0x303   :  { %v521_v12 = vrot.slane %v513_v7, %v3087_v2  ;;  %v528_v13 = vrot.slane %v514_v8, %v3087_v2 }
 0x304   :  { %v174_v14 = vpop.permute.xlu0 %173  ;;  %v168_v16 = vpop.permute.xlu1 %167 }
 0x305   :  { %v529_v17 = vcombine.low %v505_v10, %v521_v12  ;;  %v530_v18 = vcombine.high %v505_v10, %v521_v12  ;;  %v545_v19 = vcombine.low %v512_v11, %v528_v13  ;;  %v546_v20 = vcombine.high %v512_v11, %v528_v13 }
 0x306   :  { %v195_v21 = vcombine.low %v162_v5, %v174_v14  ;;  %v196_v22 = vcombine.high %v162_v5, %v174_v14  ;;  %v179_v23 = vcombine.low %v157_v51, %v168_v16  ;;  %v180_v25 = vcombine.high %v157_v51, %v168_v16 }
 0x307   :  { %v537_v26 = vrot.slane %v529_v17, %v3090_v9  ;;  %v544_v27 = vrot.slane %v530_v18, %v3090_v9  ;;  %v553_v28 = vrot.slane %v545_v19, %v3090_v9  ;;  %v560_v29 = vrot.slane %v546_v20, %v3090_v9 }
 0x308   :  { %v203_v30 = vrot.slane %v195_v21, %v3087_v2  ;;  %v210_v31 = vrot.slane %v196_v22, %v3087_v2  ;;  %v187_v32 = vrot.slane %v179_v23, %v3087_v2  ;;  %v194_v33 = vrot.slane %v180_v25, %v3087_v2  ;;  %v484_v34 = vpop.permute.xlu0 %483  ;;  %v482_v35 = vpop.permute.xlu1 %481 }
 0x309   :  { %v633_v36 = vcombine.low %v537_v26, %v544_v27  ;;  %v2582_v37 = vcombine.high %v537_v26, %v544_v27  ;;  %v649_v38 = vcombine.low %v553_v28, %v560_v29  ;;  %v2583_v39 = vcombine.high %v553_v28, %v560_v29 }
 0x30a   :  { %v211_v40 = vcombine.low %v187_v32, %v203_v30  ;;  %v212_v41 = vcombine.high %v187_v32, %v203_v30  ;;  %v227_v42 = vcombine.low %v194_v33, %v210_v31  ;;  %v228_v43 = vcombine.high %v194_v33, %v210_v31 }
 0x30b   :  { %v3105_v45 = vrot.slane %v633_v36, %v3087_v2  ;;  %v3108_v46 = vrot.slane %v2582_v37, %v3087_v2  ;;  %v3111_v47 = vrot.slane %v649_v38, %v3087_v2  ;;  %v3114_v51 = vrot.slane %v2583_v39, %v3087_v2 }
 0x30c   :  { %v219_v57 = vrot.slane %v211_v40, %v3090_v9  ;;  %v226_v58 = vrot.slane %v212_v41, %v3090_v9  ;;  %v235_v59 = vrot.slane %v227_v42, %v3090_v9  ;;  %v242_v60 = vrot.slane %v228_v43, %v3090_v9  ;;  %v488_v61 = vpop.permute.xlu0 %487  ;;  %v486_v62 = vpop.permute.xlu1 %485 }
 0x30d   :  { %v581_v63 = vcombine.low %v484_v34, %v488_v61  ;;  %v582_v0 = vcombine.high %v484_v34, %v488_v61  ;;  %v565_v1 = vcombine.low %v482_v35, %v486_v62  ;;  %v566_v3 = vcombine.high %v482_v35, %v486_v62 }
 0x30e   :  { %v315_v4 = vcombine.low %v219_v57, %v226_v58  ;;  %v2578_v5 = vcombine.high %v219_v57, %v226_v58  ;;  %v331_v6 = vcombine.low %v235_v59, %v242_v60  ;;  %v2579_v7 = vcombine.high %v235_v59, %v242_v60 }
 0x30f   :  { %v589_v8 = vrot.slane %v581_v63, %v3087_v2  ;;  %v596_v10 = vrot.slane %v582_v0, %v3087_v2  ;;  %v573_v11 = vrot.slane %v565_v1, %v3087_v2  ;;  %v580_v12 = vrot.slane %v566_v3, %v3087_v2 }
 0x310   :  { %v322_v13 = vrot.slane %v315_v4, %v3087_v2  ;;  %v330_v14 = vrot.slane %v2578_v5, %v3087_v2  ;;  %v3127_v16 = vrot.slane %v331_v6, %v3087_v2  ;;  %v3130_v17 = vrot.slane %v2579_v7, %v3087_v2  ;;  %v170_v18 = vpop.permute.xlu0 %169  ;;  %v164_v19 = vpop.permute.xlu1 %163 }
 0x311   :  { %v597_v20 = vcombine.low %v573_v11, %v589_v8  ;;  %v598_v21 = vcombine.high %v573_v11, %v589_v8  ;;  %v613_v22 = vcombine.low %v580_v12, %v596_v10  ;;  %v614_v23 = vcombine.high %v580_v12, %v596_v10 }
 0x312   :  { %v347_v25 = vcombine.low %v322_v13, %v330_v14  ;;  %v247_v26 = vcombine.low %v3079_v56, %v170_v18  ;;  %v248_v27 = vcombine.high %v3079_v56, %v170_v18  ;;  %v363_v32 = vcombine.low %v3127_v16, %v3130_v17 }
 0x313   :  { %v605_v28 = vrot.slane %v597_v20, %v3090_v9  ;;  %v612_v29 = vrot.slane %v598_v21, %v3090_v9  ;;  %v621_v30 = vrot.slane %v613_v22, %v3090_v9  ;;  %v628_v31 = vrot.slane %v614_v23, %v3090_v9 }
 0x314   :  { %v255_v33 = vrot.slane %v247_v26, %v3087_v2  ;;  %v176_v34 = vpop.permute.xlu1 %175  ;;  %v665_v35 = vcombine.low %v3105_v45, %v3108_v46  ;;  %v681_v56 = vcombine.low %v3111_v47, %v3114_v51  ;;  %v262_v39 = vrot.slane %v248_v27, %v3087_v2 }
 0x315   :  { %v701_v36 = vcombine.low %v605_v28, %v612_v29  ;;  %v2584_v37 = vcombine.high %v605_v28, %v612_v29  ;;  %v717_v38 = vcombine.low %v621_v30, %v628_v31  ;;  %v263_v40 = vcombine.low %v164_v19, %v176_v34 }
 0x316   :  { %v264_v41 = vcombine.high %v164_v19, %v176_v34  ;;  %v673_v42 = vrot.slane %v665_v35, %v3090_v9  ;;  %v689_v43 = vrot.slane %v681_v56, %v3090_v9  ;;  %v2585_v60 = vcombine.high %v621_v30, %v628_v31 }
 0x317   :  { %v3149_v57 = vrot.slane %v701_v36, %v3087_v2  ;;  %v3152_v58 = vrot.slane %v2584_v37, %v3087_v2  ;;  %v3155_v59 = vrot.slane %v717_v38, %v3087_v2  ;;  %v271_v61 = vrot.slane %v263_v40, %v3087_v2 }
 0x318   :  { %v278_v62 = vrot.slane %v264_v41, %v3087_v2  ;;  %v697_v63 = vcombine.low %v673_v42, %v689_v43  ;;  %v666_v0 = vcombine.high %v3105_v45, %v3108_v46  ;;  %v682_v1 = vcombine.high %v3111_v47, %v3114_v51 }
 0x319   :  { %v355_v3 = vrot.slane %v347_v25, %v3090_v9  ;;  %v371_v4 = vrot.slane %v363_v32, %v3090_v9  ;;  %v348_v5 = vcombine.high %v322_v13, %v330_v14  ;;  %v279_v6 = vcombine.low %v255_v33, %v271_v61 }
 0x31a   :  { %v280_v7 = vcombine.high %v255_v33, %v271_v61  ;;  %v295_v8 = vcombine.low %v262_v39, %v278_v62  ;;  %v296_v10 = vcombine.high %v262_v39, %v278_v62  ;;  %v732_v11 = vrot.slane %v2585_v60, %v3087_v2 }
 0x31b   :  { %v769_v12 = vpack.c.bf16 %v697_v63, %v697_v63  ;;  %v680_v18 = vrot.slane %v666_v0, %v3090_v9  ;;  %v696_v19 = vrot.slane %v682_v1, %v3090_v9  ;;  %v287_v45 = vrot.slane %v279_v6, %v3090_v9 }
 0x31c   :  { %v294_v46 = vrot.slane %v280_v7, %v3090_v9  ;;  %v303_v47 = vrot.slane %v295_v8, %v3090_v9  ;;  %v310_v51 = vrot.slane %v296_v10, %v3090_v9  ;;  %v379_v20 = vcombine.low %v355_v3, %v371_v4 }
 0x31d   :  { %v1086_v13 = vsel %vm1081_vm2, %v769_v12, 0  ;;  %v699_v14 = vcombine.low %v680_v18, %v696_v19  ;;  %v362_v21 = vrot.slane %v348_v5, %v3090_v9  ;;  %v364_v28 = vcombine.high %v3127_v16, %v3130_v17 }
 0x31e   :  { %v383_v22 = vcombine.low %v287_v45, %v294_v46  ;;  %v2580_v23 = vcombine.high %v287_v45, %v294_v46  ;;  %v399_v25 = vcombine.low %v303_v47, %v310_v51  ;;  %v2581_v26 = vcombine.high %v303_v47, %v310_v51  ;;  %2686 = vmatpush3.bf16.xpose.msra.mxu0 %v1086_v13 }
 0x31f   :  { %v771_v27 = vpack.c.bf16 %v699_v14, %v699_v14  ;;  %2691 = vmatprep.subr.bf16.mxu0 %v2932_v15  ;;  %v698_v29 = vcombine.high %v673_v42, %v689_v43  ;;  %v733_v30 = vcombine.low %v3149_v57, %v3152_v58  ;;  %v378_v56 = vrot.slane %v364_v28, %v3090_v9 }
 0x320   :  { %v390_v31 = vrot.slane %v383_v22, %v3087_v2  ;;  %v398_v32 = vrot.slane %v2580_v23, %v3087_v2  ;;  %v406_v33 = vrot.slane %v399_v25, %v3087_v2  ;;  %v414_v34 = vrot.slane %v2581_v26, %v3087_v2 }
 0x321   :  { %v1178_v35 = vsel %vm1081_vm2, %v771_v27, 0  ;;  %v770_v36 = vpack.c.bf16 %v698_v29, %v698_v29  ;;  %v451_v16 = vpack.c.bf16 %v379_v20, %v379_v20  ;;  %v381_v17 = vcombine.low %v362_v21, %v378_v56 }
 0x322   :  { %v415_v37 = vcombine.low %v390_v31, %v398_v32  ;;  %v431_v38 = vcombine.low %v406_v33, %v414_v34  ;;  %2698 = vmatpush3.bf16.xpose.msra.mxu1 %v1178_v35  ;;  %v741_v39 = vrot.slane %v733_v30, %v3090_v9  ;;  %v749_v40 = vcombine.low %v3155_v59, %v732_v11 }
 0x323   :  { %2709 = vmatprep.subr.bf16.mxu1 %v2932_v15  ;;  %v1132_v41 = vsel %vm1081_vm2, %v770_v36, 0  ;;  %v700_v43 = vcombine.high %v680_v18, %v696_v19  ;;  %v734_v60 = vcombine.high %v3149_v57, %v3152_v58  ;;  %v750_v61 = vcombine.high %v3155_v59, %v732_v11 }
 0x324   :  { %v757_v42 = vrot.slane %v749_v40, %v3090_v9  ;;  %v380_v62 = vcombine.high %v355_v3, %v371_v4  ;;  %v423_v63 = vrot.slane %v415_v37, %v3090_v9  ;;  %v439_v0 = vrot.slane %v431_v38, %v3090_v9 }
 0x325   :  { %2688 = vmatmul.mubr.msk.bf16.vlgmr.msra.gmra.mrb[4].mxu0 %vm1081_vm2, %v451_v16  ;;  %v453_v1 = vpack.c.bf16 %v381_v17, %v381_v17  ;;  %v748_v6 = vrot.slane %v734_v60, %v3090_v9  ;;  %v764_v7 = vrot.slane %v750_v61, %v3090_v9  ;;  %v772_v58 = vpack.c.bf16 %v700_v43, %v700_v43 }
 0x326   :  { %2692 = vmatpush3.bf16.xpose.msra.mxu0 %v1132_v41  ;;  %2693 = vmatprep.mubr.msk.bf16.mxu0 %vm2933_vm1, %v2932_v15  ;;  %v765_v5 = vcombine.low %v741_v39, %v757_v42  ;;  %v452_v3 = vpack.c.bf16 %v380_v62, %v380_v62  ;;  %v447_v4 = vcombine.low %v423_v63, %v439_v0 }
 0x327   :  { %2703 = vmatprep.subr.bf16.mxu0 %v2932_v15  ;;  %v767_v8 = vcombine.low %v748_v6, %v764_v7  ;;  %v416_v10 = vcombine.high %v390_v31, %v398_v32  ;;  %v432_v11 = vcombine.high %v406_v33, %v414_v34  ;;  %v1224_v12 = vsel %vm1081_vm2, %v772_v58, 0 }
 0x328   :  { %v773_v57 = vpack.c.bf16 %v765_v5, %v765_v5  ;;  %v766_v18 = vcombine.high %v741_v39, %v757_v42  ;;  %v382_v19 = vcombine.high %v362_v21, %v378_v56  ;;  %v455_v45 = vpack.c.bf16 %v447_v4, %v447_v4 }
 0x329   :  { %2700 = vmatmul.mubr.msk.bf16.vlgmr.msra.gmra.mrb[0].mxu1 %vm1081_vm2, %v453_v1  ;;  %v775_v46 = vpack.c.bf16 %v767_v8, %v767_v8  ;;  %v430_v51 = vrot.slane %v416_v10, %v3090_v9  ;;  %v446_v13 = vrot.slane %v432_v11, %v3090_v9  ;;  %v768_v23 = vcombine.high %v748_v6, %v764_v7 }
 0x32a   :  { %2711 = vmatprep.mubr.msk.bf16.mxu1 %vm2933_vm1, %v2932_v15  ;;  %v1270_v59 = vsel %vm1081_vm2, %v773_v57, 0  ;;  %v774_v47 = vpack.c.bf16 %v766_v18, %v766_v18  ;;  %v454_v20 = vpack.c.bf16 %v382_v19, %v382_v19  ;;  %v448_v25 = vcombine.high %v423_v63, %v439_v0 }
 0x32b   :  { %2710 = vmatpush3.bf16.xpose.msra.mxu1 %v1270_v59  ;;  %v1362_v14 = vsel %vm1081_vm2, %v775_v46, 0  ;;  %v449_v22 = vcombine.low %v430_v51, %v446_v13  ;;  %v776_v27 = vpack.c.bf16 %v768_v23, %v768_v23  ;;  %v450_v30 = vcombine.high %v430_v51, %v446_v13 }
 0x32c   :  { %2721 = vmatprep.subr.bf16.mxu1 %v2932_v15  ;;  %v1316_v21 = vsel %vm1081_vm2, %v774_v47, 0  ;;  %v456_v28 = vpack.c.bf16 %v448_v25, %v448_v25 }
 0x32d   :  { %2694 = vmatmul.mubr.msk.bf16.vlgmr.msra.gmra.mrb[8].mxu0 %vm1081_vm2, %v452_v3  ;;  %v457_v26 = vpack.c.bf16 %v449_v22, %v449_v22  ;;  %v1408_v29 = vsel %vm1081_vm2, %v776_v27, 0  ;;  %v458_v31 = vpack.c.bf16 %v450_v30, %v450_v30 }
 0x32e   :  { %2704 = vmatpush3.bf16.xpose.msra.mxu0 %v1224_v12  ;;  %2705 = vmatprep.mubr.msk.bf16.mxu0 %vm2933_vm1, %v2932_v15 }
 0x32f   :  { %2715 = vmatprep.subr.bf16.mxu0 %v2932_v15 }
 0x332   :  { %2712 = vmatmul.mubr.msk.bf16.vlgmr.msra.gmra.mrb[4].mxu1 %vm1081_vm2, %v455_v45 }
 0x333   :  { %2722 = vmatpush3.bf16.xpose.msra.mxu1 %v1362_v14  ;;  %2723 = vmatprep.mubr.msk.bf16.mxu1 %vm2933_vm1, %v2932_v15 }
 0x334   :  { %2733 = vmatprep.subr.bf16.mxu1 %v2932_v15 }
 0x335   :  { %2706 = vmatmul.mubr.msk.bf16.vlgmr.msra.gmra.mrb[12].mxu0 %vm1081_vm2, %v454_v20 }
 0x336   :  { %2716 = vmatpush3.bf16.xpose.msra.mxu0 %v1316_v21  ;;  %2717 = vmatprep.mubr.msk.bf16.mxu0 %vm2933_vm1, %v2932_v15 }
 0x337   :  { %2727 = vmatprep.subr.bf16.mxu0 %v2932_v15 }
 0x33a   :  { %2724 = vmatmul.mubr.msk.bf16.vlgmr.msra.gmra.mrb[8].mxu1 %vm1081_vm2, %v457_v26 }
 0x33b   :  { %2735 = vmatprep.mubr.msk.bf16.mxu1 %vm2933_vm1, %v2932_v15 }
 0x33d   :  { %2718 = vmatmul.mubr.msk.bf16.vlgmr.msra.gmra.mrb[16].mxu0 %vm1081_vm2, %v456_v28 }
 0x33e   :  { %2728 = vmatpush3.bf16.xpose.msra.mxu0 %v1408_v29  ;;  %2729 = vmatprep.mubr.msk.bf16.mxu0 %vm2933_vm1, %v2932_v15 }
 0x33f   :  { %2739 = vmatprep.subr.bf16.mxu0 %v2932_v15 }
 0x345   :  { %2730 = vmatmul.mubr.msk.bf16.vlgmr.msra.gmra.mrb[20].mxu0 %vm1081_vm2, %v458_v31 }
 0x346   :  { %2741 = vmatprep.mubr.msk.bf16.mxu0 %vm2933_vm1, %v2932_v15 }
 0x3f8   :  { %v1122_v32 = vpop.f32.mrb[4].mxu0 }
 0x3f9   :  { %v2689_v33 = vpop.f32.mrb[5].mxu0  ;;  %v1450_v34 = vsel %vm1081_vm2, %v1122_v32, -inf }
 0x3fa   :  { %1451 = vmax.xlane.f32.xlu0 %v1450_v34  ;;  %v1125_v35 = vpop.f32.mrb[6].mxu0 }
 0x3fb   :  { %v2690_v56 = vpop.f32.mrb[7].mxu0 }
 0x3fc   :  { %v1214_v36 = vpop.f32.mrb[0].mxu1 }
 0x3fd   :  { %v2701_v37 = vpop.f32.mrb[1].mxu1  ;;  %v1456_v38 = vsel %vm1081_vm2, %v1214_v36, -inf }
 0x3fe   :  { %v1217_v16 = vpop.f32.mrb[2].mxu1  ;;  %1457 = vmax.xlane.f32.xlu0 %v1456_v38 }
 0x3ff   :  { %v2702_v17 = vpop.f32.mrb[3].mxu1 }
 0x400   :  { %v1168_v39 = vpop.f32.mrb[8].mxu0 }
 0x401   :  { %v2695_v40 = vpop.f32.mrb[9].mxu0  ;;  %v1453_v41 = vsel %vm1081_vm2, %v1168_v39, -inf }
 0x402   :  { %1454 = vmax.xlane.f32.xlu1 %v1453_v41  ;;  %v1171_v42 = vpop.f32.mrb[10].mxu0 }
 0x403   :  { %v2696_v43 = vpop.f32.mrb[11].mxu0 }
 0x405   :  { %v1306_v60 = vpop.f32.mrb[4].mxu1 }
 0x406   :  { %v2713_v61 = vpop.f32.mrb[5].mxu1  ;;  %v1462_v62 = vsel %vm1081_vm2, %v1306_v60, -inf }
 0x407   :  { %v1309_v63 = vpop.f32.mrb[6].mxu1  ;;  %1463 = vmax.xlane.f32.xlu0 %v1462_v62 }
 0x408   :  { %v1260_v0 = vpop.f32.mrb[12].mxu0  ;;  %v2714_v1 = vpop.f32.mrb[7].mxu1 }
 0x409   :  { %v2707_v5 = vpop.f32.mrb[13].mxu0  ;;  %v1459_v6 = vsel %vm1081_vm2, %v1260_v0, -inf }
 0x40a   :  { %v1263_v7 = vpop.f32.mrb[14].mxu0 }
 0x40b   :  { %v2708_v57 = vpop.f32.mrb[15].mxu0  ;;  %1460 = vmax.xlane.f32.xlu0 %v1459_v6 }
 0x40d   :  { %v3239_v58 = vpop.f32.mrb[8].mxu1 }
 0x40e   :  { %v2725_v59 = vpop.f32.mrb[9].mxu1  ;;  %v1468_v3 = vsel %vm1081_vm2, %v3239_v58, -inf }
 0x40f   :  { %v1401_v4 = vpop.f32.mrb[10].mxu1  ;;  %1469 = vmax.xlane.f32.xlu0 %v1468_v3 }
 0x410   :  { %v1352_v8 = vpop.f32.mrb[16].mxu0  ;;  %v2726_v10 = vpop.f32.mrb[11].mxu1 }
 0x411   :  { %v2719_v11 = vpop.f32.mrb[17].mxu0  ;;  %v1465_v51 = vsel %vm1081_vm2, %v1352_v8, -inf }
 0x412   :  { %v1355_v12 = vpop.f32.mrb[18].mxu0 }
 0x413   :  { %779 = vrot.lane.b32.xlu1 %v3058_v50, %s2940_s29  ;;  %v2720_v18 = vpop.f32.mrb[19].mxu0 }
 0x417   :  { %781 = vrot.lane.b32.xlu1 %v3056_v49, %s2940_s29 }
 0x418   :  { %v3247_v19 = vpop.f32.mrb[20].mxu0 }
 0x419   :  { %v2731_v45 = vpop.f32.mrb[21].mxu0  ;;  %v1471_v13 = vsel %vm1081_vm2, %v3247_v19, -inf }
 0x41a   :  { %v1447_v46 = vpop.f32.mrb[22].mxu0 }
 0x41b   :  { %v2732_v47 = vpop.f32.mrb[23].mxu0 }
 0x425   :  { %777 = vrot.lane.b32.xlu0 %v3041_v44, %s2940_s29 }
 0x43b   :  { %1466 = vmax.xlane.f32.xlu1 %v1465_v51 }
 0x43f   :  { %1472 = vmax.xlane.f32.xlu1 %v1471_v13 }
 0x450   :  { %783 = vrot.lane.b32.xlu1 %v3063_v52, %s2940_s29 }
 0x487   :  { %v1452_v50 = vpop.xlane.xlu0 %1451 }
 0x488   :  { %v1474_v49 = vsub.f32 %v1122_v32, %v1452_v50 }
 0x48a   :  { %v1482_v14 = vmul.f32 1.442695, %v1474_v49 }
 0x48b   :  { %v1458_v20 = vpop.xlane.xlu0 %1457 }
 0x48c   :  { %2864 = vpow2.f32 %v1482_v14  ;;  %v1476_v21 = vsub.f32 %v1214_v36, %v1458_v20 }
 0x48e   :  { %v1486_v22 = vmul.f32 1.442695, %v1476_v21 }
 0x48f   :  { %v1455_v23 = vpop.xlane.xlu1 %1454 }
 0x490   :  { %2866 = vpow2.f32 %v1486_v22  ;;  %v1475_v44 = vsub.f32 %v1168_v39, %v1455_v23 }
 0x492   :  { %v1484_v25 = vmul.f32 1.442695, %v1475_v44 }
 0x493   :  { %v780_v17 = vpop.permute.xlu1 %779 }
 0x494   :  { %2868 = vpow2.f32 %v1484_v25  ;;  %v1464_v26 = vpop.xlane.xlu0 %1463 }
 0x495   :  { %v1478_v28 = vsub.f32 %v1306_v60, %v1464_v26 }
 0x496   :  { %v3256_v27 = vpop.eup %2864 }
 0x497   :  { %v1498_v29 = vsel %vm1081_vm2, %v3256_v27, 0.0  ;;  %v1490_v52 = vmul.f32 1.442695, %v1478_v28  ;;  %v782_v39 = vpop.permute.xlu1 %781 }
 0x498   :  { %1499 = vadd.xlane.f32.xlu0 %v1498_v29  ;;  %v1461_v30 = vpop.xlane.xlu0 %1460 }
 0x499   :  { %2870 = vpow2.f32 %v1490_v52  ;;  %v1477_v32 = vsub.f32 %v1260_v0, %v1461_v30 }
 0x49a   :  { %v3260_v31 = vpop.eup %2866 }
 0x49b   :  { %v1504_v33 = vsel %vm1081_vm2, %v3260_v31, 0.0  ;;  %v1488_v34 = vmul.f32 1.442695, %v1477_v32 }
 0x49c   :  { %1505 = vadd.xlane.f32.xlu0 %v1504_v33  ;;  %v3282_v40 = vpop.xlane.xlu0 %1469 }
 0x49d   :  { %2872 = vpow2.f32 %v1488_v34 }
 0x49e   :  { %v3264_v35 = vpop.eup %2868 }
 0x49f   :  { %v1501_v56 = vsel %vm1081_vm2, %v3264_v35, 0.0 }
 0x4a0   :  { %1502 = vadd.xlane.f32.xlu1 %v1501_v56  ;;  %v778_v60 = vpop.permute.xlu0 %777 }
 0x4a1   :  { %v801_v62 = vcombine.low %v778_v60, %v782_v39  ;;  %v802_v63 = vcombine.high %v778_v60, %v782_v39 }
 0x4a3   :  { %v3268_v36 = vpop.eup %2870 }
 0x4a4   :  { %v1510_v37 = vsel %vm1081_vm2, %v3268_v36, 0.0 }
 0x4a5   :  { %1511 = vadd.xlane.f32.xlu0 %v1510_v37 }
 0x4a7   :  { %v3272_v38 = vpop.eup %2872 }
 0x4a8   :  { %v1507_v16 = vsel %vm1081_vm2, %v3272_v38, 0.0 }
 0x4a9   :  { %1508 = vadd.xlane.f32.xlu1 %v1507_v16 }
 0x4ba   :  { %787 = vrot.lane.b32.xlu1 %v3068_v53, %s2940_s29 }
 0x4be   :  { %789 = vrot.lane.b32.xlu1 %v3072_v54, %s2940_s29  ;;  %v809_v54 = vrot.slane %v801_v62, %v3087_v2 }
 0x4c2   :  { %791 = vrot.lane.b32.xlu1 %v3074_v55, %s2940_s29  ;;  %v816_v55 = vrot.slane %v802_v63, %v3087_v2 }
 0x4c8   :  { %v1467_v41 = vpop.xlane.xlu1 %1466 }
 0x4c9   :  { %v1479_v42 = vsub.f32 %v1352_v8, %v1467_v41  ;;  %v1480_v41 = vsub.f32 %v3239_v58, %v3282_v40 }
 0x4cb   :  { %v1492_v43 = vmul.f32 1.442695, %v1479_v42  ;;  %v1494_v42 = vmul.f32 1.442695, %v1480_v41 }
 0x4cc   :  { %v1473_v61 = vpop.xlane.xlu1 %1472 }
 0x4cd   :  { %2874 = vpow2.f32 %v1492_v43  ;;  %v1481_v53 = vsub.f32 %v3247_v19, %v1473_v61 }
 0x4cf   :  { %v1496_v57 = vmul.f32 1.442695, %v1481_v53 }
 0x4d0   :  { %v784_v0 = vpop.permute.xlu1 %783 }
 0x4d1   :  { %v817_v1 = vcombine.low %v780_v17, %v784_v0  ;;  %v818_v5 = vcombine.high %v780_v17, %v784_v0  ;;  %2876 = vpow2.f32 %v1496_v57 }
 0x4d2   :  { %2878 = vpow2.f32 %v1494_v42 }
 0x4d3   :  { %v825_v6 = vrot.slane %v817_v1, %v3087_v2  ;;  %v832_v7 = vrot.slane %v818_v5, %v3087_v2 }
 0x4d5   :  { %v833_v59 = vcombine.low %v809_v54, %v825_v6  ;;  %v834_v3 = vcombine.high %v809_v54, %v825_v6  ;;  %v849_v4 = vcombine.low %v816_v55, %v832_v7  ;;  %v850_v8 = vcombine.high %v816_v55, %v832_v7 }
 0x4d7   :  { %v3289_v10 = vpop.eup %2874  ;;  %v841_v11 = vrot.slane %v833_v59, %v3090_v9  ;;  %v848_v12 = vrot.slane %v834_v3, %v3090_v9  ;;  %v857_v18 = vrot.slane %v849_v4, %v3090_v9  ;;  %v864_v19 = vrot.slane %v850_v8, %v3090_v9 }
 0x4d8   :  { %v1513_v45 = vsel %vm1081_vm2, %v3289_v10, 0.0 }
 0x4d9   :  { %v937_v46 = vcombine.low %v841_v11, %v848_v12  ;;  %v2586_v47 = vcombine.high %v841_v11, %v848_v12  ;;  %v953_v51 = vcombine.low %v857_v18, %v864_v19  ;;  %v2587_v13 = vcombine.high %v857_v18, %v864_v19  ;;  %1514 = vadd.xlane.f32.xlu0 %v1513_v45 }
 0x4db   :  { %v944_v50 = vrot.slane %v937_v46, %v3087_v2  ;;  %v952_v49 = vrot.slane %v2586_v47, %v3087_v2  ;;  %v960_v14 = vrot.slane %v953_v51, %v3087_v2  ;;  %v968_v20 = vrot.slane %v2587_v13, %v3087_v2  ;;  %v3305_v34 = vpop.eup %2876 }
 0x4dc   :  { %v1519_v39 = vsel %vm1081_vm2, %v3305_v34, 0.0  ;;  %v3317_v43 = vpop.eup %2878 }
 0x4dd   :  { %v969_v21 = vcombine.low %v944_v50, %v952_v49  ;;  %v985_v22 = vcombine.low %v960_v14, %v968_v20  ;;  %v970_v23 = vcombine.high %v944_v50, %v952_v49  ;;  %v986_v44 = vcombine.high %v960_v14, %v968_v20 }
 0x4de   :  { %v1516_v60 = vsel %vm1081_vm2, %v3317_v43, 0.0 }
 0x4df   :  { %v977_v25 = vrot.slane %v969_v21, %v3090_v9  ;;  %v993_v26 = vrot.slane %v985_v22, %v3090_v9  ;;  %v984_v28 = vrot.slane %v970_v23, %v3090_v9  ;;  %v1000_v29 = vrot.slane %v986_v44, %v3090_v9 }
 0x4e1   :  { %v1001_v52 = vcombine.low %v977_v25, %v993_v26  ;;  %v1002_v30 = vcombine.high %v977_v25, %v993_v26  ;;  %v1003_v32 = vcombine.low %v984_v28, %v1000_v29  ;;  %v1004_v33 = vcombine.high %v984_v28, %v1000_v29 }
 0x4e3   :  { %v1073_v56 = vpack.c.bf16 %v1001_v52, %v1001_v52  ;;  %v1074_v37 = vpack.c.bf16 %v1002_v30, %v1002_v30  ;;  %v1075_v0 = vpack.c.bf16 %v1003_v32, %v1003_v32  ;;  %v1076_v6 = vpack.c.bf16 %v1004_v33, %v1004_v33 }
 0x4e5   :  { %v1551_v16 = vsel %vm1549_vm3, %v1073_v56, 0  ;;  %v1597_v17 = vsel %vm1549_vm3, %v1074_v37, 0  ;;  %v1643_v40 = vsel %vm1549_vm3, %v1075_v0, 0  ;;  %v1689_v59 = vsel %vm1549_vm3, %v1076_v6, 0 }
 0x4e6   :  { %2734 = vmatpush3.bf16.msra.mxu1 %v1551_v16  ;;  %2740 = vmatpush3.bf16.msra.mxu0 %v1597_v17 }
 0x4e7   :  { %1520 = vadd.xlane.f32.xlu1 %v1519_v39  ;;  %2745 = vmatprep.subr.bf16.mxu1 %v2932_v15 }
 0x4e8   :  { %2751 = vmatprep.subr.bf16.mxu0 %v2932_v15 }
 0x4ef   :  { %785 = vrot.lane.b32.xlu0 %v3047_v48, %s2940_s29 }
 0x50e   :  { %1517 = vadd.xlane.f32.xlu0 %v1516_v60 }
 0x525   :  { %v1500_v61 = vpop.xlane.xlu0 %1499 }
 0x526   :  { %2880 = vrcp.f32 %v1500_v61 }
 0x529   :  { %v1506_v62 = vpop.xlane.xlu0 %1505 }
 0x52a   :  { %2882 = vrcp.f32 %v1506_v62 }
 0x52d   :  { %v1503_v63 = vpop.xlane.xlu1 %1502 }
 0x52e   :  { %2884 = vrcp.f32 %v1503_v63 }
 0x530   :  { %v2881_v53 = vpop.eup %2880 }
 0x531   :  { %v1530_v48 = vmul.f32 %v2881_v53, %v3256_v27 }
 0x532   :  { %v1512_v11 = vpop.xlane.xlu0 %1511 }
 0x533   :  { %v1538_v1 = vpack.c.bf16 %v1530_v48, %v1530_v48 }
 0x534   :  { %v2883_v58 = vpop.eup %2882 }
 0x535   :  { %2736 = vmatmul.mubr.msk.bf16.vlgmr.msra.gmra.mrb[12].mxu1 %vm1081_vm2, %v1538_v1  ;;  %v1532_v5 = vmul.f32 %v2883_v58, %v3260_v31 }
 0x536   :  { %2746 = vmatpush3.bf16.msra.mxu1 %v1643_v40  ;;  %2747 = vmatprep.mubr.msk.bf16.mxu1 %vm2933_vm1, %v2932_v15  ;;  %v1509_v54 = vpop.xlane.xlu1 %1508 }
 0x537   :  { %2757 = vmatprep.subr.bf16.mxu1 %v2932_v15  ;;  %2886 = vrcp.f32 %v1509_v54  ;;  %v1540_v57 = vpack.c.bf16 %v1532_v5, %v1532_v5 }
 0x538   :  { %v2885_v55 = vpop.eup %2884  ;;  %2888 = vrcp.f32 %v1512_v11 }
 0x539   :  { %v1531_v27 = vmul.f32 %v2885_v55, %v3264_v35 }
 0x53a   :  { %v788_v4 = vpop.permute.xlu1 %787 }
 0x53b   :  { %v1539_v7 = vpack.c.bf16 %v1531_v27, %v1531_v27 }
 0x53d   :  { %2742 = vmatmul.mubr.msk.bf16.vlgmr.msra.gmra.mrb[24].mxu0 %vm1081_vm2, %v1539_v7  ;;  %2748 = vmatmul.mubr.msk.bf16.vlgmr.msra.gmra.mrb[16].mxu1 %vm1081_vm2, %v1540_v57 }
 0x53e   :  { %2752 = vmatpush3.bf16.msra.mxu0 %v1689_v59  ;;  %2753 = vmatprep.mubr.msk.bf16.mxu0 %vm2933_vm1, %v2932_v15  ;;  %v790_v8 = vpop.permute.xlu1 %789 }
 0x53f   :  { %2763 = vmatprep.subr.bf16.mxu0 %v2932_v15  ;;  %2759 = vmatprep.mubr.msk.bf16.mxu1 %vm2933_vm1, %v2932_v15 }
 0x541   :  { %v2887_v31 = vpop.eup %2886 }
 0x542   :  { %v1533_v35 = vmul.f32 %v2887_v31, %v3272_v38  ;;  %v792_v12 = vpop.permute.xlu1 %791  ;;  %v2889_v60 = vpop.eup %2888 }
 0x543   :  { %v885_v19 = vcombine.low %v788_v4, %v792_v12  ;;  %v886_v45 = vcombine.high %v788_v4, %v792_v12  ;;  %v1534_v5 = vmul.f32 %v2889_v60, %v3268_v36 }
 0x544   :  { %v1541_v3 = vpack.c.bf16 %v1533_v35, %v1533_v35 }
 0x545   :  { %v893_v13 = vrot.slane %v885_v19, %v3087_v2  ;;  %v900_v38 = vrot.slane %v886_v45, %v3087_v2  ;;  %v1542_v31 = vpack.c.bf16 %v1534_v5, %v1534_v5 }
 0x546   :  { %2754 = vmatmul.mubr.msk.bf16.vlgmr.msra.gmra.mrb[28].mxu0 %vm1081_vm2, %v1541_v3 }
 0x547   :  { %2765 = vmatprep.mubr.msk.bf16.mxu0 %vm2933_vm1, %v2932_v15 }
 0x566   :  { %v1515_v18 = vpop.xlane.xlu0 %1514 }
 0x567   :  { %2890 = vrcp.f32 %v1515_v18 }
 0x56a   :  { %v786_v46 = vpop.permute.xlu0 %785 }
 0x56b   :  { %v869_v47 = vcombine.low %v786_v46, %v790_v8  ;;  %v870_v51 = vcombine.high %v786_v46, %v790_v8 }
 0x56d   :  { %v877_v50 = vrot.slane %v869_v47, %v3087_v2  ;;  %v884_v49 = vrot.slane %v870_v51, %v3087_v2 }
 0x56f   :  { %v901_v14 = vcombine.low %v877_v50, %v893_v13  ;;  %v902_v20 = vcombine.high %v877_v50, %v893_v13  ;;  %v917_v21 = vcombine.low %v884_v49, %v900_v38  ;;  %v918_v22 = vcombine.high %v884_v49, %v900_v38 }
 0x571   :  { %v909_v23 = vrot.slane %v901_v14, %v3090_v9  ;;  %v916_v44 = vrot.slane %v902_v20, %v3090_v9  ;;  %v925_v25 = vrot.slane %v917_v21, %v3090_v9  ;;  %v932_v26 = vrot.slane %v918_v22, %v3090_v9  ;;  %v2891_v48 = vpop.eup %2890 }
 0x572   :  { %v1535_v54 = vmul.f32 %v2891_v48, %v3289_v10 }
 0x573   :  { %v1005_v28 = vcombine.low %v909_v23, %v916_v44  ;;  %v2588_v29 = vcombine.high %v909_v23, %v916_v44  ;;  %v1021_v52 = vcombine.low %v925_v25, %v932_v26  ;;  %v2589_v30 = vcombine.high %v925_v25, %v932_v26 }
 0x574   :  { %v1521_v16 = vpop.xlane.xlu1 %1520  ;;  %v1543_v35 = vpack.c.bf16 %v1535_v54, %v1535_v54 }
 0x575   :  { %v1012_v32 = vrot.slane %v1005_v28, %v3087_v2  ;;  %v1020_v33 = vrot.slane %v2588_v29, %v3087_v2  ;;  %v1028_v56 = vrot.slane %v1021_v52, %v3087_v2  ;;  %v1036_v37 = vrot.slane %v2589_v30, %v3087_v2 }
 0x576   :  { %2892 = vrcp.f32 %v1521_v16 }
 0x577   :  { %v1037_v17 = vcombine.low %v1012_v32, %v1020_v33  ;;  %v1053_v39 = vcombine.low %v1028_v56, %v1036_v37  ;;  %v1038_v41 = vcombine.high %v1012_v32, %v1020_v33  ;;  %v1054_v42 = vcombine.high %v1028_v56, %v1036_v37 }
 0x579   :  { %v1045_v61 = vrot.slane %v1037_v17, %v3090_v9  ;;  %v1061_v62 = vrot.slane %v1053_v39, %v3090_v9  ;;  %v1052_v63 = vrot.slane %v1038_v41, %v3090_v9  ;;  %v1068_v53 = vrot.slane %v1054_v42, %v3090_v9 }
 0x57b   :  { %v1069_v0 = vcombine.low %v1045_v61, %v1061_v62  ;;  %v1070_v1 = vcombine.high %v1045_v61, %v1061_v62  ;;  %v1071_v58 = vcombine.low %v1052_v63, %v1068_v53  ;;  %v1072_v40 = vcombine.high %v1052_v63, %v1068_v53 }
 0x57d   :  { %v1077_v55 = vpack.c.bf16 %v1069_v0, %v1069_v0  ;;  %v1078_v27 = vpack.c.bf16 %v1070_v1, %v1070_v1  ;;  %v1079_v57 = vpack.c.bf16 %v1071_v58, %v1071_v58  ;;  %v1080_v59 = vpack.c.bf16 %v1072_v40, %v1072_v40 }
 0x57f   :  { %v1735_v6 = vsel %vm1549_vm3, %v1077_v55, 0  ;;  %v1781_v7 = vsel %vm1549_vm3, %v1078_v27, 0  ;;  %v1827_v36 = vsel %vm1549_vm3, %v1079_v57, 0  ;;  %v1873_v10 = vsel %vm1549_vm3, %v1080_v59, 0 }
 0x580   :  { %2758 = vmatpush3.bf16.msra.mxu1 %v1735_v6  ;;  %2764 = vmatpush3.bf16.msra.mxu0 %v1781_v7  ;;  %v2893_v3 = vpop.eup %2892 }
 0x581   :  { %2769 = vmatprep.subr.bf16.mxu1 %v2932_v15  ;;  %2775 = vmatprep.subr.bf16.mxu0 %v2932_v15  ;;  %v1537_v4 = vmul.f32 %v2893_v3, %v3305_v34 }
 0x583   :  { %2760 = vmatmul.mubr.msk.bf16.vlgmr.msra.gmra.mrb[20].mxu1 %vm1081_vm2, %v1542_v31  ;;  %2766 = vmatmul.mubr.msk.bf16.vlgmr.msra.gmra.mrb[32].mxu0 %vm1081_vm2, %v1543_v35  ;;  %v1545_v8 = vpack.c.bf16 %v1537_v4, %v1537_v4 }
 0x584   :  { %2770 = vmatpush3.bf16.msra.mxu1 %v1827_v36  ;;  %2776 = vmatpush3.bf16.msra.mxu0 %v1873_v10 }
 0x585   :  { %2777 = vmatprep.mubr.msk.bf16.mxu0 %vm2933_vm1, %v2932_v15  ;;  %2771 = vmatprep.mubr.msk.bf16.mxu1 %vm2933_vm1, %v2932_v15 }
 0x586   :  { %2781 = vmatprep.subr.bf16.mxu1 %v2932_v15  ;;  %2789 = vmatprep.subr.bf16.mxu0 %v2932_v15 }
 0x58b   :  { %2778 = vmatmul.mubr.msk.bf16.vlgmr.msra.gmra.mrb[36].mxu0 %vm1081_vm2, %v1545_v8 }
 0x58c   :  { %2793 = vmatprep.mubr.msk.bf16.mxu0 %vm2933_vm1, %v2932_v15 }
 0x59b   :  { %v1518_v11 = vpop.xlane.xlu0 %1517 }
 0x59c   :  { %2894 = vrcp.f32 %v1518_v11 }
 0x5a6   :  { %v2895_v12 = vpop.eup %2894 }
 0x5a7   :  { %v1536_v34 = vmul.f32 %v2895_v12, %v3317_v43 }
 0x5a9   :  { %v1544_v18 = vpack.c.bf16 %v1536_v34, %v1536_v34 }
 0x5ab   :  { %2772 = vmatmul.mubr.msk.bf16.vlgmr.msra.gmra.mrb[24].mxu1 %vm1081_vm2, %v1544_v18 }
 0x5ac   :  { %2785 = vmatprep.mubr.msk.bf16.mxu1 %vm2933_vm1, %v2932_v15 }
 0x608   :  { %v1587_v19 = vpop.f32.mrb[12].mxu1 }
 0x609   :  { %v2737_v45 = vpop.f32.mrb[13].mxu1 }
 0x60a   :  { %v1590_v46 = vpop.f32.mrb[14].mxu1 }
 0x60b   :  { %v2738_v47 = vpop.f32.mrb[15].mxu1 }
 0x610   :  { %v1633_v51 = vpop.f32.mrb[24].mxu0  ;;  %v1679_v13 = vpop.f32.mrb[16].mxu1 }
 0x611   :  { %v1915_v38 = vcombine.low %v1587_v19, %v1679_v13  ;;  %v1916_v50 = vcombine.high %v1587_v19, %v1679_v13  ;;  %v2743_v49 = vpop.f32.mrb[25].mxu0  ;;  %v2749_v14 = vpop.f32.mrb[17].mxu1 }
 0x612   :  { %v1636_v20 = vpop.f32.mrb[26].mxu0  ;;  %v1682_v21 = vpop.f32.mrb[18].mxu1 }
 0x613   :  { %v2744_v22 = vpop.f32.mrb[27].mxu0  ;;  %v2750_v43 = vpop.f32.mrb[19].mxu1  ;;  %v1923_v29 = vrot.slane %v1915_v38, %v3087_v2  ;;  %v1930_v52 = vrot.slane %v1916_v50, %v3087_v2 }
 0x619   :  { %v1725_v23 = vpop.f32.mrb[28].mxu0 }
 0x61a   :  { %v1931_v44 = vcombine.low %v1633_v51, %v1725_v23  ;;  %v1932_v25 = vcombine.high %v1633_v51, %v1725_v23  ;;  %v2755_v26 = vpop.f32.mrb[29].mxu0 }
 0x61b   :  { %v1728_v28 = vpop.f32.mrb[30].mxu0 }
 0x61c   :  { %v1939_v30 = vrot.slane %v1931_v44, %v3087_v2  ;;  %v1946_v32 = vrot.slane %v1932_v25, %v3087_v2  ;;  %v2756_v33 = vpop.f32.mrb[31].mxu0 }
 0x61e   :  { %v1947_v56 = vcombine.low %v1923_v29, %v1939_v30  ;;  %v1948_v37 = vcombine.high %v1923_v29, %v1939_v30  ;;  %v1963_v16 = vcombine.low %v1930_v52, %v1946_v32  ;;  %v1964_v17 = vcombine.high %v1930_v52, %v1946_v32 }
 0x620   :  { %v1955_v39 = vrot.slane %v1947_v56, %v3090_v9  ;;  %v1962_v41 = vrot.slane %v1948_v37, %v3090_v9  ;;  %v1971_v42 = vrot.slane %v1963_v16, %v3090_v9  ;;  %v1978_v60 = vrot.slane %v1964_v17, %v3090_v9 }
 0x622   :  { %v2051_v61 = vcombine.low %v1955_v39, %v1962_v41  ;;  %v2606_v62 = vcombine.high %v1955_v39, %v1962_v41  ;;  %v2067_v63 = vcombine.low %v1971_v42, %v1978_v60  ;;  %v2607_v53 = vcombine.high %v1971_v42, %v1978_v60  ;;  %v2848_v39 = vld [vmem:[%s3555_s4] sm:$0xff]  }
 0x623   :  { %2782 = vmatpush3.bf16.msra.mxu1 %v2848_v39 }
 0x624   :  { %v2058_v48 = vrot.slane %v2051_v61, %v3087_v2  ;;  %v2066_v0 = vrot.slane %v2606_v62, %v3087_v2  ;;  %v2074_v1 = vrot.slane %v2067_v63, %v3087_v2  ;;  %v2082_v58 = vrot.slane %v2607_v53, %v3087_v2  ;;  %2783 = vmatprep.subr.bf16.mxu1 %v2932_v15 }
 0x626   :  { %v2084_v40 = vcombine.high %v2058_v48, %v2066_v0  ;;  %v2100_v5 = vcombine.high %v2074_v1, %v2082_v58  ;;  %v2083_v54 = vcombine.low %v2058_v48, %v2066_v0  ;;  %v2099_v55 = vcombine.low %v2074_v1, %v2082_v58 }
 0x628   :  { %v3394_v27 = vrot.slane %v2084_v40, %v3090_v9  ;;  %v3397_v6 = vrot.slane %v2100_v5, %v3090_v9  ;;  %v3400_v7 = vrot.slane %v2083_v54, %v3090_v9  ;;  %v3403_v57 = vrot.slane %v2099_v55, %v3090_v9  ;;  %v2849_v5 = vld [vmem:[%s3555_s4 + $0x8] sm:$0xff]  }
 0x629   :  { %2784 = vmatpush3.bf16.msra.mxu1 %v2849_v5  ;;  %v2327_v5 = vsub.s32 4, %v3025_v24 }
 0x62a   :  { %v2117_v59 = vcombine.low %v3394_v27, %v3397_v6  ;;  %v2115_v31 = vcombine.low %v3400_v7, %v3403_v57  ;;  %v2116_v35 = vcombine.high %v3400_v7, %v3403_v57  ;;  %v2118_v3 = vcombine.high %v3394_v27, %v3397_v6  ;;  %2797 = vmatprep.subr.bf16.mxu1 %v2932_v15  ;;  %v2610_v57 = vld [vmem:[%s3556_s5] ss:$0 sm:$0xff]  ;;  %s2944_s5 = smov [#allocation2]  }
 0x62b   :  { %v2289_v7 = vsub.s32 2, %v3025_v24  ;;  %s2563_s21 = sshll.u32 %s2944_s5, 4  ;;  %s2564_s21 = int_to_ptr.vmem [resolvable:$true] %s2563_s21 }
 0x62c   :  { %p2913_p1 = scmp.lt.s32.totalorder %s2564_s21, %s2564_s21 }
 0x656   :  { %v1771_v36 = vpop.f32.mrb[20].mxu1  ;;  %v1817_v10 = vpop.f32.mrb[32].mxu0 }
 0x657   :  { %v2761_v4 = vpop.f32.mrb[21].mxu1  ;;  %v2767_v8 = vpop.f32.mrb[33].mxu0 }
 0x658   :  { %v1774_v11 = vpop.f32.mrb[22].mxu1  ;;  %v1820_v12 = vpop.f32.mrb[34].mxu0 }
 0x659   :  { %v2762_v34 = vpop.f32.mrb[23].mxu1  ;;  %v2768_v18 = vpop.f32.mrb[35].mxu0 }
 0x65e   :  { %v1909_v19 = vpop.f32.mrb[36].mxu0 }
 0x65f   :  { %v1999_v45 = vcombine.low %v1817_v10, %v1909_v19  ;;  %v2000_v46 = vcombine.high %v1817_v10, %v1909_v19  ;;  %v2779_v47 = vpop.f32.mrb[37].mxu0 }
 0x660   :  { %v1912_v51 = vpop.f32.mrb[38].mxu0 }
 0x661   :  { %v2780_v13 = vpop.f32.mrb[39].mxu0  ;;  %v2007_v21 = vrot.slane %v1999_v45, %v3087_v2  ;;  %v2014_v22 = vrot.slane %v2000_v46, %v3087_v2 }
 0x67e   :  { %v1863_v38 = vpop.f32.mrb[24].mxu1 }
 0x67f   :  { %v1983_v50 = vcombine.low %v1771_v36, %v1863_v38  ;;  %v1984_v49 = vcombine.high %v1771_v36, %v1863_v38  ;;  %v2773_v14 = vpop.f32.mrb[25].mxu1 }
 0x680   :  { %v1866_v20 = vpop.f32.mrb[26].mxu1 }
 0x681   :  { %v1991_v43 = vrot.slane %v1983_v50, %v3087_v2  ;;  %v1998_v23 = vrot.slane %v1984_v49, %v3087_v2  ;;  %v2774_v44 = vpop.f32.mrb[27].mxu1  ;;  %v3459_v20 = vld [vmem:[%s3552_s1 + $0x8] sm:$0x3f] }
 0x683   :  { %v2015_v25 = vcombine.low %v1991_v43, %v2007_v21  ;;  %v2016_v26 = vcombine.high %v1991_v43, %v2007_v21  ;;  %v2031_v28 = vcombine.low %v1998_v23, %v2014_v22  ;;  %v2032_v29 = vcombine.high %v1998_v23, %v2014_v22 }
 0x684   :  { %v2294_v21 = vrot.slane %v3459_v20, %v2289_v7 }
 0x685   :  { %v2023_v52 = vrot.slane %v2015_v25, %v3090_v9  ;;  %v2030_v30 = vrot.slane %v2016_v26, %v3090_v9  ;;  %v2039_v32 = vrot.slane %v2031_v28, %v3090_v9  ;;  %v2046_v33 = vrot.slane %v2032_v29, %v3090_v9  ;;  %v2906_v25 = vld [vmem:[%s3551_s0] sm:$0xff]  ;;  %v2907_v29 = vld [vmem:[%s3551_s0 + $0x8] sm:$0xff] }
 0x687   :  { %v2119_v56 = vcombine.low %v2023_v52, %v2030_v30  ;;  %v2608_v37 = vcombine.high %v2023_v52, %v2030_v30  ;;  %v2135_v16 = vcombine.low %v2039_v32, %v2046_v33  ;;  %v2609_v17 = vcombine.high %v2039_v32, %v2046_v33 }
 0x689   :  { %v2126_v41 = vrot.slane %v2119_v56, %v3087_v2  ;;  %v2134_v42 = vrot.slane %v2608_v37, %v3087_v2  ;;  %v2142_v60 = vrot.slane %v2135_v16, %v3087_v2  ;;  %v2150_v61 = vrot.slane %v2609_v17, %v3087_v2 }
 0x68b   :  { %v2152_v62 = vcombine.high %v2126_v41, %v2134_v42  ;;  %v2168_v63 = vcombine.high %v2142_v60, %v2150_v61  ;;  %v2151_v53 = vcombine.low %v2126_v41, %v2134_v42  ;;  %v2167_v48 = vcombine.low %v2142_v60, %v2150_v61 }
 0x68d   :  { %v2166_v0 = vrot.slane %v2152_v62, %v3090_v9  ;;  %v2182_v1 = vrot.slane %v2168_v63, %v3090_v9  ;;  %v2159_v58 = vrot.slane %v2151_v53, %v3090_v9  ;;  %v2175_v40 = vrot.slane %v2167_v48, %v3090_v9  ;;  %v2850_v62 = vld [vmem:[%s3557_s6] sm:$0xff]   ;;  %v2851_v63 = vld [vmem:[%s3557_s6 + $0x8] sm:$0xff]  }
 0x68e   :  { %2790 = vmatpush3.bf16.msra.mxu0 %v2850_v62 }
 0x68f   :  { %v2185_v2 = vcombine.low %v2166_v0, %v2182_v1  ;;  %v2184_v54 = vcombine.high %v2159_v58, %v2175_v40  ;;  %v2183_v55 = vcombine.low %v2159_v58, %v2175_v40  ;;  %v2186_v27 = vcombine.high %v2166_v0, %v2182_v1  ;;  %2791 = vmatprep.subr.bf16.mxu0 %v2932_v15 }
 0x691   :  { %v2836_v6 = vpack.i.bf16 %v2185_v2, %v2117_v59  ;;  %v2831_v36 = vpack.i.bf16 %v2184_v54, %v2116_v35  ;;  %v2841_v10 = vpack.i.bf16 %v2186_v27, %v2118_v3  ;;  %v2337_v27 = vsub.s32 3, %v3025_v24 }
 0x692   :  { %2792 = vmatpush3.bf16.msra.mxu0 %v2851_v63 }
 0x693   :  { %2837 = vrot.lane.b32.xlu1 %v2836_v6, %s2941_s14  ;;  %2832 = vrot.lane.b32.xlu0 %v2831_v36, %s2942_s15  ;;  %v2332_v6 = vrot.slane %v3459_v20, %v2327_v5 }
 0x697   :  { %2842 = vrot.lane.b32.xlu0 %v2841_v10, %s2943_s16 }
 0x705   :  { %v2838_v9 = vpop.permute.xlu1 %2837  ;;  %v2833_v4 = vpop.permute.xlu0 %2832 }
 0x706   :  { %v2835_v8 = vunpack.i.h.bf16 %v2833_v4  ;;  %v2834_v11 = vunpack.i.l.bf16 %v2833_v4  ;;  %v2840_v12 = vunpack.i.h.bf16 %v2838_v9  ;;  %v2839_v34 = vunpack.i.l.bf16 %v2838_v9 }
 0x708   :  { %v2211_v59 = vsel %vm1081_vm2, %v2115_v31, %v2834_v11  ;;  %v2212_v35 = vsel %vm1081_vm2, %v2183_v55, %v2835_v8  ;;  %v3453_v31 = vld [vmem:[%s3552_s1] sm:$0x3f]  ;;  %v2342_v8 = vrot.slane %v3459_v20, %v2337_v27 }
 0x709   :  { %v2843_v3 = vpop.permute.xlu0 %2842  ;;  %v2214_v45 = vsel %vm2213_vm4, %v2211_v59, %v2839_v34  ;;  %v2215_v46 = vsel %vm2213_vm4, %v2212_v35, %v2840_v12  ;;  %v2290_v38 = vrot.slane %v3453_v31, %v2289_v7  ;;  %v2328_v54 = vrot.slane %v3453_v31, %v2327_v5  ;;  %v2852_v35 = vld [vmem:[%s3559_s8] sm:$0xff]  }
 0x70a   :  { %v2845_v18 = vunpack.i.h.bf16 %v2843_v3  ;;  %v2844_v19 = vunpack.i.l.bf16 %v2843_v3  ;;  %v2338_v4 = vrot.slane %v3453_v31, %v2337_v27  ;;  %v2853_v3 = vld [vmem:[%s3559_s8 + $0x8] sm:$0xff]  }
 0x70c   :  { %v2217_v47 = vsel %vm2216_vm5, %v2214_v45, %v2844_v19  ;;  %v2218_v51 = vsel %vm2216_vm5, %v2215_v46, %v2845_v18  ;;  %v2854_v18 = vld [vmem:[%s3559_s8 + $0x10] sm:$0xff]   ;;  %v2855_v19 = vld [vmem:[%s3559_s8 + $0x18] sm:$0xff]   ;;  %v2856_v45 = vld [vmem:[%s3559_s8 + $0x20] sm:$0xff]  }
 0x70d   :  { %v2219_v13 = vpack.c.bf16 %v2218_v51, %v2217_v47  ;;  %v2857_v46 = vld [vmem:[%s3559_s8 + $0x28] sm:$0xff]   ;;  %v2858_v47 = vld [vmem:[%s3559_s8 + $0x30] sm:$0xff]   ;;  %v2859_v51 = vld [vmem:[%s3559_s8 + $0x38] sm:$0xff]  }
 0x70f   :  { %2786 = vmatmul.mubr.msk.bf16.vlgmr.msra.gmra.mrb[28].mxu1 %vm41_vm0, %v2219_v13  ;;  %v2614_v13 = vld [vmem:[%s3558_s7] ss:$0 sm:$0xff] }
 0x710   :  { %2813 = vmatprep.mubr.msk.bf16.mxu1 %vm2933_vm1, %v2932_v15  ;;  %2798 = vmatpush3.bf16.msra.mxu1 %v2852_v35 }
 0x711   :  { %2799 = vmatprep.subr.bf16.mxu1 %v2932_v15 }
 0x714   :  { %2800 = vmatpush3.bf16.msra.mxu1 %v2853_v3 }
 0x715   :  { %2801 = vmatprep.subr.bf16.mxu1 %v2932_v15 }
 0x718   :  { %2802 = vmatpush3.bf16.msra.mxu1 %v2854_v18 }
 0x719   :  { %2803 = vmatprep.subr.bf16.mxu1 %v2932_v15 }
 0x71c   :  { %2804 = vmatpush3.bf16.msra.mxu1 %v2855_v19 }
 0x71d   :  { %2805 = vmatprep.subr.bf16.mxu1 %v2932_v15 }
 0x720   :  { %2806 = vmatpush3.bf16.msra.mxu1 %v2856_v45 }
 0x721   :  { %2807 = vmatprep.subr.bf16.mxu1 %v2932_v15 }
 0x724   :  { %2808 = vmatpush3.bf16.msra.mxu1 %v2857_v46 }
 0x725   :  { %2809 = vmatprep.subr.bf16.mxu1 %v2932_v15 }
 0x728   :  { %2810 = vmatpush3.bf16.msra.mxu1 %v2858_v47 }
 0x729   :  { %2811 = vmatprep.subr.bf16.mxu1 %v2932_v15 }
 0x72c   :  { %2812 = vmatpush3.bf16.msra.mxu1 %v2859_v51 }
 0x7e2   :  { %v2280_v50 = vpop.f32.mrb[28].mxu1 }
 0x7e3   :  { %v2281_v49 = vadd.f32 %v2610_v57, %v2280_v50  ;;  %v2787_v14 = vpop.f32.mrb[29].mxu1 }
 0x7e4   :  { %v2283_v22 = vpop.f32.mrb[30].mxu1 }
 0x7e5   :  { %v2295_v43 = vmul.f32 %v2290_v38, %v2281_v49  ;;  %v2284_v23 = vadd.f32 %v2610_v57, %v2283_v22  ;;  %v2788_v44 = vpop.f32.mrb[31].mxu1 }
 0x7e7   :  { %v3465_v26 = vadd.f32 %v2906_v25, %v2295_v43  ;;  %v2296_v28 = vmul.f32 %v2294_v21, %v2284_v23 }
 0x7e9   :  { %v3470_v52 = vadd.f32 %v2907_v29, %v2296_v28  ;;  %v2299_v30 = vsel %vm41_vm0, %v3465_v26, 0.0 }
 0x7ea   :  { %2300 = vadd.xlane.f32.xlu1 %v2299_v30 }
 0x7eb   :  { %v2302_v32 = vsel %vm41_vm0, %v3470_v52, 0.0 }
 0x7ec   :  { %2303 = vadd.xlane.f32.xlu0 %v2302_v32 }
 0x877   :  { %v2301_v33 = vpop.xlane.xlu1 %2300 }
 0x878   :  { %v2305_v56 = vmul.f32 0.03125, %v2301_v33 }
 0x879   :  { %v2304_v37 = vpop.xlane.xlu0 %2303 }
 0x87a   :  { %v2307_v16 = vsub.f32 %v3465_v26, %v2305_v56  ;;  %v2306_v17 = vmul.f32 0.03125, %v2304_v37 }
 0x87c   :  { %v2308_v39 = vsub.f32 %v3470_v52, %v2306_v17  ;;  %v2309_v41 = vmul.f32 %v2307_v16, %v2307_v16 }
 0x87e   :  { %v2311_v42 = vsel %vm41_vm0, %v2309_v41, 0.0  ;;  %v2310_v60 = vmul.f32 %v2308_v39, %v2308_v39 }
 0x87f   :  { %2312 = vadd.xlane.f32.xlu0 %v2311_v42 }
 0x880   :  { %v2314_v61 = vsel %vm41_vm0, %v2310_v60, 0.0  ;;  %v2546_v60 = vsub.s32 5, %v3025_v24 }
 0x882   :  { %v2547_v62 = vrot.slane %v3453_v31, %v2546_v60 }
 0x883   :  { %2315 = vadd.xlane.f32.xlu0 %v2314_v61  ;;  %v2618_v61 = vld [vmem:[%s3560_s9] ss:$0 sm:$0xff]  ;;  %s2908_s9 = scalar_lea.vmem %s2564_s21, 256 }
 0x884   :  { %p2909_p0 = scmp.ne.s32.totalorder %s2564_s21, %s2908_s9  ;;  %p2914_p2 = scmp.lt.s32.totalorder %s2908_s9, %s2908_s9 }
 0x886   :  { %p2915_p3 = por %p2914_p2, %p2913_p1 }
 0x888   :  { %p2916_p4 = pnand %p2915_p3, %p2909_p0 }
 0x90c   :  { %v2313_v53 = vpop.xlane.xlu0 %2312 }
 0x90d   :  { %v2317_v48 = vmul.f32 0.03125, %v2313_v53 }
 0x90f   :  { %v2319_v0 = vadd.f32 1e-06, %v2317_v48 }
 0x910   :  { %v2316_v1 = vpop.xlane.xlu0 %2315 }
 0x911   :  { %2896 = vrsqrt.f32 %v2319_v0  ;;  %v2318_v58 = vmul.f32 0.03125, %v2316_v1  ;;  %v2551_v0 = vrot.slane %v3459_v20, %v2546_v60 }
 0x913   :  { %v2320_v40 = vadd.f32 1e-06, %v2318_v58 }
 0x915   :  { %2898 = vrsqrt.f32 %v2320_v40 }
 0x91b   :  { %v2897_v2 = vpop.eup %2896 }
 0x91c   :  { %v2323_v55 = vmul.f32 %v2897_v2, %v2307_v16 }
 0x91e   :  { %v2333_v10 = vmul.f32 %v2328_v54, %v2323_v55 }
 0x91f   :  { %v2899_v36 = vpop.eup %2898 }
 0x920   :  { %v2324_v9 = vmul.f32 %v2899_v36, %v2308_v39  ;;  %v2343_v12 = vadd.f32 %v2338_v4, %v2333_v10 }
 0x922   :  { %v2334_v11 = vmul.f32 %v2332_v6, %v2324_v9 }
 0x924   :  { %v2344_v34 = vadd.f32 %v2342_v8, %v2334_v11 }
 0x926   :  { %v2345_v59 = vpack.c.bf16 %v2344_v34, %v2343_v12 }
 0x928   :  { %2794 = vmatmul.mubr.msk.bf16.vlgmr.msra.gmra.mrb[40].mxu0 %vm41_vm0, %v2345_v59 }
 0x9fb   :  { %v2406_v7 = vpop.f32.mrb[40].mxu0 }
 0x9fc   :  { %v2407_v57 = vadd.f32 %v2614_v13, %v2406_v7  ;;  %v2795_v38 = vpop.f32.mrb[41].mxu0 }
 0x9fd   :  { %v2409_v50 = vpop.f32.mrb[42].mxu0 }
 0x9fe   :  { %v2415_v49 = vmul.f32 0.044715, %v2407_v57  ;;  %v2410_v14 = vadd.f32 %v2614_v13, %v2409_v50  ;;  %v2796_v21 = vpop.f32.mrb[43].mxu0  ;;  %v2413_v37 = vmul.f32 0.5, %v2407_v57 }
 0xa00   :  { %v2417_v22 = vmul.f32 %v2415_v49, %v2407_v57  ;;  %v2416_v43 = vmul.f32 0.044715, %v2410_v14  ;;  %v2414_v16 = vmul.f32 0.5, %v2410_v14 }
 0xa02   :  { %v2419_v23 = vmul.f32 %v2417_v22, %v2407_v57  ;;  %v2418_v44 = vmul.f32 %v2416_v43, %v2410_v14 }
 0xa04   :  { %v2421_v25 = vadd.f32 %v2419_v23, %v2407_v57  ;;  %v2420_v28 = vmul.f32 %v2418_v44, %v2410_v14 }
 0xa06   :  { %v2423_v29 = vmul.f32 0.7978846, %v2421_v25  ;;  %v2422_v15 = vadd.f32 %v2420_v28, %v2410_v14 }
 0xa08   :  { %2900 = vtanh.f32 %v2423_v29  ;;  %v2424_v30 = vmul.f32 0.7978846, %v2422_v15 }
 0xa0a   :  { %2902 = vtanh.f32 %v2424_v30 }
 0xa12   :  { %v2901_v32 = vpop.eup %2900 }
 0xa13   :  { %v2427_v33 = vadd.f32 1.0, %v2901_v32 }
 0xa14   :  { %v2903_v56 = vpop.eup %2902 }
 0xa15   :  { %v2428_v17 = vadd.f32 1.0, %v2903_v56  ;;  %v2429_v39 = vmul.f32 %v2427_v33, %v2413_v37 }
 0xa17   :  { %v2430_v41 = vmul.f32 %v2428_v17, %v2414_v16 }
 0xa19   :  { %v2431_v42 = vpack.c.bf16 %v2430_v41, %v2429_v39 }
 0xa1b   :  { %2814 = vmatmul.mubr.bf16.vlgmr.msra.gmra.mrb[32].mxu1 %v2431_v42 }
 0xaee   :  { %v2537_v63 = vpop.f32.mrb[32].mxu1 }
 0xaef   :  { %v2538_v53 = vadd.f32 %v2618_v61, %v2537_v63  ;;  %v2815_v48 = vpop.f32.mrb[33].mxu1 }
 0xaf0   :  { %v2540_v1 = vpop.f32.mrb[34].mxu1 }
 0xaf1   :  { %v2552_v58 = vmul.f32 %v2547_v62, %v2538_v53  ;;  %v2541_v40 = vadd.f32 %v2618_v61, %v2540_v1  ;;  %v2816_v5 = vpop.f32.mrb[35].mxu1 }
 0xaf3   :  { %v2554_v2 = vadd.f32 %v2552_v58, %v3465_v26  ;;  %v2553_v24 = vmul.f32 %v2551_v0, %v2541_v40 }
 0xaf5   :  { %2556 = vst.msk [vmem:[#allocation2] sm:$0xff] %vm41_vm0, %v2554_v2  ;;  %v2555_v54 = vadd.f32 %v2553_v24, %v3470_v52 }
 0xaf7   :  { %2557 = vst.msk [vmem:[#allocation2 + $0x8] sm:$0xff] %vm41_vm0, %v2555_v54 }
 0xaf8   :  { %2919 = shalt.err (!%p2916_p4)
}
 0xaf9   :  { %s2920_s0 = scalar_lea.hbm %s3561_s10, 256 }
 0xafa   :  { %p2921_p5 = scmp.ne.s32.totalorder %s3561_s10, %s2920_s0  ;;  %p2924_p6 = scmp.lt.u32.totalorder %s2920_s0, %s3561_s10 }
 0xafc   :  { %p2926_p7 = pnand %p2924_p6, %p2921_p5 }
 0xafe   :  { %2929 = shalt.err (!%p2926_p7)
}
 0xaff   :  { %s2945_s26 = smov 128  }
 0xb00   :  { %2569 = dma.vmem_to_hbm [thread:$0]  %s2564_s21, 256, %s3561_s10, [#allocation3], %s2945_s26, %s2945_s26, %s2942_s15  }
 0xb01   :  { %2930 = dma.done.wait [#allocation3], 256  }
 0xb02   :  { %2931 = vsyncadd [#allocation3], 4294967040 }
 0xb03   :  { %2573 = vsyncpa [#allocation3], 1 }

// kernel: tpu_custom_call.1
= control target key start
LH: loop header
LB: loop body
LE: loop exit
PB: predicated region body
PF: predicated region fallthrough
CT: control target
= control target key end

     0   :  { %vm41_vm0 = vcmask 261120   ;;  %s3551_s0 = inlined_call_operand.vmem [shape: f32[2,8,32], index: 0, kind: input, shape index: {}]   ;;  %s3552_s1 = inlined_call_operand.vmem [shape: f32[2,6,32], index: 1, kind: input, shape index: {}]   ;;  %s3553_s2 = inlined_call_operand.vmem [shape: bf16[32,96], index: 2, kind: input, shape index: {}]   ;;  %s3554_s3 = inlined_call_operand.vmem [shape: f32[1,96], index: 3, kind: input, shape index: {}]   ;;  %s3555_s4 = inlined_call_operand.vmem [shape: bf16[32,32], index: 4, kind: input, shape index: {}]   ;;  %s3556_s5 = inlined_call_operand.vmem [shape: f32[1,32], index: 5, kind: input, shape index: {}]   ;;  %s3557_s6 = inlined_call_operand.vmem [shape: bf16[32,128], index: 6, kind: input, shape index: {}]   ;;  %s3558_s7 = inlined_call_operand.vmem [shape: f32[1,128], index: 7, kind: input, shape index: {}]   ;;  %s3559_s8 = inlined_call_operand.vmem [shape: bf16[128,32], index: 8, kind: input, shape index: {}]   ;;  %s3560_s9 = inlined_call_operand.vmem [shape: f32[1,32], index: 9, kind: input, shape index: {}]   ;;  %s3561_s10 = inlined_call_operand.hbm [shape: f32[2,8,32], index: 10, kind: output, shape index: {}]  }
   0x1   :  { %v37_v0 = vld [vmem:[%s3551_s0] sm:$0xff]  ;;  %v38_v1 = vld [vmem:[%s3551_s0 + $0x8] sm:$0xff] }
   0x2   :  { %v42_v2 = vsel %vm41_vm0, %v37_v0, 0.0  ;;  %v45_v3 = vsel %vm41_vm0, %v38_v1, 0.0 }
   0x3   :  { %43 = vadd.xlane.f32.xlu0 %v42_v2 }
   0x7   :  { %46 = vadd.xlane.f32.xlu0 %v45_v3 }
   0x8   :  { %15 = vsyncpa [#allocation3], 0  ;;  %v2846_v14 = vld [vmem:[%s3553_s2] sm:$0xff]   ;;  %v2932_v15 = vmov 0.0   ;;  %v2847_v16 = vld [vmem:[%s3553_s2 + $0x8] sm:$0xff]   ;;  %vm2933_vm1 = vmmov 0   ;;  %v69_v21 = vlaneseq }
   0x9   :  { %2677 = vmatprep.subr.bf16.mxu0 %v2932_v15  ;;  %2697 = vmatprep.subr.bf16.mxu1 %v2932_v15  ;;  %v39_v26 = vld [vmem:[%s3552_s1] sm:$0x3f]  ;;  %v40_v28 = vld [vmem:[%s3552_s1 + $0x8] sm:$0x3f]  ;;  %s2934_s26 = smov 112   ;;  %s2935_s27 = smov 120  }
   0xa   :  { %2678 = vmatpush3.bf16.msra.mxu0 %v2846_v14  ;;  %2681 = vmatprep.mubr.msk.bf16.mxu0 %vm2933_vm1, %v2932_v15  ;;  %v3025_v24 = vshrl.u32 %v69_v21, 7  ;;  %v2574_v42 = vld [vmem:[%s3554_s3] ss:$0 sm:$0xff]  ;;  %s2936_s28 = smov 104   ;;  %s2937_s3 = smov 96   ;;  %vm1081_vm2 = vcmask 64512  }
   0xb   :  { %2679 = vmatprep.subr.bf16.mxu0 %v2932_v15  ;;  %2699 = vmatprep.mubr.msk.bf16.mxu1 %vm2933_vm1, %v2932_v15  ;;  %v2938_v57 = vmov 1983009808   ;;  %v2939_v60 = vmov 1934713408   ;;  %s2940_s29 = smov 64   ;;  %vm1549_vm3 = vcmask 1043456  }
   0xc   :  { %v71_v25 = vsub.s32 1, %v3025_v24  ;;  %v81_v31 = vsub.s32 0, %v3025_v24  ;;  %v182_v58 = vunpack.c.l.s4 %v2938_v57  ;;  %v214_v61 = vunpack.c.l.s4 %v2939_v60  ;;  %s2941_s14 = smov 16   ;;  %s2942_s15 = smov 8  }
   0xd   :  { %s2943_s16 = smov 24   ;;  %vm2213_vm4 = vcmask 130048   ;;  %vm2216_vm5 = vcmask 195584  }
   0xe   :  { %2680 = vmatpush3.bf16.msra.mxu0 %v2847_v16  ;;  %v72_v30 = vrot.slane %v39_v26, %v71_v25  ;;  %v76_v32 = vrot.slane %v40_v28, %v71_v25  ;;  %v82_v36 = vrot.slane %v39_v26, %v81_v31  ;;  %v86_v37 = vrot.slane %v40_v28, %v81_v31 }
   0xf   :  { %2685 = vmatprep.subr.bf16.mxu0 %v2932_v15  ;;  %v183_v62 = vunpack.c.0.s8 %v182_v58 }
  0x11   :  { %v3087_v2 = vsub.s32 %v183_v62, %v3025_v24 }
  0x90   :  { %v44_v4 = vpop.xlane.xlu0 %43 }
  0x91   :  { %v49_v5 = vmul.f32 0.03125, %v44_v4 }
  0x93   :  { %v51_v6 = vsub.f32 %v37_v0, %v49_v5 }
  0x94   :  { %v47_v7 = vpop.xlane.xlu0 %46 }
  0x95   :  { %v50_v8 = vmul.f32 0.03125, %v47_v7  ;;  %v53_v9 = vmul.f32 %v51_v6, %v51_v6 }
  0x97   :  { %v52_v10 = vsub.f32 %v38_v1, %v50_v8  ;;  %v55_v11 = vsel %vm41_vm0, %v53_v9, 0.0  ;;  %v215_v1 = vunpack.c.0.s8 %v214_v61 }
  0x98   :  { %56 = vadd.xlane.f32.xlu1 %v55_v11 }
  0x99   :  { %v54_v12 = vmul.f32 %v52_v10, %v52_v10  ;;  %v3090_v9 = vsub.s32 %v215_v1, %v3025_v24 }
  0x9b   :  { %v58_v13 = vsel %vm41_vm0, %v54_v12, 0.0 }
  0x9c   :  { %59 = vadd.xlane.f32.xlu1 %v58_v13 }
 0x125   :  { %v57_v17 = vpop.xlane.xlu1 %56 }
 0x126   :  { %v61_v18 = vmul.f32 0.03125, %v57_v17 }
 0x128   :  { %v63_v19 = vadd.f32 1e-06, %v61_v18 }
 0x129   :  { %v60_v20 = vpop.xlane.xlu1 %59 }
 0x12a   :  { %2860 = vrsqrt.f32 %v63_v19  ;;  %v62_v22 = vmul.f32 0.03125, %v60_v20 }
 0x12c   :  { %v64_v23 = vadd.f32 1e-06, %v62_v22 }
 0x12e   :  { %2862 = vrsqrt.f32 %v64_v23 }
 0x134   :  { %v2861_v27 = vpop.eup %2860 }
 0x135   :  { %v67_v29 = vmul.f32 %v2861_v27, %v51_v6 }
 0x137   :  { %v77_v35 = vmul.f32 %v72_v30, %v67_v29 }
 0x138   :  { %v2863_v33 = vpop.eup %2862 }
 0x139   :  { %v68_v34 = vmul.f32 %v2863_v33, %v52_v10  ;;  %v87_v39 = vadd.f32 %v82_v36, %v77_v35 }
 0x13b   :  { %v78_v38 = vmul.f32 %v76_v32, %v68_v34 }
 0x13d   :  { %v88_v40 = vadd.f32 %v86_v37, %v78_v38 }
 0x13f   :  { %v89_v41 = vpack.c.bf16 %v88_v40, %v87_v39 }
 0x141   :  { %2682 = vmatmul.mubr.msk.bf16.vlgmr.msra.gmra.mrb[0].mxu0 %vm41_vm0, %v89_v41 }
 0x142   :  { %2687 = vmatprep.mubr.msk.bf16.mxu0 %vm2933_vm1, %v2932_v15 }
 0x214   :  { %v150_v43 = vpop.f32.mrb[0].mxu0 }
 0x215   :  { %v3041_v44 = vadd.f32 %v2574_v42, %v150_v43  ;;  %v2683_v45 = vpop.f32.mrb[1].mxu0 }
 0x216   :  { %v153_v46 = vpop.f32.mrb[2].mxu0 }
 0x217   :  { %465 = vrot.lane.b32.xlu1 %v3041_v44, %s2934_s26  ;;  %461 = vrot.lane.b32.xlu0 %v3041_v44, %s2935_s27  ;;  %v2684_v47 = vpop.f32.mrb[3].mxu0  ;;  %v3047_v48 = vadd.f32 %v2574_v42, %v153_v46  ;;  %v157_v51 = vmul.f32 0.35355338, %v3041_v44 }
 0x219   :  { %v3079_v56 = vmul.f32 0.35355338, %v3047_v48 }
 0x21b   :  { %469 = vrot.lane.b32.xlu1 %v3041_v44, %s2936_s28  ;;  %467 = vrot.lane.b32.xlu0 %v3047_v48, %s2934_s26 }
 0x21f   :  { %473 = vrot.lane.b32.xlu0 %v3041_v44, %s2937_s3  ;;  %463 = vrot.lane.b32.xlu1 %v3047_v48, %s2935_s27 }
 0x223   :  { %471 = vrot.lane.b32.xlu1 %v3047_v48, %s2936_s28 }
 0x289   :  { %v3056_v49 = vpop.permute.xlu1 %465  ;;  %v3058_v50 = vpop.permute.xlu0 %461 }
 0x28a   :  { %477 = vrot.lane.b32.xlu0 %v3056_v49, %s2937_s3  ;;  %475 = vrot.lane.b32.xlu1 %v3058_v50, %s2937_s3 }
 0x28d   :  { %v3063_v52 = vpop.permute.xlu1 %469  ;;  %v3072_v54 = vpop.permute.xlu0 %467 }
 0x28e   :  { %161 = vrot.lane.b32.xlu0 %v157_v51, %s2935_s27  ;;  %479 = vrot.lane.b32.xlu1 %v3063_v52, %s2937_s3 }
 0x291   :  { %v3068_v53 = vpop.permute.xlu1 %463  ;;  %v474_v59 = vpop.permute.xlu0 %473 }
 0x292   :  { %173 = vrot.lane.b32.xlu0 %v157_v51, %s2936_s28  ;;  %167 = vrot.lane.b32.xlu1 %v157_v51, %s2934_s26 }
 0x295   :  { %v3074_v55 = vpop.permute.xlu1 %471 }
 0x296   :  { %481 = vrot.lane.b32.xlu1 %v3047_v48, %s2937_s3  ;;  %483 = vrot.lane.b32.xlu0 %v3068_v53, %s2937_s3 }
 0x29a   :  { %485 = vrot.lane.b32.xlu1 %v3072_v54, %s2937_s3  ;;  %487 = vrot.lane.b32.xlu0 %v3074_v55, %s2937_s3 }
 0x29e   :  { %169 = vrot.lane.b32.xlu0 %v3079_v56, %s2934_s26  ;;  %163 = vrot.lane.b32.xlu1 %v3079_v56, %s2935_s27 }
 0x2a2   :  { %175 = vrot.lane.b32.xlu1 %v3079_v56, %s2936_s28 }
 0x2fc   :  { %v478_v63 = vpop.permute.xlu0 %477  ;;  %v476_v0 = vpop.permute.xlu1 %475 }
 0x2fd   :  { %v497_v3 = vcombine.low %v474_v59, %v478_v63  ;;  %v498_v4 = vcombine.high %v474_v59, %v478_v63 }
 0x2ff   :  { %v505_v10 = vrot.slane %v497_v3, %v3087_v2  ;;  %v512_v11 = vrot.slane %v498_v4, %v3087_v2 }
 0x300   :  { %v162_v5 = vpop.permute.xlu0 %161  ;;  %v480_v6 = vpop.permute.xlu1 %479 }
 0x301   :  { %v513_v7 = vcombine.low %v476_v0, %v480_v6  ;;  %v514_v8 = vcombine.high %v476_v0, %v480_v6 }
 0x303   :  { %v521_v12 = vrot.slane %v513_v7, %v3087_v2  ;;  %v528_v13 = vrot.slane %v514_v8, %v3087_v2 }
 0x304   :  { %v174_v14 = vpop.permute.xlu0 %173  ;;  %v168_v16 = vpop.permute.xlu1 %167 }
 0x305   :  { %v529_v17 = vcombine.low %v505_v10, %v521_v12  ;;  %v530_v18 = vcombine.high %v505_v10, %v521_v12  ;;  %v545_v19 = vcombine.low %v512_v11, %v528_v13  ;;  %v546_v20 = vcombine.high %v512_v11, %v528_v13 }
 0x306   :  { %v195_v21 = vcombine.low %v162_v5, %v174_v14  ;;  %v196_v22 = vcombine.high %v162_v5, %v174_v14  ;;  %v179_v23 = vcombine.low %v157_v51, %v168_v16  ;;  %v180_v25 = vcombine.high %v157_v51, %v168_v16 }
 0x307   :  { %v537_v26 = vrot.slane %v529_v17, %v3090_v9  ;;  %v544_v27 = vrot.slane %v530_v18, %v3090_v9  ;;  %v553_v28 = vrot.slane %v545_v19, %v3090_v9  ;;  %v560_v29 = vrot.slane %v546_v20, %v3090_v9 }
 0x308   :  { %v203_v30 = vrot.slane %v195_v21, %v3087_v2  ;;  %v210_v31 = vrot.slane %v196_v22, %v3087_v2  ;;  %v187_v32 = vrot.slane %v179_v23, %v3087_v2  ;;  %v194_v33 = vrot.slane %v180_v25, %v3087_v2  ;;  %v484_v34 = vpop.permute.xlu0 %483  ;;  %v482_v35 = vpop.permute.xlu1 %481 }
 0x309   :  { %v633_v36 = vcombine.low %v537_v26, %v544_v27  ;;  %v2582_v37 = vcombine.high %v537_v26, %v544_v27  ;;  %v649_v38 = vcombine.low %v553_v28, %v560_v29  ;;  %v2583_v39 = vcombine.high %v553_v28, %v560_v29 }
 0x30a   :  { %v211_v40 = vcombine.low %v187_v32, %v203_v30  ;;  %v212_v41 = vcombine.high %v187_v32, %v203_v30  ;;  %v227_v42 = vcombine.low %v194_v33, %v210_v31  ;;  %v228_v43 = vcombine.high %v194_v33, %v210_v31 }
 0x30b   :  { %v3105_v45 = vrot.slane %v633_v36, %v3087_v2  ;;  %v3108_v46 = vrot.slane %v2582_v37, %v3087_v2  ;;  %v3111_v47 = vrot.slane %v649_v38, %v3087_v2  ;;  %v3114_v51 = vrot.slane %v2583_v39, %v3087_v2 }
 0x30c   :  { %v219_v57 = vrot.slane %v211_v40, %v3090_v9  ;;  %v226_v58 = vrot.slane %v212_v41, %v3090_v9  ;;  %v235_v59 = vrot.slane %v227_v42, %v3090_v9  ;;  %v242_v60 = vrot.slane %v228_v43, %v3090_v9  ;;  %v488_v61 = vpop.permute.xlu0 %487  ;;  %v486_v62 = vpop.permute.xlu1 %485 }
 0x30d   :  { %v581_v63 = vcombine.low %v484_v34, %v488_v61  ;;  %v582_v0 = vcombine.high %v484_v34, %v488_v61  ;;  %v565_v1 = vcombine.low %v482_v35, %v486_v62  ;;  %v566_v3 = vcombine.high %v482_v35, %v486_v62 }
 0x30e   :  { %v315_v4 = vcombine.low %v219_v57, %v226_v58  ;;  %v2578_v5 = vcombine.high %v219_v57, %v226_v58  ;;  %v331_v6 = vcombine.low %v235_v59, %v242_v60  ;;  %v2579_v7 = vcombine.high %v235_v59, %v242_v60 }
 0x30f   :  { %v589_v8 = vrot.slane %v581_v63, %v3087_v2  ;;  %v596_v10 = vrot.slane %v582_v0, %v3087_v2  ;;  %v573_v11 = vrot.slane %v565_v1, %v3087_v2  ;;  %v580_v12 = vrot.slane %v566_v3, %v3087_v2 }
 0x310   :  { %v322_v13 = vrot.slane %v315_v4, %v3087_v2  ;;  %v330_v14 = vrot.slane %v2578_v5, %v3087_v2  ;;  %v3127_v16 = vrot.slane %v331_v6, %v3087_v2  ;;  %v3130_v17 = vrot.slane %v2579_v7, %v3087_v2  ;;  %v170_v18 = vpop.permute.xlu0 %169  ;;  %v164_v19 = vpop.permute.xlu1 %163 }
 0x311   :  { %v597_v20 = vcombine.low %v573_v11, %v589_v8  ;;  %v598_v21 = vcombine.high %v573_v11, %v589_v8  ;;  %v613_v22 = vcombine.low %v580_v12, %v596_v10  ;;  %v614_v23 = vcombine.high %v580_v12, %v596_v10 }
 0x312   :  { %v347_v25 = vcombine.low %v322_v13, %v330_v14  ;;  %v247_v26 = vcombine.low %v3079_v56, %v170_v18  ;;  %v248_v27 = vcombine.high %v3079_v56, %v170_v18  ;;  %v363_v32 = vcombine.low %v3127_v16, %v3130_v17 }
 0x313   :  { %v605_v28 = vrot.slane %v597_v20, %v3090_v9  ;;  %v612_v29 = vrot.slane %v598_v21, %v3090_v9  ;;  %v621_v30 = vrot.slane %v613_v22, %v3090_v9  ;;  %v628_v31 = vrot.slane %v614_v23, %v3090_v9 }
 0x314   :  { %v255_v33 = vrot.slane %v247_v26, %v3087_v2  ;;  %v176_v34 = vpop.permute.xlu1 %175  ;;  %v665_v35 = vcombine.low %v3105_v45, %v3108_v46  ;;  %v681_v56 = vcombine.low %v3111_v47, %v3114_v51  ;;  %v262_v39 = vrot.slane %v248_v27, %v3087_v2 }
 0x315   :  { %v701_v36 = vcombine.low %v605_v28, %v612_v29  ;;  %v2584_v37 = vcombine.high %v605_v28, %v612_v29  ;;  %v717_v38 = vcombine.low %v621_v30, %v628_v31  ;;  %v263_v40 = vcombine.low %v164_v19, %v176_v34 }
 0x316   :  { %v264_v41 = vcombine.high %v164_v19, %v176_v34  ;;  %v673_v42 = vrot.slane %v665_v35, %v3090_v9  ;;  %v689_v43 = vrot.slane %v681_v56, %v3090_v9  ;;  %v2585_v60 = vcombine.high %v621_v30, %v628_v31 }
 0x317   :  { %v3149_v57 = vrot.slane %v701_v36, %v3087_v2  ;;  %v3152_v58 = vrot.slane %v2584_v37, %v3087_v2  ;;  %v3155_v59 = vrot.slane %v717_v38, %v3087_v2  ;;  %v271_v61 = vrot.slane %v263_v40, %v3087_v2 }
 0x318   :  { %v278_v62 = vrot.slane %v264_v41, %v3087_v2  ;;  %v697_v63 = vcombine.low %v673_v42, %v689_v43  ;;  %v666_v0 = vcombine.high %v3105_v45, %v3108_v46  ;;  %v682_v1 = vcombine.high %v3111_v47, %v3114_v51 }
 0x319   :  { %v355_v3 = vrot.slane %v347_v25, %v3090_v9  ;;  %v371_v4 = vrot.slane %v363_v32, %v3090_v9  ;;  %v348_v5 = vcombine.high %v322_v13, %v330_v14  ;;  %v279_v6 = vcombine.low %v255_v33, %v271_v61 }
 0x31a   :  { %v280_v7 = vcombine.high %v255_v33, %v271_v61  ;;  %v295_v8 = vcombine.low %v262_v39, %v278_v62  ;;  %v296_v10 = vcombine.high %v262_v39, %v278_v62  ;;  %v732_v11 = vrot.slane %v2585_v60, %v3087_v2 }
 0x31b   :  { %v769_v12 = vpack.c.bf16 %v697_v63, %v697_v63  ;;  %v680_v18 = vrot.slane %v666_v0, %v3090_v9  ;;  %v696_v19 = vrot.slane %v682_v1, %v3090_v9  ;;  %v287_v45 = vrot.slane %v279_v6, %v3090_v9 }
 0x31c   :  { %v294_v46 = vrot.slane %v280_v7, %v3090_v9  ;;  %v303_v47 = vrot.slane %v295_v8, %v3090_v9  ;;  %v310_v51 = vrot.slane %v296_v10, %v3090_v9  ;;  %v379_v20 = vcombine.low %v355_v3, %v371_v4 }
 0x31d   :  { %v1086_v13 = vsel %vm1081_vm2, %v769_v12, 0  ;;  %v699_v14 = vcombine.low %v680_v18, %v696_v19  ;;  %v362_v21 = vrot.slane %v348_v5, %v3090_v9  ;;  %v364_v28 = vcombine.high %v3127_v16, %v3130_v17 }
 0x31e   :  { %v383_v22 = vcombine.low %v287_v45, %v294_v46  ;;  %v2580_v23 = vcombine.high %v287_v45, %v294_v46  ;;  %v399_v25 = vcombine.low %v303_v47, %v310_v51  ;;  %v2581_v26 = vcombine.high %v303_v47, %v310_v51  ;;  %2686 = vmatpush3.bf16.xpose.msra.mxu0 %v1086_v13 }
 0x31f   :  { %v771_v27 = vpack.c.bf16 %v699_v14, %v699_v14  ;;  %2691 = vmatprep.subr.bf16.mxu0 %v2932_v15  ;;  %v698_v29 = vcombine.high %v673_v42, %v689_v43  ;;  %v733_v30 = vcombine.low %v3149_v57, %v3152_v58  ;;  %v378_v56 = vrot.slane %v364_v28, %v3090_v9 }
 0x320   :  { %v390_v31 = vrot.slane %v383_v22, %v3087_v2  ;;  %v398_v32 = vrot.slane %v2580_v23, %v3087_v2  ;;  %v406_v33 = vrot.slane %v399_v25, %v3087_v2  ;;  %v414_v34 = vrot.slane %v2581_v26, %v3087_v2 }
 0x321   :  { %v1178_v35 = vsel %vm1081_vm2, %v771_v27, 0  ;;  %v770_v36 = vpack.c.bf16 %v698_v29, %v698_v29  ;;  %v451_v16 = vpack.c.bf16 %v379_v20, %v379_v20  ;;  %v381_v17 = vcombine.low %v362_v21, %v378_v56 }
 0x322   :  { %v415_v37 = vcombine.low %v390_v31, %v398_v32  ;;  %v431_v38 = vcombine.low %v406_v33, %v414_v34  ;;  %2698 = vmatpush3.bf16.xpose.msra.mxu1 %v1178_v35  ;;  %v741_v39 = vrot.slane %v733_v30, %v3090_v9  ;;  %v749_v40 = vcombine.low %v3155_v59, %v732_v11 }
 0x323   :  { %2709 = vmatprep.subr.bf16.mxu1 %v2932_v15  ;;  %v1132_v41 = vsel %vm1081_vm2, %v770_v36, 0  ;;  %v700_v43 = vcombine.high %v680_v18, %v696_v19  ;;  %v734_v60 = vcombine.high %v3149_v57, %v3152_v58  ;;  %v750_v61 = vcombine.high %v3155_v59, %v732_v11 }
 0x324   :  { %v757_v42 = vrot.slane %v749_v40, %v3090_v9  ;;  %v380_v62 = vcombine.high %v355_v3, %v371_v4  ;;  %v423_v63 = vrot.slane %v415_v37, %v3090_v9  ;;  %v439_v0 = vrot.slane %v431_v38, %v3090_v9 }
 0x325   :  { %2688 = vmatmul.mubr.msk.bf16.vlgmr.msra.gmra.mrb[4].mxu0 %vm1081_vm2, %v451_v16  ;;  %v453_v1 = vpack.c.bf16 %v381_v17, %v381_v17  ;;  %v748_v6 = vrot.slane %v734_v60, %v3090_v9  ;;  %v764_v7 = vrot.slane %v750_v61, %v3090_v9  ;;  %v772_v58 = vpack.c.bf16 %v700_v43, %v700_v43 }
 0x326   :  { %2692 = vmatpush3.bf16.xpose.msra.mxu0 %v1132_v41  ;;  %2693 = vmatprep.mubr.msk.bf16.mxu0 %vm2933_vm1, %v2932_v15  ;;  %v765_v5 = vcombine.low %v741_v39, %v757_v42  ;;  %v452_v3 = vpack.c.bf16 %v380_v62, %v380_v62  ;;  %v447_v4 = vcombine.low %v423_v63, %v439_v0 }
 0x327   :  { %2703 = vmatprep.subr.bf16.mxu0 %v2932_v15  ;;  %v767_v8 = vcombine.low %v748_v6, %v764_v7  ;;  %v416_v10 = vcombine.high %v390_v31, %v398_v32  ;;  %v432_v11 = vcombine.high %v406_v33, %v414_v34  ;;  %v1224_v12 = vsel %vm1081_vm2, %v772_v58, 0 }
 0x328   :  { %v773_v57 = vpack.c.bf16 %v765_v5, %v765_v5  ;;  %v766_v18 = vcombine.high %v741_v39, %v757_v42  ;;  %v382_v19 = vcombine.high %v362_v21, %v378_v56  ;;  %v455_v45 = vpack.c.bf16 %v447_v4, %v447_v4 }
 0x329   :  { %2700 = vmatmul.mubr.msk.bf16.vlgmr.msra.gmra.mrb[0].mxu1 %vm1081_vm2, %v453_v1  ;;  %v775_v46 = vpack.c.bf16 %v767_v8, %v767_v8  ;;  %v430_v51 = vrot.slane %v416_v10, %v3090_v9  ;;  %v446_v13 = vrot.slane %v432_v11, %v3090_v9  ;;  %v768_v23 = vcombine.high %v748_v6, %v764_v7 }
 0x32a   :  { %2711 = vmatprep.mubr.msk.bf16.mxu1 %vm2933_vm1, %v2932_v15  ;;  %v1270_v59 = vsel %vm1081_vm2, %v773_v57, 0  ;;  %v774_v47 = vpack.c.bf16 %v766_v18, %v766_v18  ;;  %v454_v20 = vpack.c.bf16 %v382_v19, %v382_v19  ;;  %v448_v25 = vcombine.high %v423_v63, %v439_v0 }
 0x32b   :  { %2710 = vmatpush3.bf16.xpose.msra.mxu1 %v1270_v59  ;;  %v1362_v14 = vsel %vm1081_vm2, %v775_v46, 0  ;;  %v449_v22 = vcombine.low %v430_v51, %v446_v13  ;;  %v776_v27 = vpack.c.bf16 %v768_v23, %v768_v23  ;;  %v450_v30 = vcombine.high %v430_v51, %v446_v13 }
 0x32c   :  { %2721 = vmatprep.subr.bf16.mxu1 %v2932_v15  ;;  %v1316_v21 = vsel %vm1081_vm2, %v774_v47, 0  ;;  %v456_v28 = vpack.c.bf16 %v448_v25, %v448_v25 }
 0x32d   :  { %2694 = vmatmul.mubr.msk.bf16.vlgmr.msra.gmra.mrb[8].mxu0 %vm1081_vm2, %v452_v3  ;;  %v457_v26 = vpack.c.bf16 %v449_v22, %v449_v22  ;;  %v1408_v29 = vsel %vm1081_vm2, %v776_v27, 0  ;;  %v458_v31 = vpack.c.bf16 %v450_v30, %v450_v30 }
 0x32e   :  { %2704 = vmatpush3.bf16.xpose.msra.mxu0 %v1224_v12  ;;  %2705 = vmatprep.mubr.msk.bf16.mxu0 %vm2933_vm1, %v2932_v15 }
 0x32f   :  { %2715 = vmatprep.subr.bf16.mxu0 %v2932_v15 }
 0x332   :  { %2712 = vmatmul.mubr.msk.bf16.vlgmr.msra.gmra.mrb[4].mxu1 %vm1081_vm2, %v455_v45 }
 0x333   :  { %2722 = vmatpush3.bf16.xpose.msra.mxu1 %v1362_v14  ;;  %2723 = vmatprep.mubr.msk.bf16.mxu1 %vm2933_vm1, %v2932_v15 }
 0x334   :  { %2733 = vmatprep.subr.bf16.mxu1 %v2932_v15 }
 0x335   :  { %2706 = vmatmul.mubr.msk.bf16.vlgmr.msra.gmra.mrb[12].mxu0 %vm1081_vm2, %v454_v20 }
 0x336   :  { %2716 = vmatpush3.bf16.xpose.msra.mxu0 %v1316_v21  ;;  %2717 = vmatprep.mubr.msk.bf16.mxu0 %vm2933_vm1, %v2932_v15 }
 0x337   :  { %2727 = vmatprep.subr.bf16.mxu0 %v2932_v15 }
 0x33a   :  { %2724 = vmatmul.mubr.msk.bf16.vlgmr.msra.gmra.mrb[8].mxu1 %vm1081_vm2, %v457_v26 }
 0x33b   :  { %2735 = vmatprep.mubr.msk.bf16.mxu1 %vm2933_vm1, %v2932_v15 }
 0x33d   :  { %2718 = vmatmul.mubr.msk.bf16.vlgmr.msra.gmra.mrb[16].mxu0 %vm1081_vm2, %v456_v28 }
 0x33e   :  { %2728 = vmatpush3.bf16.xpose.msra.mxu0 %v1408_v29  ;;  %2729 = vmatprep.mubr.msk.bf16.mxu0 %vm2933_vm1, %v2932_v15 }
 0x33f   :  { %2739 = vmatprep.subr.bf16.mxu0 %v2932_v15 }
 0x345   :  { %2730 = vmatmul.mubr.msk.bf16.vlgmr.msra.gmra.mrb[20].mxu0 %vm1081_vm2, %v458_v31 }
 0x346   :  { %2741 = vmatprep.mubr.msk.bf16.mxu0 %vm2933_vm1, %v2932_v15 }
 0x3f8   :  { %v1122_v32 = vpop.f32.mrb[4].mxu0 }
 0x3f9   :  { %v2689_v33 = vpop.f32.mrb[5].mxu0  ;;  %v1450_v34 = vsel %vm1081_vm2, %v1122_v32, -inf }
 0x3fa   :  { %1451 = vmax.xlane.f32.xlu0 %v1450_v34  ;;  %v1125_v35 = vpop.f32.mrb[6].mxu0 }
 0x3fb   :  { %v2690_v56 = vpop.f32.mrb[7].mxu0 }
 0x3fc   :  { %v1214_v36 = vpop.f32.mrb[0].mxu1 }
 0x3fd   :  { %v2701_v37 = vpop.f32.mrb[1].mxu1  ;;  %v1456_v38 = vsel %vm1081_vm2, %v1214_v36, -inf }
 0x3fe   :  { %v1217_v16 = vpop.f32.mrb[2].mxu1  ;;  %1457 = vmax.xlane.f32.xlu0 %v1456_v38 }
 0x3ff   :  { %v2702_v17 = vpop.f32.mrb[3].mxu1 }
 0x400   :  { %v1168_v39 = vpop.f32.mrb[8].mxu0 }
 0x401   :  { %v2695_v40 = vpop.f32.mrb[9].mxu0  ;;  %v1453_v41 = vsel %vm1081_vm2, %v1168_v39, -inf }
 0x402   :  { %1454 = vmax.xlane.f32.xlu1 %v1453_v41  ;;  %v1171_v42 = vpop.f32.mrb[10].mxu0 }
 0x403   :  { %v2696_v43 = vpop.f32.mrb[11].mxu0 }
 0x405   :  { %v1306_v60 = vpop.f32.mrb[4].mxu1 }
 0x406   :  { %v2713_v61 = vpop.f32.mrb[5].mxu1  ;;  %v1462_v62 = vsel %vm1081_vm2, %v1306_v60, -inf }
 0x407   :  { %v1309_v63 = vpop.f32.mrb[6].mxu1  ;;  %1463 = vmax.xlane.f32.xlu0 %v1462_v62 }
 0x408   :  { %v1260_v0 = vpop.f32.mrb[12].mxu0  ;;  %v2714_v1 = vpop.f32.mrb[7].mxu1 }
 0x409   :  { %v2707_v5 = vpop.f32.mrb[13].mxu0  ;;  %v1459_v6 = vsel %vm1081_vm2, %v1260_v0, -inf }
 0x40a   :  { %v1263_v7 = vpop.f32.mrb[14].mxu0 }
 0x40b   :  { %v2708_v57 = vpop.f32.mrb[15].mxu0  ;;  %1460 = vmax.xlane.f32.xlu0 %v1459_v6 }
 0x40d   :  { %v3239_v58 = vpop.f32.mrb[8].mxu1 }
 0x40e   :  { %v2725_v59 = vpop.f32.mrb[9].mxu1  ;;  %v1468_v3 = vsel %vm1081_vm2, %v3239_v58, -inf }
 0x40f   :  { %v1401_v4 = vpop.f32.mrb[10].mxu1  ;;  %1469 = vmax.xlane.f32.xlu0 %v1468_v3 }
 0x410   :  { %v1352_v8 = vpop.f32.mrb[16].mxu0  ;;  %v2726_v10 = vpop.f32.mrb[11].mxu1 }
 0x411   :  { %v2719_v11 = vpop.f32.mrb[17].mxu0  ;;  %v1465_v51 = vsel %vm1081_vm2, %v1352_v8, -inf }
 0x412   :  { %v1355_v12 = vpop.f32.mrb[18].mxu0 }
 0x413   :  { %779 = vrot.lane.b32.xlu1 %v3058_v50, %s2940_s29  ;;  %v2720_v18 = vpop.f32.mrb[19].mxu0 }
 0x417   :  { %781 = vrot.lane.b32.xlu1 %v3056_v49, %s2940_s29 }
 0x418   :  { %v3247_v19 = vpop.f32.mrb[20].mxu0 }
 0x419   :  { %v2731_v45 = vpop.f32.mrb[21].mxu0  ;;  %v1471_v13 = vsel %vm1081_vm2, %v3247_v19, -inf }
 0x41a   :  { %v1447_v46 = vpop.f32.mrb[22].mxu0 }
 0x41b   :  { %v2732_v47 = vpop.f32.mrb[23].mxu0 }
 0x425   :  { %777 = vrot.lane.b32.xlu0 %v3041_v44, %s2940_s29 }
 0x43b   :  { %1466 = vmax.xlane.f32.xlu1 %v1465_v51 }
 0x43f   :  { %1472 = vmax.xlane.f32.xlu1 %v1471_v13 }
 0x450   :  { %783 = vrot.lane.b32.xlu1 %v3063_v52, %s2940_s29 }
 0x487   :  { %v1452_v50 = vpop.xlane.xlu0 %1451 }
 0x488   :  { %v1474_v49 = vsub.f32 %v1122_v32, %v1452_v50 }
 0x48a   :  { %v1482_v14 = vmul.f32 1.442695, %v1474_v49 }
 0x48b   :  { %v1458_v20 = vpop.xlane.xlu0 %1457 }
 0x48c   :  { %2864 = vpow2.f32 %v1482_v14  ;;  %v1476_v21 = vsub.f32 %v1214_v36, %v1458_v20 }
 0x48e   :  { %v1486_v22 = vmul.f32 1.442695, %v1476_v21 }
 0x48f   :  { %v1455_v23 = vpop.xlane.xlu1 %1454 }
 0x490   :  { %2866 = vpow2.f32 %v1486_v22  ;;  %v1475_v44 = vsub.f32 %v1168_v39, %v1455_v23 }
 0x492   :  { %v1484_v25 = vmul.f32 1.442695, %v1475_v44 }
 0x493   :  { %v780_v17 = vpop.permute.xlu1 %779 }
 0x494   :  { %2868 = vpow2.f32 %v1484_v25  ;;  %v1464_v26 = vpop.xlane.xlu0 %1463 }
 0x495   :  { %v1478_v28 = vsub.f32 %v1306_v60, %v1464_v26 }
 0x496   :  { %v3256_v27 = vpop.eup %2864 }
 0x497   :  { %v1498_v29 = vsel %vm1081_vm2, %v3256_v27, 0.0  ;;  %v1490_v52 = vmul.f32 1.442695, %v1478_v28  ;;  %v782_v39 = vpop.permute.xlu1 %781 }
 0x498   :  { %1499 = vadd.xlane.f32.xlu0 %v1498_v29  ;;  %v1461_v30 = vpop.xlane.xlu0 %1460 }
 0x499   :  { %2870 = vpow2.f32 %v1490_v52  ;;  %v1477_v32 = vsub.f32 %v1260_v0, %v1461_v30 }
 0x49a   :  { %v3260_v31 = vpop.eup %2866 }
 0x49b   :  { %v1504_v33 = vsel %vm1081_vm2, %v3260_v31, 0.0  ;;  %v1488_v34 = vmul.f32 1.442695, %v1477_v32 }
 0x49c   :  { %1505 = vadd.xlane.f32.xlu0 %v1504_v33  ;;  %v3282_v40 = vpop.xlane.xlu0 %1469 }
 0x49d   :  { %2872 = vpow2.f32 %v1488_v34 }
 0x49e   :  { %v3264_v35 = vpop.eup %2868 }
 0x49f   :  { %v1501_v56 = vsel %vm1081_vm2, %v3264_v35, 0.0 }
 0x4a0   :  { %1502 = vadd.xlane.f32.xlu1 %v1501_v56  ;;  %v778_v60 = vpop.permute.xlu0 %777 }
 0x4a1   :  { %v801_v62 = vcombine.low %v778_v60, %v782_v39  ;;  %v802_v63 = vcombine.high %v778_v60, %v782_v39 }
 0x4a3   :  { %v3268_v36 = vpop.eup %2870 }
 0x4a4   :  { %v1510_v37 = vsel %vm1081_vm2, %v3268_v36, 0.0 }
 0x4a5   :  { %1511 = vadd.xlane.f32.xlu0 %v1510_v37 }
 0x4a7   :  { %v3272_v38 = vpop.eup %2872 }
 0x4a8   :  { %v1507_v16 = vsel %vm1081_vm2, %v3272_v38, 0.0 }
 0x4a9   :  { %1508 = vadd.xlane.f32.xlu1 %v1507_v16 }
 0x4ba   :  { %787 = vrot.lane.b32.xlu1 %v3068_v53, %s2940_s29 }
 0x4be   :  { %789 = vrot.lane.b32.xlu1 %v3072_v54, %s2940_s29  ;;  %v809_v54 = vrot.slane %v801_v62, %v3087_v2 }
 0x4c2   :  { %791 = vrot.lane.b32.xlu1 %v3074_v55, %s2940_s29  ;;  %v816_v55 = vrot.slane %v802_v63, %v3087_v2 }
 0x4c8   :  { %v1467_v41 = vpop.xlane.xlu1 %1466 }
 0x4c9   :  { %v1479_v42 = vsub.f32 %v1352_v8, %v1467_v41  ;;  %v1480_v41 = vsub.f32 %v3239_v58, %v3282_v40 }
 0x4cb   :  { %v1492_v43 = vmul.f32 1.442695, %v1479_v42  ;;  %v1494_v42 = vmul.f32 1.442695, %v1480_v41 }
 0x4cc   :  { %v1473_v61 = vpop.xlane.xlu1 %1472 }
 0x4cd   :  { %2874 = vpow2.f32 %v1492_v43  ;;  %v1481_v53 = vsub.f32 %v3247_v19, %v1473_v61 }
 0x4cf   :  { %v1496_v57 = vmul.f32 1.442695, %v1481_v53 }
 0x4d0   :  { %v784_v0 = vpop.permute.xlu1 %783 }
 0x4d1   :  { %v817_v1 = vcombine.low %v780_v17, %v784_v0  ;;  %v818_v5 = vcombine.high %v780_v17, %v784_v0  ;;  %2876 = vpow2.f32 %v1496_v57 }
 0x4d2   :  { %2878 = vpow2.f32 %v1494_v42 }
 0x4d3   :  { %v825_v6 = vrot.slane %v817_v1, %v3087_v2  ;;  %v832_v7 = vrot.slane %v818_v5, %v3087_v2 }
 0x4d5   :  { %v833_v59 = vcombine.low %v809_v54, %v825_v6  ;;  %v834_v3 = vcombine.high %v809_v54, %v825_v6  ;;  %v849_v4 = vcombine.low %v816_v55, %v832_v7  ;;  %v850_v8 = vcombine.high %v816_v55, %v832_v7 }
 0x4d7   :  { %v3289_v10 = vpop.eup %2874  ;;  %v841_v11 = vrot.slane %v833_v59, %v3090_v9  ;;  %v848_v12 = vrot.slane %v834_v3, %v3090_v9  ;;  %v857_v18 = vrot.slane %v849_v4, %v3090_v9  ;;  %v864_v19 = vrot.slane %v850_v8, %v3090_v9 }
 0x4d8   :  { %v1513_v45 = vsel %vm1081_vm2, %v3289_v10, 0.0 }
 0x4d9   :  { %v937_v46 = vcombine.low %v841_v11, %v848_v12  ;;  %v2586_v47 = vcombine.high %v841_v11, %v848_v12  ;;  %v953_v51 = vcombine.low %v857_v18, %v864_v19  ;;  %v2587_v13 = vcombine.high %v857_v18, %v864_v19  ;;  %1514 = vadd.xlane.f32.xlu0 %v1513_v45 }
 0x4db   :  { %v944_v50 = vrot.slane %v937_v46, %v3087_v2  ;;  %v952_v49 = vrot.slane %v2586_v47, %v3087_v2  ;;  %v960_v14 = vrot.slane %v953_v51, %v3087_v2  ;;  %v968_v20 = vrot.slane %v2587_v13, %v3087_v2  ;;  %v3305_v34 = vpop.eup %2876 }
 0x4dc   :  { %v1519_v39 = vsel %vm1081_vm2, %v3305_v34, 0.0  ;;  %v3317_v43 = vpop.eup %2878 }
 0x4dd   :  { %v969_v21 = vcombine.low %v944_v50, %v952_v49  ;;  %v985_v22 = vcombine.low %v960_v14, %v968_v20  ;;  %v970_v23 = vcombine.high %v944_v50, %v952_v49  ;;  %v986_v44 = vcombine.high %v960_v14, %v968_v20 }
 0x4de   :  { %v1516_v60 = vsel %vm1081_vm2, %v3317_v43, 0.0 }
 0x4df   :  { %v977_v25 = vrot.slane %v969_v21, %v3090_v9  ;;  %v993_v26 = vrot.slane %v985_v22, %v3090_v9  ;;  %v984_v28 = vrot.slane %v970_v23, %v3090_v9  ;;  %v1000_v29 = vrot.slane %v986_v44, %v3090_v9 }
 0x4e1   :  { %v1001_v52 = vcombine.low %v977_v25, %v993_v26  ;;  %v1002_v30 = vcombine.high %v977_v25, %v993_v26  ;;  %v1003_v32 = vcombine.low %v984_v28, %v1000_v29  ;;  %v1004_v33 = vcombine.high %v984_v28, %v1000_v29 }
 0x4e3   :  { %v1073_v56 = vpack.c.bf16 %v1001_v52, %v1001_v52  ;;  %v1074_v37 = vpack.c.bf16 %v1002_v30, %v1002_v30  ;;  %v1075_v0 = vpack.c.bf16 %v1003_v32, %v1003_v32  ;;  %v1076_v6 = vpack.c.bf16 %v1004_v33, %v1004_v33 }
 0x4e5   :  { %v1551_v16 = vsel %vm1549_vm3, %v1073_v56, 0  ;;  %v1597_v17 = vsel %vm1549_vm3, %v1074_v37, 0  ;;  %v1643_v40 = vsel %vm1549_vm3, %v1075_v0, 0  ;;  %v1689_v59 = vsel %vm1549_vm3, %v1076_v6, 0 }
 0x4e6   :  { %2734 = vmatpush3.bf16.msra.mxu1 %v1551_v16  ;;  %2740 = vmatpush3.bf16.msra.mxu0 %v1597_v17 }
 0x4e7   :  { %1520 = vadd.xlane.f32.xlu1 %v1519_v39  ;;  %2745 = vmatprep.subr.bf16.mxu1 %v2932_v15 }
 0x4e8   :  { %2751 = vmatprep.subr.bf16.mxu0 %v2932_v15 }
 0x4ef   :  { %785 = vrot.lane.b32.xlu0 %v3047_v48, %s2940_s29 }
 0x50e   :  { %1517 = vadd.xlane.f32.xlu0 %v1516_v60 }
 0x525   :  { %v1500_v61 = vpop.xlane.xlu0 %1499 }
 0x526   :  { %2880 = vrcp.f32 %v1500_v61 }
 0x529   :  { %v1506_v62 = vpop.xlane.xlu0 %1505 }
 0x52a   :  { %2882 = vrcp.f32 %v1506_v62 }
 0x52d   :  { %v1503_v63 = vpop.xlane.xlu1 %1502 }
 0x52e   :  { %2884 = vrcp.f32 %v1503_v63 }
 0x530   :  { %v2881_v53 = vpop.eup %2880 }
 0x531   :  { %v1530_v48 = vmul.f32 %v2881_v53, %v3256_v27 }
 0x532   :  { %v1512_v11 = vpop.xlane.xlu0 %1511 }
 0x533   :  { %v1538_v1 = vpack.c.bf16 %v1530_v48, %v1530_v48 }
 0x534   :  { %v2883_v58 = vpop.eup %2882 }
 0x535   :  { %2736 = vmatmul.mubr.msk.bf16.vlgmr.msra.gmra.mrb[12].mxu1 %vm1081_vm2, %v1538_v1  ;;  %v1532_v5 = vmul.f32 %v2883_v58, %v3260_v31 }
 0x536   :  { %2746 = vmatpush3.bf16.msra.mxu1 %v1643_v40  ;;  %2747 = vmatprep.mubr.msk.bf16.mxu1 %vm2933_vm1, %v2932_v15  ;;  %v1509_v54 = vpop.xlane.xlu1 %1508 }
 0x537   :  { %2757 = vmatprep.subr.bf16.mxu1 %v2932_v15  ;;  %2886 = vrcp.f32 %v1509_v54  ;;  %v1540_v57 = vpack.c.bf16 %v1532_v5, %v1532_v5 }
 0x538   :  { %v2885_v55 = vpop.eup %2884  ;;  %2888 = vrcp.f32 %v1512_v11 }
 0x539   :  { %v1531_v27 = vmul.f32 %v2885_v55, %v3264_v35 }
 0x53a   :  { %v788_v4 = vpop.permute.xlu1 %787 }
 0x53b   :  { %v1539_v7 = vpack.c.bf16 %v1531_v27, %v1531_v27 }
 0x53d   :  { %2742 = vmatmul.mubr.msk.bf16.vlgmr.msra.gmra.mrb[24].mxu0 %vm1081_vm2, %v1539_v7  ;;  %2748 = vmatmul.mubr.msk.bf16.vlgmr.msra.gmra.mrb[16].mxu1 %vm1081_vm2, %v1540_v57 }
 0x53e   :  { %2752 = vmatpush3.bf16.msra.mxu0 %v1689_v59  ;;  %2753 = vmatprep.mubr.msk.bf16.mxu0 %vm2933_vm1, %v2932_v15  ;;  %v790_v8 = vpop.permute.xlu1 %789 }
 0x53f   :  { %2763 = vmatprep.subr.bf16.mxu0 %v2932_v15  ;;  %2759 = vmatprep.mubr.msk.bf16.mxu1 %vm2933_vm1, %v2932_v15 }
 0x541   :  { %v2887_v31 = vpop.eup %2886 }
 0x542   :  { %v1533_v35 = vmul.f32 %v2887_v31, %v3272_v38  ;;  %v792_v12 = vpop.permute.xlu1 %791  ;;  %v2889_v60 = vpop.eup %2888 }
 0x543   :  { %v885_v19 = vcombine.low %v788_v4, %v792_v12  ;;  %v886_v45 = vcombine.high %v788_v4, %v792_v12  ;;  %v1534_v5 = vmul.f32 %v2889_v60, %v3268_v36 }
 0x544   :  { %v1541_v3 = vpack.c.bf16 %v1533_v35, %v1533_v35 }
 0x545   :  { %v893_v13 = vrot.slane %v885_v19, %v3087_v2  ;;  %v900_v38 = vrot.slane %v886_v45, %v3087_v2  ;;  %v1542_v31 = vpack.c.bf16 %v1534_v5, %v1534_v5 }
 0x546   :  { %2754 = vmatmul.mubr.msk.bf16.vlgmr.msra.gmra.mrb[28].mxu0 %vm1081_vm2, %v1541_v3 }
 0x547   :  { %2765 = vmatprep.mubr.msk.bf16.mxu0 %vm2933_vm1, %v2932_v15 }
 0x566   :  { %v1515_v18 = vpop.xlane.xlu0 %1514 }
 0x567   :  { %2890 = vrcp.f32 %v1515_v18 }
 0x56a   :  { %v786_v46 = vpop.permute.xlu0 %785 }
 0x56b   :  { %v869_v47 = vcombine.low %v786_v46, %v790_v8  ;;  %v870_v51 = vcombine.high %v786_v46, %v790_v8 }
 0x56d   :  { %v877_v50 = vrot.slane %v869_v47, %v3087_v2  ;;  %v884_v49 = vrot.slane %v870_v51, %v3087_v2 }
 0x56f   :  { %v901_v14 = vcombine.low %v877_v50, %v893_v13  ;;  %v902_v20 = vcombine.high %v877_v50, %v893_v13  ;;  %v917_v21 = vcombine.low %v884_v49, %v900_v38  ;;  %v918_v22 = vcombine.high %v884_v49, %v900_v38 }
 0x571   :  { %v909_v23 = vrot.slane %v901_v14, %v3090_v9  ;;  %v916_v44 = vrot.slane %v902_v20, %v3090_v9  ;;  %v925_v25 = vrot.slane %v917_v21, %v3090_v9  ;;  %v932_v26 = vrot.slane %v918_v22, %v3090_v9  ;;  %v2891_v48 = vpop.eup %2890 }
 0x572   :  { %v1535_v54 = vmul.f32 %v2891_v48, %v3289_v10 }
 0x573   :  { %v1005_v28 = vcombine.low %v909_v23, %v916_v44  ;;  %v2588_v29 = vcombine.high %v909_v23, %v916_v44  ;;  %v1021_v52 = vcombine.low %v925_v25, %v932_v26  ;;  %v2589_v30 = vcombine.high %v925_v25, %v932_v26 }
 0x574   :  { %v1521_v16 = vpop.xlane.xlu1 %1520  ;;  %v1543_v35 = vpack.c.bf16 %v1535_v54, %v1535_v54 }
 0x575   :  { %v1012_v32 = vrot.slane %v1005_v28, %v3087_v2  ;;  %v1020_v33 = vrot.slane %v2588_v29, %v3087_v2  ;;  %v1028_v56 = vrot.slane %v1021_v52, %v3087_v2  ;;  %v1036_v37 = vrot.slane %v2589_v30, %v3087_v2 }
 0x576   :  { %2892 = vrcp.f32 %v1521_v16 }
 0x577   :  { %v1037_v17 = vcombine.low %v1012_v32, %v1020_v33  ;;  %v1053_v39 = vcombine.low %v1028_v56, %v1036_v37  ;;  %v1038_v41 = vcombine.high %v1012_v32, %v1020_v33  ;;  %v1054_v42 = vcombine.high %v1028_v56, %v1036_v37 }
 0x579   :  { %v1045_v61 = vrot.slane %v1037_v17, %v3090_v9  ;;  %v1061_v62 = vrot.slane %v1053_v39, %v3090_v9  ;;  %v1052_v63 = vrot.slane %v1038_v41, %v3090_v9  ;;  %v1068_v53 = vrot.slane %v1054_v42, %v3090_v9 }
 0x57b   :  { %v1069_v0 = vcombine.low %v1045_v61, %v1061_v62  ;;  %v1070_v1 = vcombine.high %v1045_v61, %v1061_v62  ;;  %v1071_v58 = vcombine.low %v1052_v63, %v1068_v53  ;;  %v1072_v40 = vcombine.high %v1052_v63, %v1068_v53 }
 0x57d   :  { %v1077_v55 = vpack.c.bf16 %v1069_v0, %v1069_v0  ;;  %v1078_v27 = vpack.c.bf16 %v1070_v1, %v1070_v1  ;;  %v1079_v57 = vpack.c.bf16 %v1071_v58, %v1071_v58  ;;  %v1080_v59 = vpack.c.bf16 %v1072_v40, %v1072_v40 }
 0x57f   :  { %v1735_v6 = vsel %vm1549_vm3, %v1077_v55, 0  ;;  %v1781_v7 = vsel %vm1549_vm3, %v1078_v27, 0  ;;  %v1827_v36 = vsel %vm1549_vm3, %v1079_v57, 0  ;;  %v1873_v10 = vsel %vm1549_vm3, %v1080_v59, 0 }
 0x580   :  { %2758 = vmatpush3.bf16.msra.mxu1 %v1735_v6  ;;  %2764 = vmatpush3.bf16.msra.mxu0 %v1781_v7  ;;  %v2893_v3 = vpop.eup %2892 }
 0x581   :  { %2769 = vmatprep.subr.bf16.mxu1 %v2932_v15  ;;  %2775 = vmatprep.subr.bf16.mxu0 %v2932_v15  ;;  %v1537_v4 = vmul.f32 %v2893_v3, %v3305_v34 }
 0x583   :  { %2760 = vmatmul.mubr.msk.bf16.vlgmr.msra.gmra.mrb[20].mxu1 %vm1081_vm2, %v1542_v31  ;;  %2766 = vmatmul.mubr.msk.bf16.vlgmr.msra.gmra.mrb[32].mxu0 %vm1081_vm2, %v1543_v35  ;;  %v1545_v8 = vpack.c.bf16 %v1537_v4, %v1537_v4 }
 0x584   :  { %2770 = vmatpush3.bf16.msra.mxu1 %v1827_v36  ;;  %2776 = vmatpush3.bf16.msra.mxu0 %v1873_v10 }
 0x585   :  { %2777 = vmatprep.mubr.msk.bf16.mxu0 %vm2933_vm1, %v2932_v15  ;;  %2771 = vmatprep.mubr.msk.bf16.mxu1 %vm2933_vm1, %v2932_v15 }
 0x586   :  { %2781 = vmatprep.subr.bf16.mxu1 %v2932_v15  ;;  %2789 = vmatprep.subr.bf16.mxu0 %v2932_v15 }
 0x58b   :  { %2778 = vmatmul.mubr.msk.bf16.vlgmr.msra.gmra.mrb[36].mxu0 %vm1081_vm2, %v1545_v8 }
 0x58c   :  { %2793 = vmatprep.mubr.msk.bf16.mxu0 %vm2933_vm1, %v2932_v15 }
 0x59b   :  { %v1518_v11 = vpop.xlane.xlu0 %1517 }
 0x59c   :  { %2894 = vrcp.f32 %v1518_v11 }
 0x5a6   :  { %v2895_v12 = vpop.eup %2894 }
 0x5a7   :  { %v1536_v34 = vmul.f32 %v2895_v12, %v3317_v43 }
 0x5a9   :  { %v1544_v18 = vpack.c.bf16 %v1536_v34, %v1536_v34 }
 0x5ab   :  { %2772 = vmatmul.mubr.msk.bf16.vlgmr.msra.gmra.mrb[24].mxu1 %vm1081_vm2, %v1544_v18 }
 0x5ac   :  { %2785 = vmatprep.mubr.msk.bf16.mxu1 %vm2933_vm1, %v2932_v15 }
 0x608   :  { %v1587_v19 = vpop.f32.mrb[12].mxu1 }
 0x609   :  { %v2737_v45 = vpop.f32.mrb[13].mxu1 }
 0x60a   :  { %v1590_v46 = vpop.f32.mrb[14].mxu1 }
 0x60b   :  { %v2738_v47 = vpop.f32.mrb[15].mxu1 }
 0x610   :  { %v1633_v51 = vpop.f32.mrb[24].mxu0  ;;  %v1679_v13 = vpop.f32.mrb[16].mxu1 }
 0x611   :  { %v1915_v38 = vcombine.low %v1587_v19, %v1679_v13  ;;  %v1916_v50 = vcombine.high %v1587_v19, %v1679_v13  ;;  %v2743_v49 = vpop.f32.mrb[25].mxu0  ;;  %v2749_v14 = vpop.f32.mrb[17].mxu1 }
 0x612   :  { %v1636_v20 = vpop.f32.mrb[26].mxu0  ;;  %v1682_v21 = vpop.f32.mrb[18].mxu1 }
 0x613   :  { %v2744_v22 = vpop.f32.mrb[27].mxu0  ;;  %v2750_v43 = vpop.f32.mrb[19].mxu1  ;;  %v1923_v29 = vrot.slane %v1915_v38, %v3087_v2  ;;  %v1930_v52 = vrot.slane %v1916_v50, %v3087_v2 }
 0x619   :  { %v1725_v23 = vpop.f32.mrb[28].mxu0 }
 0x61a   :  { %v1931_v44 = vcombine.low %v1633_v51, %v1725_v23  ;;  %v1932_v25 = vcombine.high %v1633_v51, %v1725_v23  ;;  %v2755_v26 = vpop.f32.mrb[29].mxu0 }
 0x61b   :  { %v1728_v28 = vpop.f32.mrb[30].mxu0 }
 0x61c   :  { %v1939_v30 = vrot.slane %v1931_v44, %v3087_v2  ;;  %v1946_v32 = vrot.slane %v1932_v25, %v3087_v2  ;;  %v2756_v33 = vpop.f32.mrb[31].mxu0 }
 0x61e   :  { %v1947_v56 = vcombine.low %v1923_v29, %v1939_v30  ;;  %v1948_v37 = vcombine.high %v1923_v29, %v1939_v30  ;;  %v1963_v16 = vcombine.low %v1930_v52, %v1946_v32  ;;  %v1964_v17 = vcombine.high %v1930_v52, %v1946_v32 }
 0x620   :  { %v1955_v39 = vrot.slane %v1947_v56, %v3090_v9  ;;  %v1962_v41 = vrot.slane %v1948_v37, %v3090_v9  ;;  %v1971_v42 = vrot.slane %v1963_v16, %v3090_v9  ;;  %v1978_v60 = vrot.slane %v1964_v17, %v3090_v9 }
 0x622   :  { %v2051_v61 = vcombine.low %v1955_v39, %v1962_v41  ;;  %v2606_v62 = vcombine.high %v1955_v39, %v1962_v41  ;;  %v2067_v63 = vcombine.low %v1971_v42, %v1978_v60  ;;  %v2607_v53 = vcombine.high %v1971_v42, %v1978_v60  ;;  %v2848_v39 = vld [vmem:[%s3555_s4] sm:$0xff]  }
 0x623   :  { %2782 = vmatpush3.bf16.msra.mxu1 %v2848_v39 }
 0x624   :  { %v2058_v48 = vrot.slane %v2051_v61, %v3087_v2  ;;  %v2066_v0 = vrot.slane %v2606_v62, %v3087_v2  ;;  %v2074_v1 = vrot.slane %v2067_v63, %v3087_v2  ;;  %v2082_v58 = vrot.slane %v2607_v53, %v3087_v2  ;;  %2783 = vmatprep.subr.bf16.mxu1 %v2932_v15 }
 0x626   :  { %v2084_v40 = vcombine.high %v2058_v48, %v2066_v0  ;;  %v2100_v5 = vcombine.high %v2074_v1, %v2082_v58  ;;  %v2083_v54 = vcombine.low %v2058_v48, %v2066_v0  ;;  %v2099_v55 = vcombine.low %v2074_v1, %v2082_v58 }
 0x628   :  { %v3394_v27 = vrot.slane %v2084_v40, %v3090_v9  ;;  %v3397_v6 = vrot.slane %v2100_v5, %v3090_v9  ;;  %v3400_v7 = vrot.slane %v2083_v54, %v3090_v9  ;;  %v3403_v57 = vrot.slane %v2099_v55, %v3090_v9  ;;  %v2849_v5 = vld [vmem:[%s3555_s4 + $0x8] sm:$0xff]  }
 0x629   :  { %2784 = vmatpush3.bf16.msra.mxu1 %v2849_v5  ;;  %v2327_v5 = vsub.s32 4, %v3025_v24 }
 0x62a   :  { %v2117_v59 = vcombine.low %v3394_v27, %v3397_v6  ;;  %v2115_v31 = vcombine.low %v3400_v7, %v3403_v57  ;;  %v2116_v35 = vcombine.high %v3400_v7, %v3403_v57  ;;  %v2118_v3 = vcombine.high %v3394_v27, %v3397_v6  ;;  %2797 = vmatprep.subr.bf16.mxu1 %v2932_v15  ;;  %v2610_v57 = vld [vmem:[%s3556_s5] ss:$0 sm:$0xff]  ;;  %s2944_s5 = smov [#allocation2]  }
 0x62b   :  { %v2289_v7 = vsub.s32 2, %v3025_v24  ;;  %s2563_s21 = sshll.u32 %s2944_s5, 4  ;;  %s2564_s21 = int_to_ptr.vmem [resolvable:$true] %s2563_s21 }
 0x62c   :  { %p2913_p1 = scmp.lt.s32.totalorder %s2564_s21, %s2564_s21 }
 0x656   :  { %v1771_v36 = vpop.f32.mrb[20].mxu1  ;;  %v1817_v10 = vpop.f32.mrb[32].mxu0 }
 0x657   :  { %v2761_v4 = vpop.f32.mrb[21].mxu1  ;;  %v2767_v8 = vpop.f32.mrb[33].mxu0 }
 0x658   :  { %v1774_v11 = vpop.f32.mrb[22].mxu1  ;;  %v1820_v12 = vpop.f32.mrb[34].mxu0 }
 0x659   :  { %v2762_v34 = vpop.f32.mrb[23].mxu1  ;;  %v2768_v18 = vpop.f32.mrb[35].mxu0 }
 0x65e   :  { %v1909_v19 = vpop.f32.mrb[36].mxu0 }
 0x65f   :  { %v1999_v45 = vcombine.low %v1817_v10, %v1909_v19  ;;  %v2000_v46 = vcombine.high %v1817_v10, %v1909_v19  ;;  %v2779_v47 = vpop.f32.mrb[37].mxu0 }
 0x660   :  { %v1912_v51 = vpop.f32.mrb[38].mxu0 }
 0x661   :  { %v2780_v13 = vpop.f32.mrb[39].mxu0  ;;  %v2007_v21 = vrot.slane %v1999_v45, %v3087_v2  ;;  %v2014_v22 = vrot.slane %v2000_v46, %v3087_v2 }
 0x67e   :  { %v1863_v38 = vpop.f32.mrb[24].mxu1 }
 0x67f   :  { %v1983_v50 = vcombine.low %v1771_v36, %v1863_v38  ;;  %v1984_v49 = vcombine.high %v1771_v36, %v1863_v38  ;;  %v2773_v14 = vpop.f32.mrb[25].mxu1 }
 0x680   :  { %v1866_v20 = vpop.f32.mrb[26].mxu1 }
 0x681   :  { %v1991_v43 = vrot.slane %v1983_v50, %v3087_v2  ;;  %v1998_v23 = vrot.slane %v1984_v49, %v3087_v2  ;;  %v2774_v44 = vpop.f32.mrb[27].mxu1  ;;  %v3459_v20 = vld [vmem:[%s3552_s1 + $0x8] sm:$0x3f] }
 0x683   :  { %v2015_v25 = vcombine.low %v1991_v43, %v2007_v21  ;;  %v2016_v26 = vcombine.high %v1991_v43, %v2007_v21  ;;  %v2031_v28 = vcombine.low %v1998_v23, %v2014_v22  ;;  %v2032_v29 = vcombine.high %v1998_v23, %v2014_v22 }
 0x684   :  { %v2294_v21 = vrot.slane %v3459_v20, %v2289_v7 }
 0x685   :  { %v2023_v52 = vrot.slane %v2015_v25, %v3090_v9  ;;  %v2030_v30 = vrot.slane %v2016_v26, %v3090_v9  ;;  %v2039_v32 = vrot.slane %v2031_v28, %v3090_v9  ;;  %v2046_v33 = vrot.slane %v2032_v29, %v3090_v9  ;;  %v2906_v25 = vld [vmem:[%s3551_s0] sm:$0xff]  ;;  %v2907_v29 = vld [vmem:[%s3551_s0 + $0x8] sm:$0xff] }
 0x687   :  { %v2119_v56 = vcombine.low %v2023_v52, %v2030_v30  ;;  %v2608_v37 = vcombine.high %v2023_v52, %v2030_v30  ;;  %v2135_v16 = vcombine.low %v2039_v32, %v2046_v33  ;;  %v2609_v17 = vcombine.high %v2039_v32, %v2046_v33 }
 0x689   :  { %v2126_v41 = vrot.slane %v2119_v56, %v3087_v2  ;;  %v2134_v42 = vrot.slane %v2608_v37, %v3087_v2  ;;  %v2142_v60 = vrot.slane %v2135_v16, %v3087_v2  ;;  %v2150_v61 = vrot.slane %v2609_v17, %v3087_v2 }
 0x68b   :  { %v2152_v62 = vcombine.high %v2126_v41, %v2134_v42  ;;  %v2168_v63 = vcombine.high %v2142_v60, %v2150_v61  ;;  %v2151_v53 = vcombine.low %v2126_v41, %v2134_v42  ;;  %v2167_v48 = vcombine.low %v2142_v60, %v2150_v61 }
 0x68d   :  { %v2166_v0 = vrot.slane %v2152_v62, %v3090_v9  ;;  %v2182_v1 = vrot.slane %v2168_v63, %v3090_v9  ;;  %v2159_v58 = vrot.slane %v2151_v53, %v3090_v9  ;;  %v2175_v40 = vrot.slane %v2167_v48, %v3090_v9  ;;  %v2850_v62 = vld [vmem:[%s3557_s6] sm:$0xff]   ;;  %v2851_v63 = vld [vmem:[%s3557_s6 + $0x8] sm:$0xff]  }
 0x68e   :  { %2790 = vmatpush3.bf16.msra.mxu0 %v2850_v62 }
 0x68f   :  { %v2185_v2 = vcombine.low %v2166_v0, %v2182_v1  ;;  %v2184_v54 = vcombine.high %v2159_v58, %v2175_v40  ;;  %v2183_v55 = vcombine.low %v2159_v58, %v2175_v40  ;;  %v2186_v27 = vcombine.high %v2166_v0, %v2182_v1  ;;  %2791 = vmatprep.subr.bf16.mxu0 %v2932_v15 }
 0x691   :  { %v2836_v6 = vpack.i.bf16 %v2185_v2, %v2117_v59  ;;  %v2831_v36 = vpack.i.bf16 %v2184_v54, %v2116_v35  ;;  %v2841_v10 = vpack.i.bf16 %v2186_v27, %v2118_v3  ;;  %v2337_v27 = vsub.s32 3, %v3025_v24 }
 0x692   :  { %2792 = vmatpush3.bf16.msra.mxu0 %v2851_v63 }
 0x693   :  { %2837 = vrot.lane.b32.xlu1 %v2836_v6, %s2941_s14  ;;  %2832 = vrot.lane.b32.xlu0 %v2831_v36, %s2942_s15  ;;  %v2332_v6 = vrot.slane %v3459_v20, %v2327_v5 }
 0x697   :  { %2842 = vrot.lane.b32.xlu0 %v2841_v10, %s2943_s16 }
 0x705   :  { %v2838_v9 = vpop.permute.xlu1 %2837  ;;  %v2833_v4 = vpop.permute.xlu0 %2832 }
 0x706   :  { %v2835_v8 = vunpack.i.h.bf16 %v2833_v4  ;;  %v2834_v11 = vunpack.i.l.bf16 %v2833_v4  ;;  %v2840_v12 = vunpack.i.h.bf16 %v2838_v9  ;;  %v2839_v34 = vunpack.i.l.bf16 %v2838_v9 }
 0x708   :  { %v2211_v59 = vsel %vm1081_vm2, %v2115_v31, %v2834_v11  ;;  %v2212_v35 = vsel %vm1081_vm2, %v2183_v55, %v2835_v8  ;;  %v3453_v31 = vld [vmem:[%s3552_s1] sm:$0x3f]  ;;  %v2342_v8 = vrot.slane %v3459_v20, %v2337_v27 }
 0x709   :  { %v2843_v3 = vpop.permute.xlu0 %2842  ;;  %v2214_v45 = vsel %vm2213_vm4, %v2211_v59, %v2839_v34  ;;  %v2215_v46 = vsel %vm2213_vm4, %v2212_v35, %v2840_v12  ;;  %v2290_v38 = vrot.slane %v3453_v31, %v2289_v7  ;;  %v2328_v54 = vrot.slane %v3453_v31, %v2327_v5  ;;  %v2852_v35 = vld [vmem:[%s3559_s8] sm:$0xff]  }
 0x70a   :  { %v2845_v18 = vunpack.i.h.bf16 %v2843_v3  ;;  %v2844_v19 = vunpack.i.l.bf16 %v2843_v3  ;;  %v2338_v4 = vrot.slane %v3453_v31, %v2337_v27  ;;  %v2853_v3 = vld [vmem:[%s3559_s8 + $0x8] sm:$0xff]  }
 0x70c   :  { %v2217_v47 = vsel %vm2216_vm5, %v2214_v45, %v2844_v19  ;;  %v2218_v51 = vsel %vm2216_vm5, %v2215_v46, %v2845_v18  ;;  %v2854_v18 = vld [vmem:[%s3559_s8 + $0x10] sm:$0xff]   ;;  %v2855_v19 = vld [vmem:[%s3559_s8 + $0x18] sm:$0xff]   ;;  %v2856_v45 = vld [vmem:[%s3559_s8 + $0x20] sm:$0xff]  }
 0x70d   :  { %v2219_v13 = vpack.c.bf16 %v2218_v51, %v2217_v47  ;;  %v2857_v46 = vld [vmem:[%s3559_s8 + $0x28] sm:$0xff]   ;;  %v2858_v47 = vld [vmem:[%s3559_s8 + $0x30] sm:$0xff]   ;;  %v2859_v51 = vld [vmem:[%s3559_s8 + $0x38] sm:$0xff]  }
 0x70f   :  { %2786 = vmatmul.mubr.msk.bf16.vlgmr.msra.gmra.mrb[28].mxu1 %vm41_vm0, %v2219_v13  ;;  %v2614_v13 = vld [vmem:[%s3558_s7] ss:$0 sm:$0xff] }
 0x710   :  { %2813 = vmatprep.mubr.msk.bf16.mxu1 %vm2933_vm1, %v2932_v15  ;;  %2798 = vmatpush3.bf16.msra.mxu1 %v2852_v35 }
 0x711   :  { %2799 = vmatprep.subr.bf16.mxu1 %v2932_v15 }
 0x714   :  { %2800 = vmatpush3.bf16.msra.mxu1 %v2853_v3 }
 0x715   :  { %2801 = vmatprep.subr.bf16.mxu1 %v2932_v15 }
 0x718   :  { %2802 = vmatpush3.bf16.msra.mxu1 %v2854_v18 }
 0x719   :  { %2803 = vmatprep.subr.bf16.mxu1 %v2932_v15 }
 0x71c   :  { %2804 = vmatpush3.bf16.msra.mxu1 %v2855_v19 }
 0x71d   :  { %2805 = vmatprep.subr.bf16.mxu1 %v2932_v15 }
 0x720   :  { %2806 = vmatpush3.bf16.msra.mxu1 %v2856_v45 }
 0x721   :  { %2807 = vmatprep.subr.bf16.mxu1 %v2932_v15 }
 0x724   :  { %2808 = vmatpush3.bf16.msra.mxu1 %v2857_v46 }
 0x725   :  { %2809 = vmatprep.subr.bf16.mxu1 %v2932_v15 }
 0x728   :  { %2810 = vmatpush3.bf16.msra.mxu1 %v2858_v47 }
 0x729   :  { %2811 = vmatprep.subr.bf16.mxu1 %v2932_v15 }
 0x72c   :  { %2812 = vmatpush3.bf16.msra.mxu1 %v2859_v51 }
 0x7e2   :  { %v2280_v50 = vpop.f32.mrb[28].mxu1 }
 0x7e3   :  { %v2281_v49 = vadd.f32 %v2610_v57, %v2280_v50  ;;  %v2787_v14 = vpop.f32.mrb[29].mxu1 }
 0x7e4   :  { %v2283_v22 = vpop.f32.mrb[30].mxu1 }
 0x7e5   :  { %v2295_v43 = vmul.f32 %v2290_v38, %v2281_v49  ;;  %v2284_v23 = vadd.f32 %v2610_v57, %v2283_v22  ;;  %v2788_v44 = vpop.f32.mrb[31].mxu1 }
 0x7e7   :  { %v3465_v26 = vadd.f32 %v2906_v25, %v2295_v43  ;;  %v2296_v28 = vmul.f32 %v2294_v21, %v2284_v23 }
 0x7e9   :  { %v3470_v52 = vadd.f32 %v2907_v29, %v2296_v28  ;;  %v2299_v30 = vsel %vm41_vm0, %v3465_v26, 0.0 }
 0x7ea   :  { %2300 = vadd.xlane.f32.xlu1 %v2299_v30 }
 0x7eb   :  { %v2302_v32 = vsel %vm41_vm0, %v3470_v52, 0.0 }
 0x7ec   :  { %2303 = vadd.xlane.f32.xlu0 %v2302_v32 }
 0x877   :  { %v2301_v33 = vpop.xlane.xlu1 %2300 }
 0x878   :  { %v2305_v56 = vmul.f32 0.03125, %v2301_v33 }
 0x879   :  { %v2304_v37 = vpop.xlane.xlu0 %2303 }
 0x87a   :  { %v2307_v16 = vsub.f32 %v3465_v26, %v2305_v56  ;;  %v2306_v17 = vmul.f32 0.03125, %v2304_v37 }
 0x87c   :  { %v2308_v39 = vsub.f32 %v3470_v52, %v2306_v17  ;;  %v2309_v41 = vmul.f32 %v2307_v16, %v2307_v16 }
 0x87e   :  { %v2311_v42 = vsel %vm41_vm0, %v2309_v41, 0.0  ;;  %v2310_v60 = vmul.f32 %v2308_v39, %v2308_v39 }
 0x87f   :  { %2312 = vadd.xlane.f32.xlu0 %v2311_v42 }
 0x880   :  { %v2314_v61 = vsel %vm41_vm0, %v2310_v60, 0.0  ;;  %v2546_v60 = vsub.s32 5, %v3025_v24 }
 0x882   :  { %v2547_v62 = vrot.slane %v3453_v31, %v2546_v60 }
 0x883   :  { %2315 = vadd.xlane.f32.xlu0 %v2314_v61  ;;  %v2618_v61 = vld [vmem:[%s3560_s9] ss:$0 sm:$0xff]  ;;  %s2908_s9 = scalar_lea.vmem %s2564_s21, 256 }
 0x884   :  { %p2909_p0 = scmp.ne.s32.totalorder %s2564_s21, %s2908_s9  ;;  %p2914_p2 = scmp.lt.s32.totalorder %s2908_s9, %s2908_s9 }
 0x886   :  { %p2915_p3 = por %p2914_p2, %p2913_p1 }
 0x888   :  { %p2916_p4 = pnand %p2915_p3, %p2909_p0 }
 0x90c   :  { %v2313_v53 = vpop.xlane.xlu0 %2312 }
 0x90d   :  { %v2317_v48 = vmul.f32 0.03125, %v2313_v53 }
 0x90f   :  { %v2319_v0 = vadd.f32 1e-06, %v2317_v48 }
 0x910   :  { %v2316_v1 = vpop.xlane.xlu0 %2315 }
 0x911   :  { %2896 = vrsqrt.f32 %v2319_v0  ;;  %v2318_v58 = vmul.f32 0.03125, %v2316_v1  ;;  %v2551_v0 = vrot.slane %v3459_v20, %v2546_v60 }
 0x913   :  { %v2320_v40 = vadd.f32 1e-06, %v2318_v58 }
 0x915   :  { %2898 = vrsqrt.f32 %v2320_v40 }
 0x91b   :  { %v2897_v2 = vpop.eup %2896 }
 0x91c   :  { %v2323_v55 = vmul.f32 %v2897_v2, %v2307_v16 }
 0x91e   :  { %v2333_v10 = vmul.f32 %v2328_v54, %v2323_v55 }
 0x91f   :  { %v2899_v36 = vpop.eup %2898 }
 0x920   :  { %v2324_v9 = vmul.f32 %v2899_v36, %v2308_v39  ;;  %v2343_v12 = vadd.f32 %v2338_v4, %v2333_v10 }
 0x922   :  { %v2334_v11 = vmul.f32 %v2332_v6, %v2324_v9 }
 0x924   :  { %v2344_v34 = vadd.f32 %v2342_v8, %v2334_v11 }
 0x926   :  { %v2345_v59 = vpack.c.bf16 %v2344_v34, %v2343_v12 }
 0x928   :  { %2794 = vmatmul.mubr.msk.bf16.vlgmr.msra.gmra.mrb[40].mxu0 %vm41_vm0, %v2345_v59 }
 0x9fb   :  { %v2406_v7 = vpop.f32.mrb[40].mxu0 }
 0x9fc   :  { %v2407_v57 = vadd.f32 %v2614_v13, %v2406_v7  ;;  %v2795_v38 = vpop.f32.mrb[41].mxu0 }
 0x9fd   :  { %v2409_v50 = vpop.f32.mrb[42].mxu0 }
 0x9fe   :  { %v2415_v49 = vmul.f32 0.044715, %v2407_v57  ;;  %v2410_v14 = vadd.f32 %v2614_v13, %v2409_v50  ;;  %v2796_v21 = vpop.f32.mrb[43].mxu0  ;;  %v2413_v37 = vmul.f32 0.5, %v2407_v57 }
 0xa00   :  { %v2417_v22 = vmul.f32 %v2415_v49, %v2407_v57  ;;  %v2416_v43 = vmul.f32 0.044715, %v2410_v14  ;;  %v2414_v16 = vmul.f32 0.5, %v2410_v14 }
 0xa02   :  { %v2419_v23 = vmul.f32 %v2417_v22, %v2407_v57  ;;  %v2418_v44 = vmul.f32 %v2416_v43, %v2410_v14 }
 0xa04   :  { %v2421_v25 = vadd.f32 %v2419_v23, %v2407_v57  ;;  %v2420_v28 = vmul.f32 %v2418_v44, %v2410_v14 }
 0xa06   :  { %v2423_v29 = vmul.f32 0.7978846, %v2421_v25  ;;  %v2422_v15 = vadd.f32 %v2420_v28, %v2410_v14 }
 0xa08   :  { %2900 = vtanh.f32 %v2423_v29  ;;  %v2424_v30 = vmul.f32 0.7978846, %v2422_v15 }
 0xa0a   :  { %2902 = vtanh.f32 %v2424_v30 }
 0xa12   :  { %v2901_v32 = vpop.eup %2900 }
 0xa13   :  { %v2427_v33 = vadd.f32 1.0, %v2901_v32 }
 0xa14   :  { %v2903_v56 = vpop.eup %2902 }
 0xa15   :  { %v2428_v17 = vadd.f32 1.0, %v2903_v56  ;;  %v2429_v39 = vmul.f32 %v2427_v33, %v2413_v37 }
 0xa17   :  { %v2430_v41 = vmul.f32 %v2428_v17, %v2414_v16 }
 0xa19   :  { %v2431_v42 = vpack.c.bf16 %v2430_v41, %v2429_v39 }
 0xa1b   :  { %2814 = vmatmul.mubr.bf16.vlgmr.msra.gmra.mrb[32].mxu1 %v2431_v42 }
 0xaee   :  { %v2537_v63 = vpop.f32.mrb[32].mxu1 }
 0xaef   :  { %v2538_v53 = vadd.f32 %v2618_v61, %v2537_v63  ;;  %v2815_v48 = vpop.f32.mrb[33].mxu1 }
 0xaf0   :  { %v2540_v1 = vpop.f32.mrb[34].mxu1 }
 0xaf1   :  { %v2552_v58 = vmul.f32 %v2547_v62, %v2538_v53  ;;  %v2541_v40 = vadd.f32 %v2618_v61, %v2540_v1  ;;  %v2816_v5 = vpop.f32.mrb[35].mxu1 }
 0xaf3   :  { %v2554_v2 = vadd.f32 %v2552_v58, %v3465_v26  ;;  %v2553_v24 = vmul.f32 %v2551_v0, %v2541_v40 }
 0xaf5   :  { %2556 = vst.msk [vmem:[#allocation2] sm:$0xff] %vm41_vm0, %v2554_v2  ;;  %v2555_v54 = vadd.f32 %v2553_v24, %v3470_v52 }
 0xaf7   :  { %2557 = vst.msk [vmem:[#allocation2 + $0x8] sm:$0xff] %vm41_vm0, %v2555_v54 }
 0xaf8   :  { %2919 = shalt.err (!%p2916_p4)
}
 0xaf9   :  { %s2920_s0 = scalar_lea.hbm %s3561_s10, 256 }
 0xafa   :  { %p2921_p5 = scmp.ne.s32.totalorder %s3561_s10, %s2920_s0  ;;  %p2924_p6 = scmp.lt.u32.totalorder %s2920_s0, %s3561_s10 }
 0xafc   :  { %p2926_p7 = pnand %p2924_p6, %p2921_p5 }
 0xafe   :  { %2929 = shalt.err (!%p2926_p7)
}
 0xaff   :  { %s2945_s26 = smov 128  }
 0xb00   :  { %2569 = dma.vmem_to_hbm [thread:$0]  %s2564_s21, 256, %s3561_s10, [#allocation3], %s2945_s26, %s2945_s26, %s2942_s15  }
 0xb01   :  { %2930 = dma.done.wait [#allocation3], 256  }
 0xb02   :  { %2931 = vsyncadd [#allocation3], 4294967040 }
 0xb03   :  { %2573 = vsyncpa [#allocation3], 1 }

</bundles_post_ra>
